<compile_context>
chip_gen: v7x
topology: tpu7x:2x2x1
jax: 0.10.0
libtpu: 0.0.40
codegen_flags: <defaults>
</compile_context>

<pallas_src>
import functools

import jax
import jax.numpy as jnp
from jax.experimental import pallas as pl
from jax.experimental.pallas import tpu as pltpu


def _tpu_config():
    """Per-generation (VMEM limit, row-tile cap)."""
    vmem_cap = 64 * 1024 * 1024
    try:
        info = pltpu.get_tpu_info()
        vmem_cap = getattr(info, "vmem_capacity_bytes", vmem_cap)
    except Exception:
        pass
    if vmem_cap >= 96 * 1024 * 1024:          # v5e / v6e: 128 MiB physical VMEM
        return 100 * 1024 * 1024, 2048
    return 44 * 1024 * 1024, 1024             # v7x: 64 MiB physical VMEM


VMEM_LIMIT_BYTES, ROW_TILE_CAP = _tpu_config()


def _round_up(x, m):
    return (x + m - 1) // m * m


# ----------------------------- Pallas kernels --------------------------------------


def _matmul_stats_kernel(x_ref, w_ref, y_ref, sum_ref, ssq_ref, sacc_ref, qacc_ref):
    """y = x(bf16) @ w(bf16) -> f32; accumulate per-channel sum / sum-of-squares in
    VMEM scratch; write the per-core partials once at the last row tile."""
    i = pl.program_id(1)

    @pl.when(i == 0)
    def _():
        sacc_ref[...] = jnp.zeros_like(sacc_ref)
        qacc_ref[...] = jnp.zeros_like(qacc_ref)

    y = jnp.dot(x_ref[...], w_ref[...], preferred_element_type=jnp.float32)
    y_ref[...] = y
    sacc_ref[...] += jnp.sum(y, axis=0, keepdims=True)
    qacc_ref[...] += jnp.sum(y * y, axis=0, keepdims=True)

    @pl.when(i == pl.num_programs(1) - 1)
    def _():
        sum_ref[...] = sacc_ref[...][None]
        ssq_ref[...] = qacc_ref[...][None]


def _scale_shift_kernel(*refs, relu, with_residual):
    """Fused BN apply (precomputed scale/shift) + optional ReLU / residual add."""
    if with_residual:
        y_ref, sc_ref, sh_ref, res_ref, o_ref = refs
    else:
        y_ref, sc_ref, sh_ref, o_ref = refs
    y = y_ref[...] * sc_ref[...] + sh_ref[...]
    if relu:
        y = jnp.maximum(y, 0.0)
    if with_residual:
        y = y + res_ref[...].astype(jnp.float32)
    o_ref[...] = y.astype(o_ref.dtype)


def _final_conv_kernel(x_ref, w_ref, b_ref, o_ref):
    """Final 7x7 conv (bias=True, lane-dense padded channels) + Tanh + out_norm."""
    y = jnp.dot(x_ref[...], w_ref[...], preferred_element_type=jnp.float32) + b_ref[...]
    o_ref[...] = jnp.tanh(y) * 0.5 + 0.5


# ----------------------------- pallas_call wrappers ---------------------------------


def _pallas_matmul_stats(patches, w_mat):
    """Row-tiled bf16 matmul with per-core batch-stat partial accumulation."""
    p, k = patches.shape
    cout = w_mat.shape[1]
    tp = min(ROW_TILE_CAP, _round_up(p, 8))
    p_pad = _round_up(p, tp)
    if p_pad != p:
        # zero rows: y == 0 -> contribute nothing to sum / sum-of-squares
        patches = jnp.pad(patches, ((0, p_pad - p), (0, 0)))
    tiles = p_pad // tp
    n_split = 2 if tiles % 2 == 0 else 1      # v7x megacore split; serial elsewhere
    tps = tiles // n_split

    y, s, ss = pl.pallas_call(
        _matmul_stats_kernel,
        out_shape=(jax.ShapeDtypeStruct((p_pad, cout), jnp.float32),
                   jax.ShapeDtypeStruct((n_split, 1, cout), jnp.float32),
                   jax.ShapeDtypeStruct((n_split, 1, cout), jnp.float32)),
        grid=(n_split, tps),
        in_specs=[
            pl.BlockSpec((tp, k), lambda c, i: (c * tps + i, 0)),
            # TODO(synk): pipeline_mode=pl.Buffered(1) would drop the redundant second
            #             buffer for this constant weight block.
            pl.BlockSpec((k, cout), lambda c, i: (0, 0)),
        ],
        out_specs=(
            pl.BlockSpec((tp, cout), lambda c, i: (c * tps + i, 0)),
            pl.BlockSpec((1, 1, cout), lambda c, i: (c, 0, 0)),
            pl.BlockSpec((1, 1, cout), lambda c, i: (c, 0, 0)),
        ),
        scratch_shapes=[pltpu.VMEM((1, cout), jnp.float32),
                        pltpu.VMEM((1, cout), jnp.float32)],
        compiler_params=pltpu.CompilerParams(
            dimension_semantics=("parallel", "arbitrary"),
            vmem_limit_bytes=VMEM_LIMIT_BYTES),
    )(patches, w_mat)
    return y, s, ss


def _pallas_scale_shift(y, scale, shift, *, relu, residual=None, out_dtype=jnp.bfloat16):
    rows, c = y.shape
    tp = min(ROW_TILE_CAP, _round_up(rows, 8))
    p_pad = _round_up(rows, tp)
    if p_pad != rows:
        y = jnp.pad(y, ((0, p_pad - rows), (0, 0)))
    if residual is not None and residual.shape[0] != p_pad:
        residual = jnp.pad(residual, ((0, p_pad - residual.shape[0]), (0, 0)))

    in_specs = [pl.BlockSpec((tp, c), lambda i: (i, 0)),
                pl.BlockSpec((1, c), lambda i: (0, 0)),
                pl.BlockSpec((1, c), lambda i: (0, 0))]
    args = [y, scale, shift]
    if residual is not None:
        in_specs.append(pl.BlockSpec((tp, c), lambda i: (i, 0)))
        args.append(residual)

    kernel = functools.partial(_scale_shift_kernel, relu=relu,
                               with_residual=residual is not None)
    return pl.pallas_call(
        kernel,
        out_shape=jax.ShapeDtypeStruct((p_pad, c), out_dtype),
        grid=(p_pad // tp,),
        in_specs=in_specs,
        out_specs=pl.BlockSpec((tp, c), lambda i: (i, 0)),
        compiler_params=pltpu.CompilerParams(
            dimension_semantics=("parallel",),          # independent tiles -> megacore
            vmem_limit_bytes=VMEM_LIMIT_BYTES),
    )(*args)


# ----------------------------- layer helpers ---------------------------------------


def _im2col(x_nhwc, k, stride, pad, pad_mode):
    """Extract k*k patches (bf16); feature order (kh, kw, cin) matches HWIO flattening."""
    n, h, w, c = x_nhwc.shape
    if pad > 0:
        x_p = jnp.pad(x_nhwc, ((0, 0), (pad, pad), (pad, pad), (0, 0)), mode=pad_mode)
    else:
        x_p = x_nhwc
    hp, wp = h + 2 * pad, w + 2 * pad
    ho = (hp - k) // stride + 1
    wo = (wp - k) // stride + 1
    cols = []
    for di in range(k):
        for dj in range(k):
            cols.append(x_p[:, di:di + stride * ho:stride, dj:dj + stride * wo:stride, :])
    patches = jnp.concatenate(cols, axis=-1)              # (n, ho, wo, k*k*c)
    return patches.reshape(n * ho * wo, k * k * c), (n, ho, wo)


def _bn_scale_shift(sum_c, ssq_c, gamma, beta, count, eps=1e-5):
    """Fold training-mode batch stats into per-channel scale/shift (tiny (C,) math)."""
    # TODO(synk): E[y^2]-E[y]^2 in f32 can cancel for very large batches; a Welford
    #             per-tile combine would be the fully robust form.
    mean = sum_c / count
    var = jnp.maximum(ssq_c / count - mean * mean, 0.0)
    scale = gamma.reshape(-1) * jax.lax.rsqrt(var + eps)
    shift = beta.reshape(-1) - mean * scale
    return scale.reshape(1, -1).astype(jnp.float32), shift.reshape(1, -1).astype(jnp.float32)


def _conv_bn_act(x_nhwc, w_hwio, gamma, beta, *, stride, pad, pad_mode,
                 relu=True, residual=None):
    kh, kw, cin, cout = w_hwio.shape
    patches, (n, ho, wo) = _im2col(x_nhwc, kh, stride, pad, pad_mode)
    w_mat = w_hwio.reshape(kh * kw * cin, cout).astype(jnp.bfloat16)
    y, s, ss = _pallas_matmul_stats(patches.astype(jnp.bfloat16), w_mat)
    count = n * ho * wo
    scale, shift = _bn_scale_shift(jnp.sum(s, axis=(0, 1)), jnp.sum(ss, axis=(0, 1)),
                                   gamma, beta, count)
    res = residual.reshape(count, cout) if residual is not None else None
    out = _pallas_scale_shift(y, scale, shift, relu=relu, residual=res)
    return out[:count].reshape(n, ho, wo, cout)


# Subpixel phases for ConvTranspose2d(k=3, s=2, p=1, output_padding=1):
#   out[2i+a, 2j+b] = sum over ((dh,dw),(kh,kw)) of x[i+dh, j+dw] @ w[kh, kw]
_SUBPIXEL_TAPS = {
    (0, 0): (((0, 0), (1, 1)),),
    (0, 1): (((0, 0), (1, 0)), ((0, 1), (1, 2))),
    (1, 0): (((0, 0), (0, 1)), ((1, 0), (2, 1))),
    (1, 1): (((0, 0), (0, 0)), ((0, 1), (0, 2)), ((1, 0), (2, 0)), ((1, 1), (2, 2))),
}


def _convtranspose_bn_relu(x_nhwc, w_hwio, gamma, beta):
    """ConvTranspose + BN + ReLU via 4-phase subpixel decomposition (no zero-stuffing)."""
    n, h, w, cin = x_nhwc.shape
    cout = w_hwio.shape[3]
    xp = jnp.pad(x_nhwc, ((0, 0), (0, 1), (0, 1), (0, 0)))        # bottom/right halo
    w_bf = w_hwio.astype(jnp.bfloat16)
    count = n * (2 * h) * (2 * w)

    out = jnp.zeros((n, 2 * h, 2 * w, cout), jnp.float32)
    sum_c = jnp.zeros((cout,), jnp.float32)
    ssq_c = jnp.zeros((cout,), jnp.float32)
    for (a, b), taps in _SUBPIXEL_TAPS.items():
        pat = jnp.concatenate([xp[:, dh:dh + h, dw:dw + w, :] for (dh, dw), _ in taps],
                              axis=-1).reshape(n * h * w, len(taps) * cin)
        wm = jnp.concatenate([w_bf[kh, kw] for _, (kh, kw) in taps], axis=0)
        y, s, ss = _pallas_matmul_stats(pat, wm)
        out = out.at[:, a::2, b::2, :].set(y[:n * h * w].reshape(n, h, w, cout))
        sum_c = sum_c + jnp.sum(s, axis=(0, 1))
        ssq_c = ssq_c + jnp.sum(ss, axis=(0, 1))

    scale, shift = _bn_scale_shift(sum_c, ssq_c, gamma, beta, count)
    o = _pallas_scale_shift(out.reshape(count, cout), scale, shift, relu=True)
    return o[:count].reshape(n, 2 * h, 2 * w, cout)


def _final_conv(x_nhwc, w_hwio, bias):
    kh, kw, cin, cout = w_hwio.shape
    patches, (n, ho, wo) = _im2col(x_nhwc, kh, 1, 3, "reflect")
    patches = patches.astype(jnp.bfloat16)
    cpad = _round_up(cout, 128)                                   # lane-dense stores
    w_mat = jnp.zeros((kh * kw * cin, cpad), jnp.bfloat16)
    w_mat = w_mat.at[:, :cout].set(w_hwio.reshape(-1, cout).astype(jnp.bfloat16))
    b_pad = jnp.zeros((1, cpad), jnp.float32).at[:, :cout].set(bias)

    p, k = patches.shape
    tp = min(ROW_TILE_CAP, _round_up(p, 8))
    p_pad = _round_up(p, tp)
    if p_pad != p:
        patches = jnp.pad(patches, ((0, p_pad - p), (0, 0)))
    out = pl.pallas_call(
        _final_conv_kernel,
        out_shape=jax.ShapeDtypeStruct((p_pad, cpad), jnp.float32),
        grid=(p_pad // tp,),
        in_specs=[pl.BlockSpec((tp, k), lambda i: (i, 0)),
                  pl.BlockSpec((k, cpad), lambda i: (0, 0)),
                  pl.BlockSpec((1, cpad), lambda i: (0, 0))],
        out_specs=pl.BlockSpec((tp, cpad), lambda i: (i, 0)),
        compiler_params=pltpu.CompilerParams(
            dimension_semantics=("parallel",),
            vmem_limit_bytes=VMEM_LIMIT_BYTES),
    )(patches, w_mat, b_pad)
    return out[:p, :cout].reshape(n, ho, wo, cout)


# ----------------------------- full generator forward -------------------------------


def resnet_generator_pallas(x_nchw, params, *, n_blocks):
    # Normalize((.5,.5,.5),(.5,.5,.5)) input transform, NCHW -> NHWC, bf16 activations.
    x = (jnp.transpose(x_nchw, (0, 2, 3, 1)) * 2.0 - 1.0).astype(jnp.bfloat16)

    # ReflectionPad2d(3) + Conv2d(input_nc, ngf, 7, bias=False) + BN + ReLU
    h = _conv_bn_act(x, params["c0_w"], params["c0_g"], params["c0_b"],
                     stride=1, pad=3, pad_mode="reflect")

    # two stride-2 downsampling convs (zero padding 1)
    h = _conv_bn_act(h, params["d1_w"], params["d1_g"], params["d1_b"],
                     stride=2, pad=1, pad_mode="constant")
    h = _conv_bn_act(h, params["d2_w"], params["d2_g"], params["d2_b"],
                     stride=2, pad=1, pad_mode="constant")

    # n_blocks ResnetBlocks (reflect padding, use_dropout=False)
    for i in range(n_blocks):
        t = _conv_bn_act(h, params[f"r{i}a_w"], params[f"r{i}a_g"], params[f"r{i}a_b"],
                         stride=1, pad=1, pad_mode="reflect")
        h = _conv_bn_act(t, params[f"r{i}b_w"], params[f"r{i}b_g"], params[f"r{i}b_b"],
                         stride=1, pad=1, pad_mode="reflect", relu=False, residual=h)

    # two stride-2 transposed convs (subpixel decomposition)
    h = _convtranspose_bn_relu(h, params["u1_w"], params["u1_g"], params["u1_b"])
    h = _convtranspose_bn_relu(h, params["u2_w"], params["u2_g"], params["u2_b"])

    # ReflectionPad2d(3) + Conv2d(ngf, output_nc, 7, bias=True) + Tanh + out_norm
    out = _final_conv(h, params["cf_w"], params["cf_b"])
    return jnp.transpose(out, (0, 3, 1, 2))               # back to NCHW


# ----------------------------- parameters & reference -------------------------------


def init_params(key, input_nc=3, output_nc=3, ngf=64, n_blocks=6):
    """Deterministic synthetic weights; conv weights stored HWIO (kh, kw, cin, cout)."""
    keys = iter(jax.random.split(key, 17 + 6 * n_blocks))

    def conv_w(kh, kw, cin, cout):
        s = (cin * kh * kw) ** -0.5
        return jax.random.uniform(next(keys), (kh, kw, cin, cout), jnp.float32, -s, s)

    def bn(c):
        g = 1.0 + 0.1 * jax.random.normal(next(keys), (1, c), jnp.float32)
        b = 0.1 * jax.random.normal(next(keys), (1, c), jnp.float32)
        return g, b

    p = {}
    p["c0_w"] = conv_w(7, 7, input_nc, ngf)
    p["c0_g"], p["c0_b"] = bn(ngf)
    p["d1_w"] = conv_w(3, 3, ngf, 2 * ngf)
    p["d1_g"], p["d1_b"] = bn(2 * ngf)
    p["d2_w"] = conv_w(3, 3, 2 * ngf, 4 * ngf)
    p["d2_g"], p["d2_b"] = bn(4 * ngf)
    for i in range(n_blocks):
        p[f"r{i}a_w"] = conv_w(3, 3, 4 * ngf, 4 * ngf)
        p[f"r{i}a_g"], p[f"r{i}a_b"] = bn(4 * ngf)
        p[f"r{i}b_w"] = conv_w(3, 3, 4 * ngf, 4 * ngf)
        p[f"r{i}b_g"], p[f"r{i}b_b"] = bn(4 * ngf)
    p["u1_w"] = conv_w(3, 3, 4 * ngf, 2 * ngf)   # equivalent-conv weight of ConvTranspose2d
    p["u1_g"], p["u1_b"] = bn(2 * ngf)
    p["u2_w"] = conv_w(3, 3, 2 * ngf, ngf)
    p["u2_g"], p["u2_b"] = bn(ngf)
    p["cf_w"] = conv_w(7, 7, ngf, output_nc)
    p["cf_b"] = 0.1 * jax.random.normal(next(keys), (1, output_nc), jnp.float32)
    return p


def _conv_ref(x, w, *, stride=1, reflect_pad=0, zero_pad=0, lhs_dilation=(1, 1), padding=None):
    if reflect_pad:
        x = jnp.pad(x, ((0, 0), (reflect_pad,) * 2, (reflect_pad,) * 2, (0, 0)), mode="reflect")
    if padding is None:
        padding = ((zero_pad, zero_pad), (zero_pad, zero_pad))
    return jax.lax.conv_general_dilated(
        x.astype(jnp.bfloat16), w.astype(jnp.bfloat16), (stride, stride), padding,
        lhs_dilation=lhs_dilation, dimension_numbers=("NHWC", "HWIO", "NHWC"),
        preferred_element_type=jnp.float32)


def _bn_ref(x, g, b, relu, out_dtype=jnp.bfloat16):
    mean = jnp.mean(x, axis=(0, 1, 2), keepdims=True)
    var = jnp.mean((x - mean) ** 2, axis=(0, 1, 2), keepdims=True)
    y = (x - mean) * jax.lax.rsqrt(var + 1e-5) * g.reshape(1, 1, 1, -1) + b.reshape(1, 1, 1, -1)
    y = jnp.maximum(y, 0.0) if relu else y
    return y.astype(out_dtype)


def resnet_generator_ref(x_nchw, params, *, n_blocks):
    """Reference of the same forward math with the same precision policy
    (bf16 matmul operands / inter-layer activations, f32 accumulation and BN)."""
    x = (jnp.transpose(x_nchw, (0, 2, 3, 1)) * 2.0 - 1.0).astype(jnp.bfloat16)
    h = _bn_ref(_conv_ref(x, params["c0_w"], reflect_pad=3), params["c0_g"], params["c0_b"], True)
    h = _bn_ref(_conv_ref(h, params["d1_w"], stride=2, zero_pad=1), params["d1_g"], params["d1_b"], True)
    h = _bn_ref(_conv_ref(h, params["d2_w"], stride=2, zero_pad=1), params["d2_g"], params["d2_b"], True)
    for i in range(n_blocks):
        t = _bn_ref(_conv_ref(h, params[f"r{i}a_w"], reflect_pad=1),
                    params[f"r{i}a_g"], params[f"r{i}a_b"], True)
        t = _bn_ref(_conv_ref(t, params[f"r{i}b_w"], reflect_pad=1),
                    params[f"r{i}b_g"], params[f"r{i}b_b"], False, out_dtype=jnp.float32)
        h = (h.astype(jnp.float32) + t).astype(jnp.bfloat16)
    h = _bn_ref(_conv_ref(h, params["u1_w"], lhs_dilation=(2, 2), padding=((1, 2), (1, 2))),
                params["u1_g"], params["u1_b"], True)
    h = _bn_ref(_conv_ref(h, params["u2_w"], lhs_dilation=(2, 2), padding=((1, 2), (1, 2))),
                params["u2_g"], params["u2_b"], True)
    y = _conv_ref(h, params["cf_w"], reflect_pad=3) + params["cf_b"].reshape(1, 1, 1, -1)
    y = jnp.tanh(y) * 0.5 + 0.5
    return jnp.transpose(y, (0, 3, 1, 2))


if __name__ == "__main__":
    key = jax.random.PRNGKey(0)
    k_x, k_p = jax.random.split(key)

    N, C, H, W = 2, 3, 16, 16      # input_nc = output_nc = 3 (RGB)
    NGF, N_BLOCKS = 16, 2          # small config; structure identical to ngf=64, n_blocks=6

    # Small row-tile cap so the toy shapes exercise the multi-tile stats accumulation
    # and the per-core-split reduction paths (real workloads use the _tpu_config cap).
    ROW_TILE_CAP = 128

    x = jax.random.uniform(k_x, (N, C, H, W), jnp.float32)   # image-like values in [0, 1]
    params = init_params(k_p, input_nc=C, output_nc=3, ngf=NGF, n_blocks=N_BLOCKS)

    fwd = jax.jit(functools.partial(resnet_generator_pallas, n_blocks=N_BLOCKS))
    out = jax.block_until_ready(fwd(x, params))

    ref = resnet_generator_ref(x, params, n_blocks=N_BLOCKS)
    assert out.shape == (N, 3, H, W), out.shape
    max_err = float(jnp.max(jnp.abs(out - ref)))
    assert max_err < 2e-2, f"mismatch vs reference: {max_err}"

    print("KERNEL_OK")
</pallas_src>

<mosaic_0001>
module attributes {stable_mosaic.version = 11 : i64} {
  func.func @_matmul_stats_kernel(%arg0: i32, %arg1: i32, %arg2: memref<128x147xbf16, #tpu.memory_space<vmem>>, %arg3: memref<147x16xbf16, #tpu.memory_space<vmem>>, %arg4: memref<128x16xf32, #tpu.memory_space<vmem>>, %arg5: memref<1x1x16xf32, #tpu.memory_space<vmem>>, %arg6: memref<1x1x16xf32, #tpu.memory_space<vmem>>, %arg7: memref<1x16xf32, #tpu.memory_space<vmem>>, %arg8: memref<1x16xf32, #tpu.memory_space<vmem>>) attributes {dimension_semantics = [#tpu.dimension_semantics<parallel>, #tpu.dimension_semantics<arbitrary>], iteration_bounds = array<i64: 2, 2>, scalar_prefetch = 0 : i64, scratch_operands = 2 : i64, tpu.core_type = #tpu.core_type<tc>, window_params = [{transform_indices = @transform_0, window_bounds = array<i64: 128, 147>}, {pipeline_mode = #tpu.pipeline_mode<synchronous>, transform_indices = @transform_1, window_bounds = array<i64: 147, 16>}, {transform_indices = @transform_2, window_bounds = array<i64: 128, 16>}, {transform_indices = @transform_3, window_bounds = array<i64: 1, 1, 16>}, {transform_indices = @transform_4, window_bounds = array<i64: 1, 1, 16>}]} {
    %c0_i32 = arith.constant 0 : i32
    %0 = arith.cmpi eq, %arg1, %c0_i32 : i32
    %1 = arith.extui %0 : i1 to i32
    %c0_i32_0 = arith.constant 0 : i32
    %2 = arith.cmpi ne, %1, %c0_i32_0 : i32
    scf.if %2 {
      %cst_17 = arith.constant 0.000000e+00 : f32
      %21 = vector.broadcast %cst_17 : f32 to vector<1x16xf32>
      %c0_18 = arith.constant 0 : index
      %c0_19 = arith.constant 0 : index
      %22 = vector.load %arg7[%c0_18, %c0_19] : memref<1x16xf32, #tpu.memory_space<vmem>>, vector<1x16xf32>
      tpu.vector_store %arg7[%c0_18, %c0_19], %21 {strides = array<i32>} : memref<1x16xf32, #tpu.memory_space<vmem>>, vector<1x16xf32>,
      %cst_20 = arith.constant 0.000000e+00 : f32
      %23 = vector.broadcast %cst_20 : f32 to vector<1x16xf32>
      %c0_21 = arith.constant 0 : index
      %c0_22 = arith.constant 0 : index
      %24 = vector.load %arg8[%c0_21, %c0_22] : memref<1x16xf32, #tpu.memory_space<vmem>>, vector<1x16xf32>
      tpu.vector_store %arg8[%c0_21, %c0_22], %23 {strides = array<i32>} : memref<1x16xf32, #tpu.memory_space<vmem>>, vector<1x16xf32>,
    } else {
    }
    %c0 = arith.constant 0 : index
    %c0_1 = arith.constant 0 : index
    %3 = vector.load %arg2[%c0, %c0_1] : memref<128x147xbf16, #tpu.memory_space<vmem>>, vector<128x147xbf16>
    %c0_2 = arith.constant 0 : index
    %c0_3 = arith.constant 0 : index
    %4 = vector.load %arg3[%c0_2, %c0_3] : memref<147x16xbf16, #tpu.memory_space<vmem>>, vector<147x16xbf16>
    %cst = arith.constant dense<0.000000e+00> : vector<128x16xf32>
    %5 = tpu.matmul %3, %4, %cst {dimension_numbers = #tpu.dot_dimension_numbers<[1], [0], [0], [1], [0, 0, 1, 1], [], []>} : vector<128x147xbf16>, vector<147x16xbf16>, vector<128x16xf32> -> vector<128x16xf32>
    %c0_4 = arith.constant 0 : index
    %c0_5 = arith.constant 0 : index
    %6 = vector.load %arg4[%c0_4, %c0_5] : memref<128x16xf32, #tpu.memory_space<vmem>>, vector<128x16xf32>
    tpu.vector_store %arg4[%c0_4, %c0_5], %5 {strides = array<i32>} : memref<128x16xf32, #tpu.memory_space<vmem>>, vector<128x16xf32>,
    %c0_6 = arith.constant 0 : index
    %c0_7 = arith.constant 0 : index
    %7 = vector.load %arg7[%c0_6, %c0_7] : memref<1x16xf32, #tpu.memory_space<vmem>>, vector<1x16xf32>
    %cst_8 = arith.constant dense<0.000000e+00> : vector<16xf32>
    %8 = vector.multi_reduction <add>, %5, %cst_8 [0] : vector<128x16xf32> to vector<16xf32>
    %9 = vector.shape_cast %8 : vector<16xf32> to vector<1x16xf32>
    %10 = arith.addf %7, %9 : vector<1x16xf32>
    %c0_9 = arith.constant 0 : index
    %c0_10 = arith.constant 0 : index
    %11 = vector.load %arg7[%c0_9, %c0_10] : memref<1x16xf32, #tpu.memory_space<vmem>>, vector<1x16xf32>
    tpu.vector_store %arg7[%c0_9, %c0_10], %10 {strides = array<i32>} : memref<1x16xf32, #tpu.memory_space<vmem>>, vector<1x16xf32>,
    %c0_11 = arith.constant 0 : index
    %c0_12 = arith.constant 0 : index
    %12 = vector.load %arg8[%c0_11, %c0_12] : memref<1x16xf32, #tpu.memory_space<vmem>>, vector<1x16xf32>
    %13 = arith.mulf %5, %5 : vector<128x16xf32>
    %cst_13 = arith.constant dense<0.000000e+00> : vector<16xf32>
    %14 = vector.multi_reduction <add>, %13, %cst_13 [0] : vector<128x16xf32> to vector<16xf32>
    %15 = vector.shape_cast %14 : vector<16xf32> to vector<1x16xf32>
    %16 = arith.addf %12, %15 : vector<1x16xf32>
    %c0_14 = arith.constant 0 : index
    %c0_15 = arith.constant 0 : index
    %17 = vector.load %arg8[%c0_14, %c0_15] : memref<1x16xf32, #tpu.memory_space<vmem>>, vector<1x16xf32>
    tpu.vector_store %arg8[%c0_14, %c0_15], %16 {strides = array<i32>} : memref<1x16xf32, #tpu.memory_space<vmem>>, vector<1x16xf32>,
    %c1_i32 = arith.constant 1 : i32
    %18 = arith.cmpi eq, %arg1, %c1_i32 : i32
    %19 = arith.extui %18 : i1 to i32
    %c0_i32_16 = arith.constant 0 : i32
    %20 = arith.cmpi ne, %19, %c0_i32_16 : i32
    scf.if %20 {
      %c0_17 = arith.constant 0 : index
      %c0_18 = arith.constant 0 : index
      %21 = vector.load %arg7[%c0_17, %c0_18] : memref<1x16xf32, #tpu.memory_space<vmem>>, vector<1x16xf32>
      %22 = vector.shape_cast %21 : vector<1x16xf32> to vector<1x1x16xf32>
      %c0_19 = arith.constant 0 : index
      %c0_20 = arith.constant 0 : index
      %c0_21 = arith.constant 0 : index
      %23 = vector.load %arg5[%c0_19, %c0_20, %c0_21] : memref<1x1x16xf32, #tpu.memory_space<vmem>>, vector<1x1x16xf32>
      tpu.vector_store %arg5[%c0_19, %c0_20, %c0_21], %22 {strides = array<i32>} : memref<1x1x16xf32, #tpu.memory_space<vmem>>, vector<1x1x16xf32>,
      %c0_22 = arith.constant 0 : index
      %c0_23 = arith.constant 0 : index
      %24 = vector.load %arg8[%c0_22, %c0_23] : memref<1x16xf32, #tpu.memory_space<vmem>>, vector<1x16xf32>
      %25 = vector.shape_cast %24 : vector<1x16xf32> to vector<1x1x16xf32>
      %c0_24 = arith.constant 0 : index
      %c0_25 = arith.constant 0 : index
      %c0_26 = arith.constant 0 : index
      %26 = vector.load %arg6[%c0_24, %c0_25, %c0_26] : memref<1x1x16xf32, #tpu.memory_space<vmem>>, vector<1x1x16xf32>
      tpu.vector_store %arg6[%c0_24, %c0_25, %c0_26], %25 {strides = array<i32>} : memref<1x1x16xf32, #tpu.memory_space<vmem>>, vector<1x1x16xf32>,
    } else {
    }
    return
  }
  func.func @transform_0(%arg0: i32, %arg1: i32) -> (i32, i32) {
    %c2_i32 = arith.constant 2 : i32
    %0 = arith.muli %arg0, %c2_i32 : i32
    %1 = arith.addi %0, %arg1 : i32
    %c0_i32 = arith.constant 0 : i32
    %c0_i32_0 = arith.constant 0 : i32
    return %1, %c0_i32 : i32, i32
  }
  func.func @transform_1(%arg0: i32, %arg1: i32) -> (i32, i32) {
    %c0_i32 = arith.constant 0 : i32
    %c0_i32_0 = arith.constant 0 : i32
    %c0_i32_1 = arith.constant 0 : i32
    return %c0_i32, %c0_i32_0 : i32, i32
  }
  func.func @transform_2(%arg0: i32, %arg1: i32) -> (i32, i32) {
    %c2_i32 = arith.constant 2 : i32
    %0 = arith.muli %arg0, %c2_i32 : i32
    %1 = arith.addi %0, %arg1 : i32
    %c0_i32 = arith.constant 0 : i32
    %c0_i32_0 = arith.constant 0 : i32
    return %1, %c0_i32 : i32, i32
  }
  func.func @transform_3(%arg0: i32, %arg1: i32) -> (i32, i32, i32) {
    %c0_i32 = arith.constant 0 : i32
    %c0_i32_0 = arith.constant 0 : i32
    %c0_i32_1 = arith.constant 0 : i32
    return %arg0, %c0_i32, %c0_i32_0 : i32, i32, i32
  }
  func.func @transform_4(%arg0: i32, %arg1: i32) -> (i32, i32, i32) {
    %c0_i32 = arith.constant 0 : i32
    %c0_i32_0 = arith.constant 0 : i32
    %c0_i32_1 = arith.constant 0 : i32
    return %arg0, %c0_i32, %c0_i32_0 : i32, i32, i32
  }
}

module attributes {stable_mosaic.version = 11 : i64} {
  func.func @_scale_shift_kernel(%arg0: i32, %arg1: memref<128x16xf32, #tpu.memory_space<vmem>>, %arg2: memref<1x16xf32, #tpu.memory_space<vmem>>, %arg3: memref<1x16xf32, #tpu.memory_space<vmem>>, %arg4: memref<128x16xbf16, #tpu.memory_space<vmem>>) attributes {dimension_semantics = [#tpu.dimension_semantics<parallel>], iteration_bounds = array<i64: 4>, scalar_prefetch = 0 : i64, scratch_operands = 0 : i64, tpu.core_type = #tpu.core_type<tc>, window_params = [{transform_indices = @transform_0, window_bounds = array<i64: 128, 16>}, {pipeline_mode = #tpu.pipeline_mode<synchronous>, transform_indices = @transform_1, window_bounds = array<i64: 1, 16>}, {pipeline_mode = #tpu.pipeline_mode<synchronous>, transform_indices = @transform_2, window_bounds = array<i64: 1, 16>}, {transform_indices = @transform_3, window_bounds = array<i64: 128, 16>}]} {
    %c0 = arith.constant 0 : index
    %c0_0 = arith.constant 0 : index
    %0 = vector.load %arg1[%c0, %c0_0] : memref<128x16xf32, #tpu.memory_space<vmem>>, vector<128x16xf32>
    %c0_1 = arith.constant 0 : index
    %c0_2 = arith.constant 0 : index
    %1 = vector.load %arg2[%c0_1, %c0_2] : memref<1x16xf32, #tpu.memory_space<vmem>>, vector<1x16xf32>
    %2 = vector.broadcast %1 : vector<1x16xf32> to vector<128x16xf32>
    %3 = arith.mulf %0, %2 : vector<128x16xf32>
    %c0_3 = arith.constant 0 : index
    %c0_4 = arith.constant 0 : index
    %4 = vector.load %arg3[%c0_3, %c0_4] : memref<1x16xf32, #tpu.memory_space<vmem>>, vector<1x16xf32>
    %5 = vector.broadcast %4 : vector<1x16xf32> to vector<128x16xf32>
    %6 = arith.addf %3, %5 : vector<128x16xf32>
    %cst = arith.constant 0.000000e+00 : f32
    %7 = vector.broadcast %cst : f32 to vector<128x16xf32>
    %8 = arith.maximumf %6, %7 : vector<128x16xf32>
    %9 = arith.truncf %8 : vector<128x16xf32> to vector<128x16xbf16>
    %c0_5 = arith.constant 0 : index
    %c0_6 = arith.constant 0 : index
    %10 = vector.load %arg4[%c0_5, %c0_6] : memref<128x16xbf16, #tpu.memory_space<vmem>>, vector<128x16xbf16>
    tpu.vector_store %arg4[%c0_5, %c0_6], %9 {strides = array<i32>} : memref<128x16xbf16, #tpu.memory_space<vmem>>, vector<128x16xbf16>,
    return
  }
  func.func @transform_0(%arg0: i32) -> (i32, i32) {
    %c0_i32 = arith.constant 0 : i32
    %c0_i32_0 = arith.constant 0 : i32
    return %arg0, %c0_i32 : i32, i32
  }
  func.func @transform_1(%arg0: i32) -> (i32, i32) {
    %c0_i32 = arith.constant 0 : i32
    %c0_i32_0 = arith.constant 0 : i32
    %c0_i32_1 = arith.constant 0 : i32
    return %c0_i32, %c0_i32_0 : i32, i32
  }
  func.func @transform_2(%arg0: i32) -> (i32, i32) {
    %c0_i32 = arith.constant 0 : i32
    %c0_i32_0 = arith.constant 0 : i32
    %c0_i32_1 = arith.constant 0 : i32
    return %c0_i32, %c0_i32_0 : i32, i32
  }
  func.func @transform_3(%arg0: i32) -> (i32, i32) {
    %c0_i32 = arith.constant 0 : i32
    %c0_i32_0 = arith.constant 0 : i32
    return %arg0, %c0_i32 : i32, i32
  }
}

module attributes {stable_mosaic.version = 11 : i64} {
  func.func @_matmul_stats_kernel(%arg0: i32, %arg1: i32, %arg2: memref<128x144xbf16, #tpu.memory_space<vmem>>, %arg3: memref<144x32xbf16, #tpu.memory_space<vmem>>, %arg4: memref<128x32xf32, #tpu.memory_space<vmem>>, %arg5: memref<1x1x32xf32, #tpu.memory_space<vmem>>, %arg6: memref<1x1x32xf32, #tpu.memory_space<vmem>>, %arg7: memref<1x32xf32, #tpu.memory_space<vmem>>, %arg8: memref<1x32xf32, #tpu.memory_space<vmem>>) attributes {dimension_semantics = [#tpu.dimension_semantics<parallel>, #tpu.dimension_semantics<arbitrary>], iteration_bounds = array<i64: 1, 1>, scalar_prefetch = 0 : i64, scratch_operands = 2 : i64, tpu.core_type = #tpu.core_type<tc>, window_params = [{transform_indices = @transform_0, window_bounds = array<i64: 128, 144>}, {pipeline_mode = #tpu.pipeline_mode<synchronous>, transform_indices = @transform_1, window_bounds = array<i64: 144, 32>}, {transform_indices = @transform_2, window_bounds = array<i64: 128, 32>}, {transform_indices = @transform_3, window_bounds = array<i64: 1, 1, 32>}, {transform_indices = @transform_4, window_bounds = array<i64: 1, 1, 32>}]} {
    %c0_i32 = arith.constant 0 : i32
    %0 = arith.cmpi eq, %arg1, %c0_i32 : i32
    %1 = arith.extui %0 : i1 to i32
    %c0_i32_0 = arith.constant 0 : i32
    %2 = arith.cmpi ne, %1, %c0_i32_0 : i32
    scf.if %2 {
      %cst_18 = arith.constant 0.000000e+00 : f32
      %21 = vector.broadcast %cst_18 : f32 to vector<1x32xf32>
      %c0_19 = arith.constant 0 : index
      %c0_20 = arith.constant 0 : index
      %22 = vector.load %arg7[%c0_19, %c0_20] : memref<1x32xf32, #tpu.memory_space<vmem>>, vector<1x32xf32>
      tpu.vector_store %arg7[%c0_19, %c0_20], %21 {strides = array<i32>} : memref<1x32xf32, #tpu.memory_space<vmem>>, vector<1x32xf32>,
      %cst_21 = arith.constant 0.000000e+00 : f32
      %23 = vector.broadcast %cst_21 : f32 to vector<1x32xf32>
      %c0_22 = arith.constant 0 : index
      %c0_23 = arith.constant 0 : index
      %24 = vector.load %arg8[%c0_22, %c0_23] : memref<1x32xf32, #tpu.memory_space<vmem>>, vector<1x32xf32>
      tpu.vector_store %arg8[%c0_22, %c0_23], %23 {strides = array<i32>} : memref<1x32xf32, #tpu.memory_space<vmem>>, vector<1x32xf32>,
    } else {
    }
    %c0 = arith.constant 0 : index
    %c0_1 = arith.constant 0 : index
    %3 = vector.load %arg2[%c0, %c0_1] : memref<128x144xbf16, #tpu.memory_space<vmem>>, vector<128x144xbf16>
    %c0_2 = arith.constant 0 : index
    %c0_3 = arith.constant 0 : index
    %4 = vector.load %arg3[%c0_2, %c0_3] : memref<144x32xbf16, #tpu.memory_space<vmem>>, vector<144x32xbf16>
    %cst = arith.constant dense<0.000000e+00> : vector<128x32xf32>
    %5 = tpu.matmul %3, %4, %cst {dimension_numbers = #tpu.dot_dimension_numbers<[1], [0], [0], [1], [0, 0, 1, 1], [], []>} : vector<128x144xbf16>, vector<144x32xbf16>, vector<128x32xf32> -> vector<128x32xf32>
    %c0_4 = arith.constant 0 : index
    %c0_5 = arith.constant 0 : index
    %6 = vector.load %arg4[%c0_4, %c0_5] : memref<128x32xf32, #tpu.memory_space<vmem>>, vector<128x32xf32>
    tpu.vector_store %arg4[%c0_4, %c0_5], %5 {strides = array<i32>} : memref<128x32xf32, #tpu.memory_space<vmem>>, vector<128x32xf32>,
    %c0_6 = arith.constant 0 : index
    %c0_7 = arith.constant 0 : index
    %7 = vector.load %arg7[%c0_6, %c0_7] : memref<1x32xf32, #tpu.memory_space<vmem>>, vector<1x32xf32>
    %cst_8 = arith.constant dense<0.000000e+00> : vector<32xf32>
    %8 = vector.multi_reduction <add>, %5, %cst_8 [0] : vector<128x32xf32> to vector<32xf32>
    %9 = vector.shape_cast %8 : vector<32xf32> to vector<1x32xf32>
    %10 = arith.addf %7, %9 : vector<1x32xf32>
    %c0_9 = arith.constant 0 : index
    %c0_10 = arith.constant 0 : index
    %11 = vector.load %arg7[%c0_9, %c0_10] : memref<1x32xf32, #tpu.memory_space<vmem>>, vector<1x32xf32>
    tpu.vector_store %arg7[%c0_9, %c0_10], %10 {strides = array<i32>} : memref<1x32xf32, #tpu.memory_space<vmem>>, vector<1x32xf32>,
    %c0_11 = arith.constant 0 : index
    %c0_12 = arith.constant 0 : index
    %12 = vector.load %arg8[%c0_11, %c0_12] : memref<1x32xf32, #tpu.memory_space<vmem>>, vector<1x32xf32>
    %13 = arith.mulf %5, %5 : vector<128x32xf32>
    %cst_13 = arith.constant dense<0.000000e+00> : vector<32xf32>
    %14 = vector.multi_reduction <add>, %13, %cst_13 [0] : vector<128x32xf32> to vector<32xf32>
    %15 = vector.shape_cast %14 : vector<32xf32> to vector<1x32xf32>
    %16 = arith.addf %12, %15 : vector<1x32xf32>
    %c0_14 = arith.constant 0 : index
    %c0_15 = arith.constant 0 : index
    %17 = vector.load %arg8[%c0_14, %c0_15] : memref<1x32xf32, #tpu.memory_space<vmem>>, vector<1x32xf32>
    tpu.vector_store %arg8[%c0_14, %c0_15], %16 {strides = array<i32>} : memref<1x32xf32, #tpu.memory_space<vmem>>, vector<1x32xf32>,
    %c0_i32_16 = arith.constant 0 : i32
    %18 = arith.cmpi eq, %arg1, %c0_i32_16 : i32
    %19 = arith.extui %18 : i1 to i32
    %c0_i32_17 = arith.constant 0 : i32
    %20 = arith.cmpi ne, %19, %c0_i32_17 : i32
    scf.if %20 {
      %c0_18 = arith.constant 0 : index
      %c0_19 = arith.constant 0 : index
      %21 = vector.load %arg7[%c0_18, %c0_19] : memref<1x32xf32, #tpu.memory_space<vmem>>, vector<1x32xf32>
      %22 = vector.shape_cast %21 : vector<1x32xf32> to vector<1x1x32xf32>
      %c0_20 = arith.constant 0 : index
      %c0_21 = arith.constant 0 : index
      %c0_22 = arith.constant 0 : index
      %23 = vector.load %arg5[%c0_20, %c0_21, %c0_22] : memref<1x1x32xf32, #tpu.memory_space<vmem>>, vector<1x1x32xf32>
      tpu.vector_store %arg5[%c0_20, %c0_21, %c0_22], %22 {strides = array<i32>} : memref<1x1x32xf32, #tpu.memory_space<vmem>>, vector<1x1x32xf32>,
      %c0_23 = arith.constant 0 : index
      %c0_24 = arith.constant 0 : index
      %24 = vector.load %arg8[%c0_23, %c0_24] : memref<1x32xf32, #tpu.memory_space<vmem>>, vector<1x32xf32>
      %25 = vector.shape_cast %24 : vector<1x32xf32> to vector<1x1x32xf32>
      %c0_25 = arith.constant 0 : index
      %c0_26 = arith.constant 0 : index
      %c0_27 = arith.constant 0 : index
      %26 = vector.load %arg6[%c0_25, %c0_26, %c0_27] : memref<1x1x32xf32, #tpu.memory_space<vmem>>, vector<1x1x32xf32>
      tpu.vector_store %arg6[%c0_25, %c0_26, %c0_27], %25 {strides = array<i32>} : memref<1x1x32xf32, #tpu.memory_space<vmem>>, vector<1x1x32xf32>,
    } else {
    }
    return
  }
  func.func @transform_0(%arg0: i32, %arg1: i32) -> (i32, i32) {
    %c1_i32 = arith.constant 1 : i32
    %0 = arith.muli %arg0, %c1_i32 : i32
    %1 = arith.addi %0, %arg1 : i32
    %c0_i32 = arith.constant 0 : i32
    %c0_i32_0 = arith.constant 0 : i32
    return %1, %c0_i32 : i32, i32
  }
  func.func @transform_1(%arg0: i32, %arg1: i32) -> (i32, i32) {
    %c0_i32 = arith.constant 0 : i32
    %c0_i32_0 = arith.constant 0 : i32
    %c0_i32_1 = arith.constant 0 : i32
    return %c0_i32, %c0_i32_0 : i32, i32
  }
  func.func @transform_2(%arg0: i32, %arg1: i32) -> (i32, i32) {
    %c1_i32 = arith.constant 1 : i32
    %0 = arith.muli %arg0, %c1_i32 : i32
    %1 = arith.addi %0, %arg1 : i32
    %c0_i32 = arith.constant 0 : i32
    %c0_i32_0 = arith.constant 0 : i32
    return %1, %c0_i32 : i32, i32
  }
  func.func @transform_3(%arg0: i32, %arg1: i32) -> (i32, i32, i32) {
    %c0_i32 = arith.constant 0 : i32
    %c0_i32_0 = arith.constant 0 : i32
    %c0_i32_1 = arith.constant 0 : i32
    return %arg0, %c0_i32, %c0_i32_0 : i32, i32, i32
  }
  func.func @transform_4(%arg0: i32, %arg1: i32) -> (i32, i32, i32) {
    %c0_i32 = arith.constant 0 : i32
    %c0_i32_0 = arith.constant 0 : i32
    %c0_i32_1 = arith.constant 0 : i32
    return %arg0, %c0_i32, %c0_i32_0 : i32, i32, i32
  }
}

module attributes {stable_mosaic.version = 11 : i64} {
  func.func @_scale_shift_kernel(%arg0: i32, %arg1: memref<128x32xf32, #tpu.memory_space<vmem>>, %arg2: memref<1x32xf32, #tpu.memory_space<vmem>>, %arg3: memref<1x32xf32, #tpu.memory_space<vmem>>, %arg4: memref<128x32xbf16, #tpu.memory_space<vmem>>) attributes {dimension_semantics = [#tpu.dimension_semantics<parallel>], iteration_bounds = array<i64: 1>, scalar_prefetch = 0 : i64, scratch_operands = 0 : i64, tpu.core_type = #tpu.core_type<tc>, window_params = [{transform_indices = @transform_0, window_bounds = array<i64: 128, 32>}, {pipeline_mode = #tpu.pipeline_mode<synchronous>, transform_indices = @transform_1, window_bounds = array<i64: 1, 32>}, {pipeline_mode = #tpu.pipeline_mode<synchronous>, transform_indices = @transform_2, window_bounds = array<i64: 1, 32>}, {transform_indices = @transform_3, window_bounds = array<i64: 128, 32>}]} {
    %c0 = arith.constant 0 : index
    %c0_0 = arith.constant 0 : index
    %0 = vector.load %arg1[%c0, %c0_0] : memref<128x32xf32, #tpu.memory_space<vmem>>, vector<128x32xf32>
    %c0_1 = arith.constant 0 : index
    %c0_2 = arith.constant 0 : index
    %1 = vector.load %arg2[%c0_1, %c0_2] : memref<1x32xf32, #tpu.memory_space<vmem>>, vector<1x32xf32>
    %2 = vector.broadcast %1 : vector<1x32xf32> to vector<128x32xf32>
    %3 = arith.mulf %0, %2 : vector<128x32xf32>
    %c0_3 = arith.constant 0 : index
    %c0_4 = arith.constant 0 : index
    %4 = vector.load %arg3[%c0_3, %c0_4] : memref<1x32xf32, #tpu.memory_space<vmem>>, vector<1x32xf32>
    %5 = vector.broadcast %4 : vector<1x32xf32> to vector<128x32xf32>
    %6 = arith.addf %3, %5 : vector<128x32xf32>
    %cst = arith.constant 0.000000e+00 : f32
    %7 = vector.broadcast %cst : f32 to vector<128x32xf32>
    %8 = arith.maximumf %6, %7 : vector<128x32xf32>
    %9 = arith.truncf %8 : vector<128x32xf32> to vector<128x32xbf16>
    %c0_5 = arith.constant 0 : index
    %c0_6 = arith.constant 0 : index
    %10 = vector.load %arg4[%c0_5, %c0_6] : memref<128x32xbf16, #tpu.memory_space<vmem>>, vector<128x32xbf16>
    tpu.vector_store %arg4[%c0_5, %c0_6], %9 {strides = array<i32>} : memref<128x32xbf16, #tpu.memory_space<vmem>>, vector<128x32xbf16>,
    return
  }
  func.func @transform_0(%arg0: i32) -> (i32, i32) {
    %c0_i32 = arith.constant 0 : i32
    %c0_i32_0 = arith.constant 0 : i32
    return %arg0, %c0_i32 : i32, i32
  }
  func.func @transform_1(%arg0: i32) -> (i32, i32) {
    %c0_i32 = arith.constant 0 : i32
    %c0_i32_0 = arith.constant 0 : i32
    %c0_i32_1 = arith.constant 0 : i32
    return %c0_i32, %c0_i32_0 : i32, i32
  }
  func.func @transform_2(%arg0: i32) -> (i32, i32) {
    %c0_i32 = arith.constant 0 : i32
    %c0_i32_0 = arith.constant 0 : i32
    %c0_i32_1 = arith.constant 0 : i32
    return %c0_i32, %c0_i32_0 : i32, i32
  }
  func.func @transform_3(%arg0: i32) -> (i32, i32) {
    %c0_i32 = arith.constant 0 : i32
    %c0_i32_0 = arith.constant 0 : i32
    return %arg0, %c0_i32 : i32, i32
  }
}

module attributes {stable_mosaic.version = 11 : i64} {
  func.func @_matmul_stats_kernel(%arg0: i32, %arg1: i32, %arg2: memref<32x288xbf16, #tpu.memory_space<vmem>>, %arg3: memref<288x64xbf16, #tpu.memory_space<vmem>>, %arg4: memref<32x64xf32, #tpu.memory_space<vmem>>, %arg5: memref<1x1x64xf32, #tpu.memory_space<vmem>>, %arg6: memref<1x1x64xf32, #tpu.memory_space<vmem>>, %arg7: memref<1x64xf32, #tpu.memory_space<vmem>>, %arg8: memref<1x64xf32, #tpu.memory_space<vmem>>) attributes {dimension_semantics = [#tpu.dimension_semantics<parallel>, #tpu.dimension_semantics<arbitrary>], iteration_bounds = array<i64: 1, 1>, scalar_prefetch = 0 : i64, scratch_operands = 2 : i64, tpu.core_type = #tpu.core_type<tc>, window_params = [{transform_indices = @transform_0, window_bounds = array<i64: 32, 288>}, {pipeline_mode = #tpu.pipeline_mode<synchronous>, transform_indices = @transform_1, window_bounds = array<i64: 288, 64>}, {transform_indices = @transform_2, window_bounds = array<i64: 32, 64>}, {transform_indices = @transform_3, window_bounds = array<i64: 1, 1, 64>}, {transform_indices = @transform_4, window_bounds = array<i64: 1, 1, 64>}]} {
    %c0_i32 = arith.constant 0 : i32
    %0 = arith.cmpi eq, %arg1, %c0_i32 : i32
    %1 = arith.extui %0 : i1 to i32
    %c0_i32_0 = arith.constant 0 : i32
    %2 = arith.cmpi ne, %1, %c0_i32_0 : i32
    scf.if %2 {
      %cst_18 = arith.constant 0.000000e+00 : f32
      %21 = vector.broadcast %cst_18 : f32 to vector<1x64xf32>
      %c0_19 = arith.constant 0 : index
      %c0_20 = arith.constant 0 : index
      %22 = vector.load %arg7[%c0_19, %c0_20] : memref<1x64xf32, #tpu.memory_space<vmem>>, vector<1x64xf32>
      tpu.vector_store %arg7[%c0_19, %c0_20], %21 {strides = array<i32>} : memref<1x64xf32, #tpu.memory_space<vmem>>, vector<1x64xf32>,
      %cst_21 = arith.constant 0.000000e+00 : f32
      %23 = vector.broadcast %cst_21 : f32 to vector<1x64xf32>
      %c0_22 = arith.constant 0 : index
      %c0_23 = arith.constant 0 : index
      %24 = vector.load %arg8[%c0_22, %c0_23] : memref<1x64xf32, #tpu.memory_space<vmem>>, vector<1x64xf32>
      tpu.vector_store %arg8[%c0_22, %c0_23], %23 {strides = array<i32>} : memref<1x64xf32, #tpu.memory_space<vmem>>, vector<1x64xf32>,
    } else {
    }
    %c0 = arith.constant 0 : index
    %c0_1 = arith.constant 0 : index
    %3 = vector.load %arg2[%c0, %c0_1] : memref<32x288xbf16, #tpu.memory_space<vmem>>, vector<32x288xbf16>
    %c0_2 = arith.constant 0 : index
    %c0_3 = arith.constant 0 : index
    %4 = vector.load %arg3[%c0_2, %c0_3] : memref<288x64xbf16, #tpu.memory_space<vmem>>, vector<288x64xbf16>
    %cst = arith.constant dense<0.000000e+00> : vector<32x64xf32>
    %5 = tpu.matmul %3, %4, %cst {dimension_numbers = #tpu.dot_dimension_numbers<[1], [0], [0], [1], [0, 0, 1, 1], [], []>} : vector<32x288xbf16>, vector<288x64xbf16>, vector<32x64xf32> -> vector<32x64xf32>
    %c0_4 = arith.constant 0 : index
    %c0_5 = arith.constant 0 : index
    %6 = vector.load %arg4[%c0_4, %c0_5] : memref<32x64xf32, #tpu.memory_space<vmem>>, vector<32x64xf32>
    tpu.vector_store %arg4[%c0_4, %c0_5], %5 {strides = array<i32>} : memref<32x64xf32, #tpu.memory_space<vmem>>, vector<32x64xf32>,
    %c0_6 = arith.constant 0 : index
    %c0_7 = arith.constant 0 : index
    %7 = vector.load %arg7[%c0_6, %c0_7] : memref<1x64xf32, #tpu.memory_space<vmem>>, vector<1x64xf32>
    %cst_8 = arith.constant dense<0.000000e+00> : vector<64xf32>
    %8 = vector.multi_reduction <add>, %5, %cst_8 [0] : vector<32x64xf32> to vector<64xf32>
    %9 = vector.shape_cast %8 : vector<64xf32> to vector<1x64xf32>
    %10 = arith.addf %7, %9 : vector<1x64xf32>
    %c0_9 = arith.constant 0 : index
    %c0_10 = arith.constant 0 : index
    %11 = vector.load %arg7[%c0_9, %c0_10] : memref<1x64xf32, #tpu.memory_space<vmem>>, vector<1x64xf32>
    tpu.vector_store %arg7[%c0_9, %c0_10], %10 {strides = array<i32>} : memref<1x64xf32, #tpu.memory_space<vmem>>, vector<1x64xf32>,
    %c0_11 = arith.constant 0 : index
    %c0_12 = arith.constant 0 : index
    %12 = vector.load %arg8[%c0_11, %c0_12] : memref<1x64xf32, #tpu.memory_space<vmem>>, vector<1x64xf32>
    %13 = arith.mulf %5, %5 : vector<32x64xf32>
    %cst_13 = arith.constant dense<0.000000e+00> : vector<64xf32>
    %14 = vector.multi_reduction <add>, %13, %cst_13 [0] : vector<32x64xf32> to vector<64xf32>
    %15 = vector.shape_cast %14 : vector<64xf32> to vector<1x64xf32>
    %16 = arith.addf %12, %15 : vector<1x64xf32>
    %c0_14 = arith.constant 0 : index
    %c0_15 = arith.constant 0 : index
    %17 = vector.load %arg8[%c0_14, %c0_15] : memref<1x64xf32, #tpu.memory_space<vmem>>, vector<1x64xf32>
    tpu.vector_store %arg8[%c0_14, %c0_15], %16 {strides = array<i32>} : memref<1x64xf32, #tpu.memory_space<vmem>>, vector<1x64xf32>,
    %c0_i32_16 = arith.constant 0 : i32
    %18 = arith.cmpi eq, %arg1, %c0_i32_16 : i32
    %19 = arith.extui %18 : i1 to i32
    %c0_i32_17 = arith.constant 0 : i32
    %20 = arith.cmpi ne, %19, %c0_i32_17 : i32
    scf.if %20 {
      %c0_18 = arith.constant 0 : index
      %c0_19 = arith.constant 0 : index
      %21 = vector.load %arg7[%c0_18, %c0_19] : memref<1x64xf32, #tpu.memory_space<vmem>>, vector<1x64xf32>
      %22 = vector.shape_cast %21 : vector<1x64xf32> to vector<1x1x64xf32>
      %c0_20 = arith.constant 0 : index
      %c0_21 = arith.constant 0 : index
      %c0_22 = arith.constant 0 : index
      %23 = vector.load %arg5[%c0_20, %c0_21, %c0_22] : memref<1x1x64xf32, #tpu.memory_space<vmem>>, vector<1x1x64xf32>
      tpu.vector_store %arg5[%c0_20, %c0_21, %c0_22], %22 {strides = array<i32>} : memref<1x1x64xf32, #tpu.memory_space<vmem>>, vector<1x1x64xf32>,
      %c0_23 = arith.constant 0 : index
      %c0_24 = arith.constant 0 : index
      %24 = vector.load %arg8[%c0_23, %c0_24] : memref<1x64xf32, #tpu.memory_space<vmem>>, vector<1x64xf32>
      %25 = vector.shape_cast %24 : vector<1x64xf32> to vector<1x1x64xf32>
      %c0_25 = arith.constant 0 : index
      %c0_26 = arith.constant 0 : index
      %c0_27 = arith.constant 0 : index
      %26 = vector.load %arg6[%c0_25, %c0_26, %c0_27] : memref<1x1x64xf32, #tpu.memory_space<vmem>>, vector<1x1x64xf32>
      tpu.vector_store %arg6[%c0_25, %c0_26, %c0_27], %25 {strides = array<i32>} : memref<1x1x64xf32, #tpu.memory_space<vmem>>, vector<1x1x64xf32>,
    } else {
    }
    return
  }
  func.func @transform_0(%arg0: i32, %arg1: i32) -> (i32, i32) {
    %c1_i32 = arith.constant 1 : i32
    %0 = arith.muli %arg0, %c1_i32 : i32
    %1 = arith.addi %0, %arg1 : i32
    %c0_i32 = arith.constant 0 : i32
    %c0_i32_0 = arith.constant 0 : i32
    return %1, %c0_i32 : i32, i32
  }
  func.func @transform_1(%arg0: i32, %arg1: i32) -> (i32, i32) {
    %c0_i32 = arith.constant 0 : i32
    %c0_i32_0 = arith.constant 0 : i32
    %c0_i32_1 = arith.constant 0 : i32
    return %c0_i32, %c0_i32_0 : i32, i32
  }
  func.func @transform_2(%arg0: i32, %arg1: i32) -> (i32, i32) {
    %c1_i32 = arith.constant 1 : i32
    %0 = arith.muli %arg0, %c1_i32 : i32
    %1 = arith.addi %0, %arg1 : i32
    %c0_i32 = arith.constant 0 : i32
    %c0_i32_0 = arith.constant 0 : i32
    return %1, %c0_i32 : i32, i32
  }
  func.func @transform_3(%arg0: i32, %arg1: i32) -> (i32, i32, i32) {
    %c0_i32 = arith.constant 0 : i32
    %c0_i32_0 = arith.constant 0 : i32
    %c0_i32_1 = arith.constant 0 : i32
    return %arg0, %c0_i32, %c0_i32_0 : i32, i32, i32
  }
  func.func @transform_4(%arg0: i32, %arg1: i32) -> (i32, i32, i32) {
    %c0_i32 = arith.constant 0 : i32
    %c0_i32_0 = arith.constant 0 : i32
    %c0_i32_1 = arith.constant 0 : i32
    return %arg0, %c0_i32, %c0_i32_0 : i32, i32, i32
  }
}

module attributes {stable_mosaic.version = 11 : i64} {
  func.func @_scale_shift_kernel(%arg0: i32, %arg1: memref<32x64xf32, #tpu.memory_space<vmem>>, %arg2: memref<1x64xf32, #tpu.memory_space<vmem>>, %arg3: memref<1x64xf32, #tpu.memory_space<vmem>>, %arg4: memref<32x64xbf16, #tpu.memory_space<vmem>>) attributes {dimension_semantics = [#tpu.dimension_semantics<parallel>], iteration_bounds = array<i64: 1>, scalar_prefetch = 0 : i64, scratch_operands = 0 : i64, tpu.core_type = #tpu.core_type<tc>, window_params = [{transform_indices = @transform_0, window_bounds = array<i64: 32, 64>}, {pipeline_mode = #tpu.pipeline_mode<synchronous>, transform_indices = @transform_1, window_bounds = array<i64: 1, 64>}, {pipeline_mode = #tpu.pipeline_mode<synchronous>, transform_indices = @transform_2, window_bounds = array<i64: 1, 64>}, {transform_indices = @transform_3, window_bounds = array<i64: 32, 64>}]} {
    %c0 = arith.constant 0 : index
    %c0_0 = arith.constant 0 : index
    %0 = vector.load %arg1[%c0, %c0_0] : memref<32x64xf32, #tpu.memory_space<vmem>>, vector<32x64xf32>
    %c0_1 = arith.constant 0 : index
    %c0_2 = arith.constant 0 : index
    %1 = vector.load %arg2[%c0_1, %c0_2] : memref<1x64xf32, #tpu.memory_space<vmem>>, vector<1x64xf32>
    %2 = vector.broadcast %1 : vector<1x64xf32> to vector<32x64xf32>
    %3 = arith.mulf %0, %2 : vector<32x64xf32>
    %c0_3 = arith.constant 0 : index
    %c0_4 = arith.constant 0 : index
    %4 = vector.load %arg3[%c0_3, %c0_4] : memref<1x64xf32, #tpu.memory_space<vmem>>, vector<1x64xf32>
    %5 = vector.broadcast %4 : vector<1x64xf32> to vector<32x64xf32>
    %6 = arith.addf %3, %5 : vector<32x64xf32>
    %cst = arith.constant 0.000000e+00 : f32
    %7 = vector.broadcast %cst : f32 to vector<32x64xf32>
    %8 = arith.maximumf %6, %7 : vector<32x64xf32>
    %9 = arith.truncf %8 : vector<32x64xf32> to vector<32x64xbf16>
    %c0_5 = arith.constant 0 : index
    %c0_6 = arith.constant 0 : index
    %10 = vector.load %arg4[%c0_5, %c0_6] : memref<32x64xbf16, #tpu.memory_space<vmem>>, vector<32x64xbf16>
    tpu.vector_store %arg4[%c0_5, %c0_6], %9 {strides = array<i32>} : memref<32x64xbf16, #tpu.memory_space<vmem>>, vector<32x64xbf16>,
    return
  }
  func.func @transform_0(%arg0: i32) -> (i32, i32) {
    %c0_i32 = arith.constant 0 : i32
    %c0_i32_0 = arith.constant 0 : i32
    return %arg0, %c0_i32 : i32, i32
  }
  func.func @transform_1(%arg0: i32) -> (i32, i32) {
    %c0_i32 = arith.constant 0 : i32
    %c0_i32_0 = arith.constant 0 : i32
    %c0_i32_1 = arith.constant 0 : i32
    return %c0_i32, %c0_i32_0 : i32, i32
  }
  func.func @transform_2(%arg0: i32) -> (i32, i32) {
    %c0_i32 = arith.constant 0 : i32
    %c0_i32_0 = arith.constant 0 : i32
    %c0_i32_1 = arith.constant 0 : i32
    return %c0_i32, %c0_i32_0 : i32, i32
  }
  func.func @transform_3(%arg0: i32) -> (i32, i32) {
    %c0_i32 = arith.constant 0 : i32
    %c0_i32_0 = arith.constant 0 : i32
    return %arg0, %c0_i32 : i32, i32
  }
}

module attributes {stable_mosaic.version = 11 : i64} {
  func.func @_matmul_stats_kernel(%arg0: i32, %arg1: i32, %arg2: memref<32x576xbf16, #tpu.memory_space<vmem>>, %arg3: memref<576x64xbf16, #tpu.memory_space<vmem>>, %arg4: memref<32x64xf32, #tpu.memory_space<vmem>>, %arg5: memref<1x1x64xf32, #tpu.memory_space<vmem>>, %arg6: memref<1x1x64xf32, #tpu.memory_space<vmem>>, %arg7: memref<1x64xf32, #tpu.memory_space<vmem>>, %arg8: memref<1x64xf32, #tpu.memory_space<vmem>>) attributes {dimension_semantics = [#tpu.dimension_semantics<parallel>, #tpu.dimension_semantics<arbitrary>], iteration_bounds = array<i64: 1, 1>, scalar_prefetch = 0 : i64, scratch_operands = 2 : i64, tpu.core_type = #tpu.core_type<tc>, window_params = [{transform_indices = @transform_0, window_bounds = array<i64: 32, 576>}, {pipeline_mode = #tpu.pipeline_mode<synchronous>, transform_indices = @transform_1, window_bounds = array<i64: 576, 64>}, {transform_indices = @transform_2, window_bounds = array<i64: 32, 64>}, {transform_indices = @transform_3, window_bounds = array<i64: 1, 1, 64>}, {transform_indices = @transform_4, window_bounds = array<i64: 1, 1, 64>}]} {
    %c0_i32 = arith.constant 0 : i32
    %0 = arith.cmpi eq, %arg1, %c0_i32 : i32
    %1 = arith.extui %0 : i1 to i32
    %c0_i32_0 = arith.constant 0 : i32
    %2 = arith.cmpi ne, %1, %c0_i32_0 : i32
    scf.if %2 {
      %cst_18 = arith.constant 0.000000e+00 : f32
      %21 = vector.broadcast %cst_18 : f32 to vector<1x64xf32>
      %c0_19 = arith.constant 0 : index
      %c0_20 = arith.constant 0 : index
      %22 = vector.load %arg7[%c0_19, %c0_20] : memref<1x64xf32, #tpu.memory_space<vmem>>, vector<1x64xf32>
      tpu.vector_store %arg7[%c0_19, %c0_20], %21 {strides = array<i32>} : memref<1x64xf32, #tpu.memory_space<vmem>>, vector<1x64xf32>,
      %cst_21 = arith.constant 0.000000e+00 : f32
      %23 = vector.broadcast %cst_21 : f32 to vector<1x64xf32>
      %c0_22 = arith.constant 0 : index
      %c0_23 = arith.constant 0 : index
      %24 = vector.load %arg8[%c0_22, %c0_23] : memref<1x64xf32, #tpu.memory_space<vmem>>, vector<1x64xf32>
      tpu.vector_store %arg8[%c0_22, %c0_23], %23 {strides = array<i32>} : memref<1x64xf32, #tpu.memory_space<vmem>>, vector<1x64xf32>,
    } else {
    }
    %c0 = arith.constant 0 : index
    %c0_1 = arith.constant 0 : index
    %3 = vector.load %arg2[%c0, %c0_1] : memref<32x576xbf16, #tpu.memory_space<vmem>>, vector<32x576xbf16>
    %c0_2 = arith.constant 0 : index
    %c0_3 = arith.constant 0 : index
    %4 = vector.load %arg3[%c0_2, %c0_3] : memref<576x64xbf16, #tpu.memory_space<vmem>>, vector<576x64xbf16>
    %cst = arith.constant dense<0.000000e+00> : vector<32x64xf32>
    %5 = tpu.matmul %3, %4, %cst {dimension_numbers = #tpu.dot_dimension_numbers<[1], [0], [0], [1], [0, 0, 1, 1], [], []>} : vector<32x576xbf16>, vector<576x64xbf16>, vector<32x64xf32> -> vector<32x64xf32>
    %c0_4 = arith.constant 0 : index
    %c0_5 = arith.constant 0 : index
    %6 = vector.load %arg4[%c0_4, %c0_5] : memref<32x64xf32, #tpu.memory_space<vmem>>, vector<32x64xf32>
    tpu.vector_store %arg4[%c0_4, %c0_5], %5 {strides = array<i32>} : memref<32x64xf32, #tpu.memory_space<vmem>>, vector<32x64xf32>,
    %c0_6 = arith.constant 0 : index
    %c0_7 = arith.constant 0 : index
    %7 = vector.load %arg7[%c0_6, %c0_7] : memref<1x64xf32, #tpu.memory_space<vmem>>, vector<1x64xf32>
    %cst_8 = arith.constant dense<0.000000e+00> : vector<64xf32>
    %8 = vector.multi_reduction <add>, %5, %cst_8 [0] : vector<32x64xf32> to vector<64xf32>
    %9 = vector.shape_cast %8 : vector<64xf32> to vector<1x64xf32>
    %10 = arith.addf %7, %9 : vector<1x64xf32>
    %c0_9 = arith.constant 0 : index
    %c0_10 = arith.constant 0 : index
    %11 = vector.load %arg7[%c0_9, %c0_10] : memref<1x64xf32, #tpu.memory_space<vmem>>, vector<1x64xf32>
    tpu.vector_store %arg7[%c0_9, %c0_10], %10 {strides = array<i32>} : memref<1x64xf32, #tpu.memory_space<vmem>>, vector<1x64xf32>,
    %c0_11 = arith.constant 0 : index
    %c0_12 = arith.constant 0 : index
    %12 = vector.load %arg8[%c0_11, %c0_12] : memref<1x64xf32, #tpu.memory_space<vmem>>, vector<1x64xf32>
    %13 = arith.mulf %5, %5 : vector<32x64xf32>
    %cst_13 = arith.constant dense<0.000000e+00> : vector<64xf32>
    %14 = vector.multi_reduction <add>, %13, %cst_13 [0] : vector<32x64xf32> to vector<64xf32>
    %15 = vector.shape_cast %14 : vector<64xf32> to vector<1x64xf32>
    %16 = arith.addf %12, %15 : vector<1x64xf32>
    %c0_14 = arith.constant 0 : index
    %c0_15 = arith.constant 0 : index
    %17 = vector.load %arg8[%c0_14, %c0_15] : memref<1x64xf32, #tpu.memory_space<vmem>>, vector<1x64xf32>
    tpu.vector_store %arg8[%c0_14, %c0_15], %16 {strides = array<i32>} : memref<1x64xf32, #tpu.memory_space<vmem>>, vector<1x64xf32>,
    %c0_i32_16 = arith.constant 0 : i32
    %18 = arith.cmpi eq, %arg1, %c0_i32_16 : i32
    %19 = arith.extui %18 : i1 to i32
    %c0_i32_17 = arith.constant 0 : i32
    %20 = arith.cmpi ne, %19, %c0_i32_17 : i32
    scf.if %20 {
      %c0_18 = arith.constant 0 : index
      %c0_19 = arith.constant 0 : index
      %21 = vector.load %arg7[%c0_18, %c0_19] : memref<1x64xf32, #tpu.memory_space<vmem>>, vector<1x64xf32>
      %22 = vector.shape_cast %21 : vector<1x64xf32> to vector<1x1x64xf32>
      %c0_20 = arith.constant 0 : index
      %c0_21 = arith.constant 0 : index
      %c0_22 = arith.constant 0 : index
      %23 = vector.load %arg5[%c0_20, %c0_21, %c0_22] : memref<1x1x64xf32, #tpu.memory_space<vmem>>, vector<1x1x64xf32>
      tpu.vector_store %arg5[%c0_20, %c0_21, %c0_22], %22 {strides = array<i32>} : memref<1x1x64xf32, #tpu.memory_space<vmem>>, vector<1x1x64xf32>,
      %c0_23 = arith.constant 0 : index
      %c0_24 = arith.constant 0 : index
      %24 = vector.load %arg8[%c0_23, %c0_24] : memref<1x64xf32, #tpu.memory_space<vmem>>, vector<1x64xf32>
      %25 = vector.shape_cast %24 : vector<1x64xf32> to vector<1x1x64xf32>
      %c0_25 = arith.constant 0 : index
      %c0_26 = arith.constant 0 : index
      %c0_27 = arith.constant 0 : index
      %26 = vector.load %arg6[%c0_25, %c0_26, %c0_27] : memref<1x1x64xf32, #tpu.memory_space<vmem>>, vector<1x1x64xf32>
      tpu.vector_store %arg6[%c0_25, %c0_26, %c0_27], %25 {strides = array<i32>} : memref<1x1x64xf32, #tpu.memory_space<vmem>>, vector<1x1x64xf32>,
    } else {
    }
    return
  }
  func.func @transform_0(%arg0: i32, %arg1: i32) -> (i32, i32) {
    %c1_i32 = arith.constant 1 : i32
    %0 = arith.muli %arg0, %c1_i32 : i32
    %1 = arith.addi %0, %arg1 : i32
    %c0_i32 = arith.constant 0 : i32
    %c0_i32_0 = arith.constant 0 : i32
    return %1, %c0_i32 : i32, i32
  }
  func.func @transform_1(%arg0: i32, %arg1: i32) -> (i32, i32) {
    %c0_i32 = arith.constant 0 : i32
    %c0_i32_0 = arith.constant 0 : i32
    %c0_i32_1 = arith.constant 0 : i32
    return %c0_i32, %c0_i32_0 : i32, i32
  }
  func.func @transform_2(%arg0: i32, %arg1: i32) -> (i32, i32) {
    %c1_i32 = arith.constant 1 : i32
    %0 = arith.muli %arg0, %c1_i32 : i32
    %1 = arith.addi %0, %arg1 : i32
    %c0_i32 = arith.constant 0 : i32
    %c0_i32_0 = arith.constant 0 : i32
    return %1, %c0_i32 : i32, i32
  }
  func.func @transform_3(%arg0: i32, %arg1: i32) -> (i32, i32, i32) {
    %c0_i32 = arith.constant 0 : i32
    %c0_i32_0 = arith.constant 0 : i32
    %c0_i32_1 = arith.constant 0 : i32
    return %arg0, %c0_i32, %c0_i32_0 : i32, i32, i32
  }
  func.func @transform_4(%arg0: i32, %arg1: i32) -> (i32, i32, i32) {
    %c0_i32 = arith.constant 0 : i32
    %c0_i32_0 = arith.constant 0 : i32
    %c0_i32_1 = arith.constant 0 : i32
    return %arg0, %c0_i32, %c0_i32_0 : i32, i32, i32
  }
}

module attributes {stable_mosaic.version = 11 : i64} {
  func.func @_scale_shift_kernel(%arg0: i32, %arg1: memref<32x64xf32, #tpu.memory_space<vmem>>, %arg2: memref<1x64xf32, #tpu.memory_space<vmem>>, %arg3: memref<1x64xf32, #tpu.memory_space<vmem>>, %arg4: memref<32x64xbf16, #tpu.memory_space<vmem>>, %arg5: memref<32x64xbf16, #tpu.memory_space<vmem>>) attributes {dimension_semantics = [#tpu.dimension_semantics<parallel>], iteration_bounds = array<i64: 1>, scalar_prefetch = 0 : i64, scratch_operands = 0 : i64, tpu.core_type = #tpu.core_type<tc>, window_params = [{transform_indices = @transform_0, window_bounds = array<i64: 32, 64>}, {pipeline_mode = #tpu.pipeline_mode<synchronous>, transform_indices = @transform_1, window_bounds = array<i64: 1, 64>}, {pipeline_mode = #tpu.pipeline_mode<synchronous>, transform_indices = @transform_2, window_bounds = array<i64: 1, 64>}, {transform_indices = @transform_3, window_bounds = array<i64: 32, 64>}, {transform_indices = @transform_4, window_bounds = array<i64: 32, 64>}]} {
    %c0 = arith.constant 0 : index
    %c0_0 = arith.constant 0 : index
    %0 = vector.load %arg1[%c0, %c0_0] : memref<32x64xf32, #tpu.memory_space<vmem>>, vector<32x64xf32>
    %c0_1 = arith.constant 0 : index
    %c0_2 = arith.constant 0 : index
    %1 = vector.load %arg2[%c0_1, %c0_2] : memref<1x64xf32, #tpu.memory_space<vmem>>, vector<1x64xf32>
    %2 = vector.broadcast %1 : vector<1x64xf32> to vector<32x64xf32>
    %3 = arith.mulf %0, %2 : vector<32x64xf32>
    %c0_3 = arith.constant 0 : index
    %c0_4 = arith.constant 0 : index
    %4 = vector.load %arg3[%c0_3, %c0_4] : memref<1x64xf32, #tpu.memory_space<vmem>>, vector<1x64xf32>
    %5 = vector.broadcast %4 : vector<1x64xf32> to vector<32x64xf32>
    %6 = arith.addf %3, %5 : vector<32x64xf32>
    %c0_5 = arith.constant 0 : index
    %c0_6 = arith.constant 0 : index
    %7 = vector.load %arg4[%c0_5, %c0_6] : memref<32x64xbf16, #tpu.memory_space<vmem>>, vector<32x64xbf16>
    %8 = arith.extf %7 : vector<32x64xbf16> to vector<32x64xf32>
    %9 = arith.addf %6, %8 : vector<32x64xf32>
    %10 = arith.truncf %9 : vector<32x64xf32> to vector<32x64xbf16>
    %c0_7 = arith.constant 0 : index
    %c0_8 = arith.constant 0 : index
    %11 = vector.load %arg5[%c0_7, %c0_8] : memref<32x64xbf16, #tpu.memory_space<vmem>>, vector<32x64xbf16>
    tpu.vector_store %arg5[%c0_7, %c0_8], %10 {strides = array<i32>} : memref<32x64xbf16, #tpu.memory_space<vmem>>, vector<32x64xbf16>,
    return
  }
  func.func @transform_0(%arg0: i32) -> (i32, i32) {
    %c0_i32 = arith.constant 0 : i32
    %c0_i32_0 = arith.constant 0 : i32
    return %arg0, %c0_i32 : i32, i32
  }
  func.func @transform_1(%arg0: i32) -> (i32, i32) {
    %c0_i32 = arith.constant 0 : i32
    %c0_i32_0 = arith.constant 0 : i32
    %c0_i32_1 = arith.constant 0 : i32
    return %c0_i32, %c0_i32_0 : i32, i32
  }
  func.func @transform_2(%arg0: i32) -> (i32, i32) {
    %c0_i32 = arith.constant 0 : i32
    %c0_i32_0 = arith.constant 0 : i32
    %c0_i32_1 = arith.constant 0 : i32
    return %c0_i32, %c0_i32_0 : i32, i32
  }
  func.func @transform_3(%arg0: i32) -> (i32, i32) {
    %c0_i32 = arith.constant 0 : i32
    %c0_i32_0 = arith.constant 0 : i32
    return %arg0, %c0_i32 : i32, i32
  }
  func.func @transform_4(%arg0: i32) -> (i32, i32) {
    %c0_i32 = arith.constant 0 : i32
    %c0_i32_0 = arith.constant 0 : i32
    return %arg0, %c0_i32 : i32, i32
  }
}

module attributes {stable_mosaic.version = 11 : i64} {
  func.func @_matmul_stats_kernel(%arg0: i32, %arg1: i32, %arg2: memref<32x256xbf16, #tpu.memory_space<vmem>>, %arg3: memref<256x32xbf16, #tpu.memory_space<vmem>>, %arg4: memref<32x32xf32, #tpu.memory_space<vmem>>, %arg5: memref<1x1x32xf32, #tpu.memory_space<vmem>>, %arg6: memref<1x1x32xf32, #tpu.memory_space<vmem>>, %arg7: memref<1x32xf32, #tpu.memory_space<vmem>>, %arg8: memref<1x32xf32, #tpu.memory_space<vmem>>) attributes {dimension_semantics = [#tpu.dimension_semantics<parallel>, #tpu.dimension_semantics<arbitrary>], iteration_bounds = array<i64: 1, 1>, scalar_prefetch = 0 : i64, scratch_operands = 2 : i64, tpu.core_type = #tpu.core_type<tc>, window_params = [{transform_indices = @transform_0, window_bounds = array<i64: 32, 256>}, {pipeline_mode = #tpu.pipeline_mode<synchronous>, transform_indices = @transform_1, window_bounds = array<i64: 256, 32>}, {transform_indices = @transform_2, window_bounds = array<i64: 32, 32>}, {transform_indices = @transform_3, window_bounds = array<i64: 1, 1, 32>}, {transform_indices = @transform_4, window_bounds = array<i64: 1, 1, 32>}]} {
    %c0_i32 = arith.constant 0 : i32
    %0 = arith.cmpi eq, %arg1, %c0_i32 : i32
    %1 = arith.extui %0 : i1 to i32
    %c0_i32_0 = arith.constant 0 : i32
    %2 = arith.cmpi ne, %1, %c0_i32_0 : i32
    scf.if %2 {
      %cst_18 = arith.constant 0.000000e+00 : f32
      %21 = vector.broadcast %cst_18 : f32 to vector<1x32xf32>
      %c0_19 = arith.constant 0 : index
      %c0_20 = arith.constant 0 : index
      %22 = vector.load %arg7[%c0_19, %c0_20] : memref<1x32xf32, #tpu.memory_space<vmem>>, vector<1x32xf32>
      tpu.vector_store %arg7[%c0_19, %c0_20], %21 {strides = array<i32>} : memref<1x32xf32, #tpu.memory_space<vmem>>, vector<1x32xf32>,
      %cst_21 = arith.constant 0.000000e+00 : f32
      %23 = vector.broadcast %cst_21 : f32 to vector<1x32xf32>
      %c0_22 = arith.constant 0 : index
      %c0_23 = arith.constant 0 : index
      %24 = vector.load %arg8[%c0_22, %c0_23] : memref<1x32xf32, #tpu.memory_space<vmem>>, vector<1x32xf32>
      tpu.vector_store %arg8[%c0_22, %c0_23], %23 {strides = array<i32>} : memref<1x32xf32, #tpu.memory_space<vmem>>, vector<1x32xf32>,
    } else {
    }
    %c0 = arith.constant 0 : index
    %c0_1 = arith.constant 0 : index
    %3 = vector.load %arg2[%c0, %c0_1] : memref<32x256xbf16, #tpu.memory_space<vmem>>, vector<32x256xbf16>
    %c0_2 = arith.constant 0 : index
    %c0_3 = arith.constant 0 : index
    %4 = vector.load %arg3[%c0_2, %c0_3] : memref<256x32xbf16, #tpu.memory_space<vmem>>, vector<256x32xbf16>
    %cst = arith.constant dense<0.000000e+00> : vector<32x32xf32>
    %5 = tpu.matmul %3, %4, %cst {dimension_numbers = #tpu.dot_dimension_numbers<[1], [0], [0], [1], [0, 0, 1, 1], [], []>} : vector<32x256xbf16>, vector<256x32xbf16>, vector<32x32xf32> -> vector<32x32xf32>
    %c0_4 = arith.constant 0 : index
    %c0_5 = arith.constant 0 : index
    %6 = vector.load %arg4[%c0_4, %c0_5] : memref<32x32xf32, #tpu.memory_space<vmem>>, vector<32x32xf32>
    tpu.vector_store %arg4[%c0_4, %c0_5], %5 {strides = array<i32>} : memref<32x32xf32, #tpu.memory_space<vmem>>, vector<32x32xf32>,
    %c0_6 = arith.constant 0 : index
    %c0_7 = arith.constant 0 : index
    %7 = vector.load %arg7[%c0_6, %c0_7] : memref<1x32xf32, #tpu.memory_space<vmem>>, vector<1x32xf32>
    %cst_8 = arith.constant dense<0.000000e+00> : vector<32xf32>
    %8 = vector.multi_reduction <add>, %5, %cst_8 [0] : vector<32x32xf32> to vector<32xf32>
    %9 = vector.shape_cast %8 : vector<32xf32> to vector<1x32xf32>
    %10 = arith.addf %7, %9 : vector<1x32xf32>
    %c0_9 = arith.constant 0 : index
    %c0_10 = arith.constant 0 : index
    %11 = vector.load %arg7[%c0_9, %c0_10] : memref<1x32xf32, #tpu.memory_space<vmem>>, vector<1x32xf32>
    tpu.vector_store %arg7[%c0_9, %c0_10], %10 {strides = array<i32>} : memref<1x32xf32, #tpu.memory_space<vmem>>, vector<1x32xf32>,
    %c0_11 = arith.constant 0 : index
    %c0_12 = arith.constant 0 : index
    %12 = vector.load %arg8[%c0_11, %c0_12] : memref<1x32xf32, #tpu.memory_space<vmem>>, vector<1x32xf32>
    %13 = arith.mulf %5, %5 : vector<32x32xf32>
    %cst_13 = arith.constant dense<0.000000e+00> : vector<32xf32>
    %14 = vector.multi_reduction <add>, %13, %cst_13 [0] : vector<32x32xf32> to vector<32xf32>
    %15 = vector.shape_cast %14 : vector<32xf32> to vector<1x32xf32>
    %16 = arith.addf %12, %15 : vector<1x32xf32>
    %c0_14 = arith.constant 0 : index
    %c0_15 = arith.constant 0 : index
    %17 = vector.load %arg8[%c0_14, %c0_15] : memref<1x32xf32, #tpu.memory_space<vmem>>, vector<1x32xf32>
    tpu.vector_store %arg8[%c0_14, %c0_15], %16 {strides = array<i32>} : memref<1x32xf32, #tpu.memory_space<vmem>>, vector<1x32xf32>,
    %c0_i32_16 = arith.constant 0 : i32
    %18 = arith.cmpi eq, %arg1, %c0_i32_16 : i32
    %19 = arith.extui %18 : i1 to i32
    %c0_i32_17 = arith.constant 0 : i32
    %20 = arith.cmpi ne, %19, %c0_i32_17 : i32
    scf.if %20 {
      %c0_18 = arith.constant 0 : index
      %c0_19 = arith.constant 0 : index
      %21 = vector.load %arg7[%c0_18, %c0_19] : memref<1x32xf32, #tpu.memory_space<vmem>>, vector<1x32xf32>
      %22 = vector.shape_cast %21 : vector<1x32xf32> to vector<1x1x32xf32>
      %c0_20 = arith.constant 0 : index
      %c0_21 = arith.constant 0 : index
      %c0_22 = arith.constant 0 : index
      %23 = vector.load %arg5[%c0_20, %c0_21, %c0_22] : memref<1x1x32xf32, #tpu.memory_space<vmem>>, vector<1x1x32xf32>
      tpu.vector_store %arg5[%c0_20, %c0_21, %c0_22], %22 {strides = array<i32>} : memref<1x1x32xf32, #tpu.memory_space<vmem>>, vector<1x1x32xf32>,
      %c0_23 = arith.constant 0 : index
      %c0_24 = arith.constant 0 : index
      %24 = vector.load %arg8[%c0_23, %c0_24] : memref<1x32xf32, #tpu.memory_space<vmem>>, vector<1x32xf32>
      %25 = vector.shape_cast %24 : vector<1x32xf32> to vector<1x1x32xf32>
      %c0_25 = arith.constant 0 : index
      %c0_26 = arith.constant 0 : index
      %c0_27 = arith.constant 0 : index
      %26 = vector.load %arg6[%c0_25, %c0_26, %c0_27] : memref<1x1x32xf32, #tpu.memory_space<vmem>>, vector<1x1x32xf32>
      tpu.vector_store %arg6[%c0_25, %c0_26, %c0_27], %25 {strides = array<i32>} : memref<1x1x32xf32, #tpu.memory_space<vmem>>, vector<1x1x32xf32>,
    } else {
    }
    return
  }
  func.func @transform_0(%arg0: i32, %arg1: i32) -> (i32, i32) {
    %c1_i32 = arith.constant 1 : i32
    %0 = arith.muli %arg0, %c1_i32 : i32
    %1 = arith.addi %0, %arg1 : i32
    %c0_i32 = arith.constant 0 : i32
    %c0_i32_0 = arith.constant 0 : i32
    return %1, %c0_i32 : i32, i32
  }
  func.func @transform_1(%arg0: i32, %arg1: i32) -> (i32, i32) {
    %c0_i32 = arith.constant 0 : i32
    %c0_i32_0 = arith.constant 0 : i32
    %c0_i32_1 = arith.constant 0 : i32
    return %c0_i32, %c0_i32_0 : i32, i32
  }
  func.func @transform_2(%arg0: i32, %arg1: i32) -> (i32, i32) {
    %c1_i32 = arith.constant 1 : i32
    %0 = arith.muli %arg0, %c1_i32 : i32
    %1 = arith.addi %0, %arg1 : i32
    %c0_i32 = arith.constant 0 : i32
    %c0_i32_0 = arith.constant 0 : i32
    return %1, %c0_i32 : i32, i32
  }
  func.func @transform_3(%arg0: i32, %arg1: i32) -> (i32, i32, i32) {
    %c0_i32 = arith.constant 0 : i32
    %c0_i32_0 = arith.constant 0 : i32
    %c0_i32_1 = arith.constant 0 : i32
    return %arg0, %c0_i32, %c0_i32_0 : i32, i32, i32
  }
  func.func @transform_4(%arg0: i32, %arg1: i32) -> (i32, i32, i32) {
    %c0_i32 = arith.constant 0 : i32
    %c0_i32_0 = arith.constant 0 : i32
    %c0_i32_1 = arith.constant 0 : i32
    return %arg0, %c0_i32, %c0_i32_0 : i32, i32, i32
  }
}

module attributes {stable_mosaic.version = 11 : i64} {
  func.func @_matmul_stats_kernel(%arg0: i32, %arg1: i32, %arg2: memref<32x64xbf16, #tpu.memory_space<vmem>>, %arg3: memref<64x32xbf16, #tpu.memory_space<vmem>>, %arg4: memref<32x32xf32, #tpu.memory_space<vmem>>, %arg5: memref<1x1x32xf32, #tpu.memory_space<vmem>>, %arg6: memref<1x1x32xf32, #tpu.memory_space<vmem>>, %arg7: memref<1x32xf32, #tpu.memory_space<vmem>>, %arg8: memref<1x32xf32, #tpu.memory_space<vmem>>) attributes {dimension_semantics = [#tpu.dimension_semantics<parallel>, #tpu.dimension_semantics<arbitrary>], iteration_bounds = array<i64: 1, 1>, scalar_prefetch = 0 : i64, scratch_operands = 2 : i64, tpu.core_type = #tpu.core_type<tc>, window_params = [{transform_indices = @transform_0, window_bounds = array<i64: 32, 64>}, {pipeline_mode = #tpu.pipeline_mode<synchronous>, transform_indices = @transform_1, window_bounds = array<i64: 64, 32>}, {transform_indices = @transform_2, window_bounds = array<i64: 32, 32>}, {transform_indices = @transform_3, window_bounds = array<i64: 1, 1, 32>}, {transform_indices = @transform_4, window_bounds = array<i64: 1, 1, 32>}]} {
    %c0_i32 = arith.constant 0 : i32
    %0 = arith.cmpi eq, %arg1, %c0_i32 : i32
    %1 = arith.extui %0 : i1 to i32
    %c0_i32_0 = arith.constant 0 : i32
    %2 = arith.cmpi ne, %1, %c0_i32_0 : i32
    scf.if %2 {
      %cst_18 = arith.constant 0.000000e+00 : f32
      %21 = vector.broadcast %cst_18 : f32 to vector<1x32xf32>
      %c0_19 = arith.constant 0 : index
      %c0_20 = arith.constant 0 : index
      %22 = vector.load %arg7[%c0_19, %c0_20] : memref<1x32xf32, #tpu.memory_space<vmem>>, vector<1x32xf32>
      tpu.vector_store %arg7[%c0_19, %c0_20], %21 {strides = array<i32>} : memref<1x32xf32, #tpu.memory_space<vmem>>, vector<1x32xf32>,
      %cst_21 = arith.constant 0.000000e+00 : f32
      %23 = vector.broadcast %cst_21 : f32 to vector<1x32xf32>
      %c0_22 = arith.constant 0 : index
      %c0_23 = arith.constant 0 : index
      %24 = vector.load %arg8[%c0_22, %c0_23] : memref<1x32xf32, #tpu.memory_space<vmem>>, vector<1x32xf32>
      tpu.vector_store %arg8[%c0_22, %c0_23], %23 {strides = array<i32>} : memref<1x32xf32, #tpu.memory_space<vmem>>, vector<1x32xf32>,
    } else {
    }
    %c0 = arith.constant 0 : index
    %c0_1 = arith.constant 0 : index
    %3 = vector.load %arg2[%c0, %c0_1] : memref<32x64xbf16, #tpu.memory_space<vmem>>, vector<32x64xbf16>
    %c0_2 = arith.constant 0 : index
    %c0_3 = arith.constant 0 : index
    %4 = vector.load %arg3[%c0_2, %c0_3] : memref<64x32xbf16, #tpu.memory_space<vmem>>, vector<64x32xbf16>
    %cst = arith.constant dense<0.000000e+00> : vector<32x32xf32>
    %5 = tpu.matmul %3, %4, %cst {dimension_numbers = #tpu.dot_dimension_numbers<[1], [0], [0], [1], [0, 0, 1, 1], [], []>} : vector<32x64xbf16>, vector<64x32xbf16>, vector<32x32xf32> -> vector<32x32xf32>
    %c0_4 = arith.constant 0 : index
    %c0_5 = arith.constant 0 : index
    %6 = vector.load %arg4[%c0_4, %c0_5] : memref<32x32xf32, #tpu.memory_space<vmem>>, vector<32x32xf32>
    tpu.vector_store %arg4[%c0_4, %c0_5], %5 {strides = array<i32>} : memref<32x32xf32, #tpu.memory_space<vmem>>, vector<32x32xf32>,
    %c0_6 = arith.constant 0 : index
    %c0_7 = arith.constant 0 : index
    %7 = vector.load %arg7[%c0_6, %c0_7] : memref<1x32xf32, #tpu.memory_space<vmem>>, vector<1x32xf32>
    %cst_8 = arith.constant dense<0.000000e+00> : vector<32xf32>
    %8 = vector.multi_reduction <add>, %5, %cst_8 [0] : vector<32x32xf32> to vector<32xf32>
    %9 = vector.shape_cast %8 : vector<32xf32> to vector<1x32xf32>
    %10 = arith.addf %7, %9 : vector<1x32xf32>
    %c0_9 = arith.constant 0 : index
    %c0_10 = arith.constant 0 : index
    %11 = vector.load %arg7[%c0_9, %c0_10] : memref<1x32xf32, #tpu.memory_space<vmem>>, vector<1x32xf32>
    tpu.vector_store %arg7[%c0_9, %c0_10], %10 {strides = array<i32>} : memref<1x32xf32, #tpu.memory_space<vmem>>, vector<1x32xf32>,
    %c0_11 = arith.constant 0 : index
    %c0_12 = arith.constant 0 : index
    %12 = vector.load %arg8[%c0_11, %c0_12] : memref<1x32xf32, #tpu.memory_space<vmem>>, vector<1x32xf32>
    %13 = arith.mulf %5, %5 : vector<32x32xf32>
    %cst_13 = arith.constant dense<0.000000e+00> : vector<32xf32>
    %14 = vector.multi_reduction <add>, %13, %cst_13 [0] : vector<32x32xf32> to vector<32xf32>
    %15 = vector.shape_cast %14 : vector<32xf32> to vector<1x32xf32>
    %16 = arith.addf %12, %15 : vector<1x32xf32>
    %c0_14 = arith.constant 0 : index
    %c0_15 = arith.constant 0 : index
    %17 = vector.load %arg8[%c0_14, %c0_15] : memref<1x32xf32, #tpu.memory_space<vmem>>, vector<1x32xf32>
    tpu.vector_store %arg8[%c0_14, %c0_15], %16 {strides = array<i32>} : memref<1x32xf32, #tpu.memory_space<vmem>>, vector<1x32xf32>,
    %c0_i32_16 = arith.constant 0 : i32
    %18 = arith.cmpi eq, %arg1, %c0_i32_16 : i32
    %19 = arith.extui %18 : i1 to i32
    %c0_i32_17 = arith.constant 0 : i32
    %20 = arith.cmpi ne, %19, %c0_i32_17 : i32
    scf.if %20 {
      %c0_18 = arith.constant 0 : index
      %c0_19 = arith.constant 0 : index
      %21 = vector.load %arg7[%c0_18, %c0_19] : memref<1x32xf32, #tpu.memory_space<vmem>>, vector<1x32xf32>
      %22 = vector.shape_cast %21 : vector<1x32xf32> to vector<1x1x32xf32>
      %c0_20 = arith.constant 0 : index
      %c0_21 = arith.constant 0 : index
      %c0_22 = arith.constant 0 : index
      %23 = vector.load %arg5[%c0_20, %c0_21, %c0_22] : memref<1x1x32xf32, #tpu.memory_space<vmem>>, vector<1x1x32xf32>
      tpu.vector_store %arg5[%c0_20, %c0_21, %c0_22], %22 {strides = array<i32>} : memref<1x1x32xf32, #tpu.memory_space<vmem>>, vector<1x1x32xf32>,
      %c0_23 = arith.constant 0 : index
      %c0_24 = arith.constant 0 : index
      %24 = vector.load %arg8[%c0_23, %c0_24] : memref<1x32xf32, #tpu.memory_space<vmem>>, vector<1x32xf32>
      %25 = vector.shape_cast %24 : vector<1x32xf32> to vector<1x1x32xf32>
      %c0_25 = arith.constant 0 : index
      %c0_26 = arith.constant 0 : index
      %c0_27 = arith.constant 0 : index
      %26 = vector.load %arg6[%c0_25, %c0_26, %c0_27] : memref<1x1x32xf32, #tpu.memory_space<vmem>>, vector<1x1x32xf32>
      tpu.vector_store %arg6[%c0_25, %c0_26, %c0_27], %25 {strides = array<i32>} : memref<1x1x32xf32, #tpu.memory_space<vmem>>, vector<1x1x32xf32>,
    } else {
    }
    return
  }
  func.func @transform_0(%arg0: i32, %arg1: i32) -> (i32, i32) {
    %c1_i32 = arith.constant 1 : i32
    %0 = arith.muli %arg0, %c1_i32 : i32
    %1 = arith.addi %0, %arg1 : i32
    %c0_i32 = arith.constant 0 : i32
    %c0_i32_0 = arith.constant 0 : i32
    return %1, %c0_i32 : i32, i32
  }
  func.func @transform_1(%arg0: i32, %arg1: i32) -> (i32, i32) {
    %c0_i32 = arith.constant 0 : i32
    %c0_i32_0 = arith.constant 0 : i32
    %c0_i32_1 = arith.constant 0 : i32
    return %c0_i32, %c0_i32_0 : i32, i32
  }
  func.func @transform_2(%arg0: i32, %arg1: i32) -> (i32, i32) {
    %c1_i32 = arith.constant 1 : i32
    %0 = arith.muli %arg0, %c1_i32 : i32
    %1 = arith.addi %0, %arg1 : i32
    %c0_i32 = arith.constant 0 : i32
    %c0_i32_0 = arith.constant 0 : i32
    return %1, %c0_i32 : i32, i32
  }
  func.func @transform_3(%arg0: i32, %arg1: i32) -> (i32, i32, i32) {
    %c0_i32 = arith.constant 0 : i32
    %c0_i32_0 = arith.constant 0 : i32
    %c0_i32_1 = arith.constant 0 : i32
    return %arg0, %c0_i32, %c0_i32_0 : i32, i32, i32
  }
  func.func @transform_4(%arg0: i32, %arg1: i32) -> (i32, i32, i32) {
    %c0_i32 = arith.constant 0 : i32
    %c0_i32_0 = arith.constant 0 : i32
    %c0_i32_1 = arith.constant 0 : i32
    return %arg0, %c0_i32, %c0_i32_0 : i32, i32, i32
  }
}

module attributes {stable_mosaic.version = 11 : i64} {
  func.func @_matmul_stats_kernel(%arg0: i32, %arg1: i32, %arg2: memref<32x128xbf16, #tpu.memory_space<vmem>>, %arg3: memref<128x32xbf16, #tpu.memory_space<vmem>>, %arg4: memref<32x32xf32, #tpu.memory_space<vmem>>, %arg5: memref<1x1x32xf32, #tpu.memory_space<vmem>>, %arg6: memref<1x1x32xf32, #tpu.memory_space<vmem>>, %arg7: memref<1x32xf32, #tpu.memory_space<vmem>>, %arg8: memref<1x32xf32, #tpu.memory_space<vmem>>) attributes {dimension_semantics = [#tpu.dimension_semantics<parallel>, #tpu.dimension_semantics<arbitrary>], iteration_bounds = array<i64: 1, 1>, scalar_prefetch = 0 : i64, scratch_operands = 2 : i64, tpu.core_type = #tpu.core_type<tc>, window_params = [{transform_indices = @transform_0, window_bounds = array<i64: 32, 128>}, {pipeline_mode = #tpu.pipeline_mode<synchronous>, transform_indices = @transform_1, window_bounds = array<i64: 128, 32>}, {transform_indices = @transform_2, window_bounds = array<i64: 32, 32>}, {transform_indices = @transform_3, window_bounds = array<i64: 1, 1, 32>}, {transform_indices = @transform_4, window_bounds = array<i64: 1, 1, 32>}]} {
    %c0_i32 = arith.constant 0 : i32
    %0 = arith.cmpi eq, %arg1, %c0_i32 : i32
    %1 = arith.extui %0 : i1 to i32
    %c0_i32_0 = arith.constant 0 : i32
    %2 = arith.cmpi ne, %1, %c0_i32_0 : i32
    scf.if %2 {
      %cst_18 = arith.constant 0.000000e+00 : f32
      %21 = vector.broadcast %cst_18 : f32 to vector<1x32xf32>
      %c0_19 = arith.constant 0 : index
      %c0_20 = arith.constant 0 : index
      %22 = vector.load %arg7[%c0_19, %c0_20] : memref<1x32xf32, #tpu.memory_space<vmem>>, vector<1x32xf32>
      tpu.vector_store %arg7[%c0_19, %c0_20], %21 {strides = array<i32>} : memref<1x32xf32, #tpu.memory_space<vmem>>, vector<1x32xf32>,
      %cst_21 = arith.constant 0.000000e+00 : f32
      %23 = vector.broadcast %cst_21 : f32 to vector<1x32xf32>
      %c0_22 = arith.constant 0 : index
      %c0_23 = arith.constant 0 : index
      %24 = vector.load %arg8[%c0_22, %c0_23] : memref<1x32xf32, #tpu.memory_space<vmem>>, vector<1x32xf32>
      tpu.vector_store %arg8[%c0_22, %c0_23], %23 {strides = array<i32>} : memref<1x32xf32, #tpu.memory_space<vmem>>, vector<1x32xf32>,
    } else {
    }
    %c0 = arith.constant 0 : index
    %c0_1 = arith.constant 0 : index
    %3 = vector.load %arg2[%c0, %c0_1] : memref<32x128xbf16, #tpu.memory_space<vmem>>, vector<32x128xbf16>
    %c0_2 = arith.constant 0 : index
    %c0_3 = arith.constant 0 : index
    %4 = vector.load %arg3[%c0_2, %c0_3] : memref<128x32xbf16, #tpu.memory_space<vmem>>, vector<128x32xbf16>
    %cst = arith.constant dense<0.000000e+00> : vector<32x32xf32>
    %5 = tpu.matmul %3, %4, %cst {dimension_numbers = #tpu.dot_dimension_numbers<[1], [0], [0], [1], [0, 0, 1, 1], [], []>} : vector<32x128xbf16>, vector<128x32xbf16>, vector<32x32xf32> -> vector<32x32xf32>
    %c0_4 = arith.constant 0 : index
    %c0_5 = arith.constant 0 : index
    %6 = vector.load %arg4[%c0_4, %c0_5] : memref<32x32xf32, #tpu.memory_space<vmem>>, vector<32x32xf32>
    tpu.vector_store %arg4[%c0_4, %c0_5], %5 {strides = array<i32>} : memref<32x32xf32, #tpu.memory_space<vmem>>, vector<32x32xf32>,
    %c0_6 = arith.constant 0 : index
    %c0_7 = arith.constant 0 : index
    %7 = vector.load %arg7[%c0_6, %c0_7] : memref<1x32xf32, #tpu.memory_space<vmem>>, vector<1x32xf32>
    %cst_8 = arith.constant dense<0.000000e+00> : vector<32xf32>
    %8 = vector.multi_reduction <add>, %5, %cst_8 [0] : vector<32x32xf32> to vector<32xf32>
    %9 = vector.shape_cast %8 : vector<32xf32> to vector<1x32xf32>
    %10 = arith.addf %7, %9 : vector<1x32xf32>
    %c0_9 = arith.constant 0 : index
    %c0_10 = arith.constant 0 : index
    %11 = vector.load %arg7[%c0_9, %c0_10] : memref<1x32xf32, #tpu.memory_space<vmem>>, vector<1x32xf32>
    tpu.vector_store %arg7[%c0_9, %c0_10], %10 {strides = array<i32>} : memref<1x32xf32, #tpu.memory_space<vmem>>, vector<1x32xf32>,
    %c0_11 = arith.constant 0 : index
    %c0_12 = arith.constant 0 : index
    %12 = vector.load %arg8[%c0_11, %c0_12] : memref<1x32xf32, #tpu.memory_space<vmem>>, vector<1x32xf32>
    %13 = arith.mulf %5, %5 : vector<32x32xf32>
    %cst_13 = arith.constant dense<0.000000e+00> : vector<32xf32>
    %14 = vector.multi_reduction <add>, %13, %cst_13 [0] : vector<32x32xf32> to vector<32xf32>
    %15 = vector.shape_cast %14 : vector<32xf32> to vector<1x32xf32>
    %16 = arith.addf %12, %15 : vector<1x32xf32>
    %c0_14 = arith.constant 0 : index
    %c0_15 = arith.constant 0 : index
    %17 = vector.load %arg8[%c0_14, %c0_15] : memref<1x32xf32, #tpu.memory_space<vmem>>, vector<1x32xf32>
    tpu.vector_store %arg8[%c0_14, %c0_15], %16 {strides = array<i32>} : memref<1x32xf32, #tpu.memory_space<vmem>>, vector<1x32xf32>,
    %c0_i32_16 = arith.constant 0 : i32
    %18 = arith.cmpi eq, %arg1, %c0_i32_16 : i32
    %19 = arith.extui %18 : i1 to i32
    %c0_i32_17 = arith.constant 0 : i32
    %20 = arith.cmpi ne, %19, %c0_i32_17 : i32
    scf.if %20 {
      %c0_18 = arith.constant 0 : index
      %c0_19 = arith.constant 0 : index
      %21 = vector.load %arg7[%c0_18, %c0_19] : memref<1x32xf32, #tpu.memory_space<vmem>>, vector<1x32xf32>
      %22 = vector.shape_cast %21 : vector<1x32xf32> to vector<1x1x32xf32>
      %c0_20 = arith.constant 0 : index
      %c0_21 = arith.constant 0 : index
      %c0_22 = arith.constant 0 : index
      %23 = vector.load %arg5[%c0_20, %c0_21, %c0_22] : memref<1x1x32xf32, #tpu.memory_space<vmem>>, vector<1x1x32xf32>
      tpu.vector_store %arg5[%c0_20, %c0_21, %c0_22], %22 {strides = array<i32>} : memref<1x1x32xf32, #tpu.memory_space<vmem>>, vector<1x1x32xf32>,
      %c0_23 = arith.constant 0 : index
      %c0_24 = arith.constant 0 : index
      %24 = vector.load %arg8[%c0_23, %c0_24] : memref<1x32xf32, #tpu.memory_space<vmem>>, vector<1x32xf32>
      %25 = vector.shape_cast %24 : vector<1x32xf32> to vector<1x1x32xf32>
      %c0_25 = arith.constant 0 : index
      %c0_26 = arith.constant 0 : index
      %c0_27 = arith.constant 0 : index
      %26 = vector.load %arg6[%c0_25, %c0_26, %c0_27] : memref<1x1x32xf32, #tpu.memory_space<vmem>>, vector<1x1x32xf32>
      tpu.vector_store %arg6[%c0_25, %c0_26, %c0_27], %25 {strides = array<i32>} : memref<1x1x32xf32, #tpu.memory_space<vmem>>, vector<1x1x32xf32>,
    } else {
    }
    return
  }
  func.func @transform_0(%arg0: i32, %arg1: i32) -> (i32, i32) {
    %c1_i32 = arith.constant 1 : i32
    %0 = arith.muli %arg0, %c1_i32 : i32
    %1 = arith.addi %0, %arg1 : i32
    %c0_i32 = arith.constant 0 : i32
    %c0_i32_0 = arith.constant 0 : i32
    return %1, %c0_i32 : i32, i32
  }
  func.func @transform_1(%arg0: i32, %arg1: i32) -> (i32, i32) {
    %c0_i32 = arith.constant 0 : i32
    %c0_i32_0 = arith.constant 0 : i32
    %c0_i32_1 = arith.constant 0 : i32
    return %c0_i32, %c0_i32_0 : i32, i32
  }
  func.func @transform_2(%arg0: i32, %arg1: i32) -> (i32, i32) {
    %c1_i32 = arith.constant 1 : i32
    %0 = arith.muli %arg0, %c1_i32 : i32
    %1 = arith.addi %0, %arg1 : i32
    %c0_i32 = arith.constant 0 : i32
    %c0_i32_0 = arith.constant 0 : i32
    return %1, %c0_i32 : i32, i32
  }
  func.func @transform_3(%arg0: i32, %arg1: i32) -> (i32, i32, i32) {
    %c0_i32 = arith.constant 0 : i32
    %c0_i32_0 = arith.constant 0 : i32
    %c0_i32_1 = arith.constant 0 : i32
    return %arg0, %c0_i32, %c0_i32_0 : i32, i32, i32
  }
  func.func @transform_4(%arg0: i32, %arg1: i32) -> (i32, i32, i32) {
    %c0_i32 = arith.constant 0 : i32
    %c0_i32_0 = arith.constant 0 : i32
    %c0_i32_1 = arith.constant 0 : i32
    return %arg0, %c0_i32, %c0_i32_0 : i32, i32, i32
  }
}

module attributes {stable_mosaic.version = 11 : i64} {
  func.func @_matmul_stats_kernel(%arg0: i32, %arg1: i32, %arg2: memref<128x128xbf16, #tpu.memory_space<vmem>>, %arg3: memref<128x16xbf16, #tpu.memory_space<vmem>>, %arg4: memref<128x16xf32, #tpu.memory_space<vmem>>, %arg5: memref<1x1x16xf32, #tpu.memory_space<vmem>>, %arg6: memref<1x1x16xf32, #tpu.memory_space<vmem>>, %arg7: memref<1x16xf32, #tpu.memory_space<vmem>>, %arg8: memref<1x16xf32, #tpu.memory_space<vmem>>) attributes {dimension_semantics = [#tpu.dimension_semantics<parallel>, #tpu.dimension_semantics<arbitrary>], iteration_bounds = array<i64: 1, 1>, scalar_prefetch = 0 : i64, scratch_operands = 2 : i64, tpu.core_type = #tpu.core_type<tc>, window_params = [{transform_indices = @transform_0, window_bounds = array<i64: 128, 128>}, {pipeline_mode = #tpu.pipeline_mode<synchronous>, transform_indices = @transform_1, window_bounds = array<i64: 128, 16>}, {transform_indices = @transform_2, window_bounds = array<i64: 128, 16>}, {transform_indices = @transform_3, window_bounds = array<i64: 1, 1, 16>}, {transform_indices = @transform_4, window_bounds = array<i64: 1, 1, 16>}]} {
    %c0_i32 = arith.constant 0 : i32
    %0 = arith.cmpi eq, %arg1, %c0_i32 : i32
    %1 = arith.extui %0 : i1 to i32
    %c0_i32_0 = arith.constant 0 : i32
    %2 = arith.cmpi ne, %1, %c0_i32_0 : i32
    scf.if %2 {
      %cst_18 = arith.constant 0.000000e+00 : f32
      %21 = vector.broadcast %cst_18 : f32 to vector<1x16xf32>
      %c0_19 = arith.constant 0 : index
      %c0_20 = arith.constant 0 : index
      %22 = vector.load %arg7[%c0_19, %c0_20] : memref<1x16xf32, #tpu.memory_space<vmem>>, vector<1x16xf32>
      tpu.vector_store %arg7[%c0_19, %c0_20], %21 {strides = array<i32>} : memref<1x16xf32, #tpu.memory_space<vmem>>, vector<1x16xf32>,
      %cst_21 = arith.constant 0.000000e+00 : f32
      %23 = vector.broadcast %cst_21 : f32 to vector<1x16xf32>
      %c0_22 = arith.constant 0 : index
      %c0_23 = arith.constant 0 : index
      %24 = vector.load %arg8[%c0_22, %c0_23] : memref<1x16xf32, #tpu.memory_space<vmem>>, vector<1x16xf32>
      tpu.vector_store %arg8[%c0_22, %c0_23], %23 {strides = array<i32>} : memref<1x16xf32, #tpu.memory_space<vmem>>, vector<1x16xf32>,
    } else {
    }
    %c0 = arith.constant 0 : index
    %c0_1 = arith.constant 0 : index
    %3 = vector.load %arg2[%c0, %c0_1] : memref<128x128xbf16, #tpu.memory_space<vmem>>, vector<128x128xbf16>
    %c0_2 = arith.constant 0 : index
    %c0_3 = arith.constant 0 : index
    %4 = vector.load %arg3[%c0_2, %c0_3] : memref<128x16xbf16, #tpu.memory_space<vmem>>, vector<128x16xbf16>
    %cst = arith.constant dense<0.000000e+00> : vector<128x16xf32>
    %5 = tpu.matmul %3, %4, %cst {dimension_numbers = #tpu.dot_dimension_numbers<[1], [0], [0], [1], [0, 0, 1, 1], [], []>} : vector<128x128xbf16>, vector<128x16xbf16>, vector<128x16xf32> -> vector<128x16xf32>
    %c0_4 = arith.constant 0 : index
    %c0_5 = arith.constant 0 : index
    %6 = vector.load %arg4[%c0_4, %c0_5] : memref<128x16xf32, #tpu.memory_space<vmem>>, vector<128x16xf32>
    tpu.vector_store %arg4[%c0_4, %c0_5], %5 {strides = array<i32>} : memref<128x16xf32, #tpu.memory_space<vmem>>, vector<128x16xf32>,
    %c0_6 = arith.constant 0 : index
    %c0_7 = arith.constant 0 : index
    %7 = vector.load %arg7[%c0_6, %c0_7] : memref<1x16xf32, #tpu.memory_space<vmem>>, vector<1x16xf32>
    %cst_8 = arith.constant dense<0.000000e+00> : vector<16xf32>
    %8 = vector.multi_reduction <add>, %5, %cst_8 [0] : vector<128x16xf32> to vector<16xf32>
    %9 = vector.shape_cast %8 : vector<16xf32> to vector<1x16xf32>
    %10 = arith.addf %7, %9 : vector<1x16xf32>
    %c0_9 = arith.constant 0 : index
    %c0_10 = arith.constant 0 : index
    %11 = vector.load %arg7[%c0_9, %c0_10] : memref<1x16xf32, #tpu.memory_space<vmem>>, vector<1x16xf32>
    tpu.vector_store %arg7[%c0_9, %c0_10], %10 {strides = array<i32>} : memref<1x16xf32, #tpu.memory_space<vmem>>, vector<1x16xf32>,
    %c0_11 = arith.constant 0 : index
    %c0_12 = arith.constant 0 : index
    %12 = vector.load %arg8[%c0_11, %c0_12] : memref<1x16xf32, #tpu.memory_space<vmem>>, vector<1x16xf32>
    %13 = arith.mulf %5, %5 : vector<128x16xf32>
    %cst_13 = arith.constant dense<0.000000e+00> : vector<16xf32>
    %14 = vector.multi_reduction <add>, %13, %cst_13 [0] : vector<128x16xf32> to vector<16xf32>
    %15 = vector.shape_cast %14 : vector<16xf32> to vector<1x16xf32>
    %16 = arith.addf %12, %15 : vector<1x16xf32>
    %c0_14 = arith.constant 0 : index
    %c0_15 = arith.constant 0 : index
    %17 = vector.load %arg8[%c0_14, %c0_15] : memref<1x16xf32, #tpu.memory_space<vmem>>, vector<1x16xf32>
    tpu.vector_store %arg8[%c0_14, %c0_15], %16 {strides = array<i32>} : memref<1x16xf32, #tpu.memory_space<vmem>>, vector<1x16xf32>,
    %c0_i32_16 = arith.constant 0 : i32
    %18 = arith.cmpi eq, %arg1, %c0_i32_16 : i32
    %19 = arith.extui %18 : i1 to i32
    %c0_i32_17 = arith.constant 0 : i32
    %20 = arith.cmpi ne, %19, %c0_i32_17 : i32
    scf.if %20 {
      %c0_18 = arith.constant 0 : index
      %c0_19 = arith.constant 0 : index
      %21 = vector.load %arg7[%c0_18, %c0_19] : memref<1x16xf32, #tpu.memory_space<vmem>>, vector<1x16xf32>
      %22 = vector.shape_cast %21 : vector<1x16xf32> to vector<1x1x16xf32>
      %c0_20 = arith.constant 0 : index
      %c0_21 = arith.constant 0 : index
      %c0_22 = arith.constant 0 : index
      %23 = vector.load %arg5[%c0_20, %c0_21, %c0_22] : memref<1x1x16xf32, #tpu.memory_space<vmem>>, vector<1x1x16xf32>
      tpu.vector_store %arg5[%c0_20, %c0_21, %c0_22], %22 {strides = array<i32>} : memref<1x1x16xf32, #tpu.memory_space<vmem>>, vector<1x1x16xf32>,
      %c0_23 = arith.constant 0 : index
      %c0_24 = arith.constant 0 : index
      %24 = vector.load %arg8[%c0_23, %c0_24] : memref<1x16xf32, #tpu.memory_space<vmem>>, vector<1x16xf32>
      %25 = vector.shape_cast %24 : vector<1x16xf32> to vector<1x1x16xf32>
      %c0_25 = arith.constant 0 : index
      %c0_26 = arith.constant 0 : index
      %c0_27 = arith.constant 0 : index
      %26 = vector.load %arg6[%c0_25, %c0_26, %c0_27] : memref<1x1x16xf32, #tpu.memory_space<vmem>>, vector<1x1x16xf32>
      tpu.vector_store %arg6[%c0_25, %c0_26, %c0_27], %25 {strides = array<i32>} : memref<1x1x16xf32, #tpu.memory_space<vmem>>, vector<1x1x16xf32>,
    } else {
    }
    return
  }
  func.func @transform_0(%arg0: i32, %arg1: i32) -> (i32, i32) {
    %c1_i32 = arith.constant 1 : i32
    %0 = arith.muli %arg0, %c1_i32 : i32
    %1 = arith.addi %0, %arg1 : i32
    %c0_i32 = arith.constant 0 : i32
    %c0_i32_0 = arith.constant 0 : i32
    return %1, %c0_i32 : i32, i32
  }
  func.func @transform_1(%arg0: i32, %arg1: i32) -> (i32, i32) {
    %c0_i32 = arith.constant 0 : i32
    %c0_i32_0 = arith.constant 0 : i32
    %c0_i32_1 = arith.constant 0 : i32
    return %c0_i32, %c0_i32_0 : i32, i32
  }
  func.func @transform_2(%arg0: i32, %arg1: i32) -> (i32, i32) {
    %c1_i32 = arith.constant 1 : i32
    %0 = arith.muli %arg0, %c1_i32 : i32
    %1 = arith.addi %0, %arg1 : i32
    %c0_i32 = arith.constant 0 : i32
    %c0_i32_0 = arith.constant 0 : i32
    return %1, %c0_i32 : i32, i32
  }
  func.func @transform_3(%arg0: i32, %arg1: i32) -> (i32, i32, i32) {
    %c0_i32 = arith.constant 0 : i32
    %c0_i32_0 = arith.constant 0 : i32
    %c0_i32_1 = arith.constant 0 : i32
    return %arg0, %c0_i32, %c0_i32_0 : i32, i32, i32
  }
  func.func @transform_4(%arg0: i32, %arg1: i32) -> (i32, i32, i32) {
    %c0_i32 = arith.constant 0 : i32
    %c0_i32_0 = arith.constant 0 : i32
    %c0_i32_1 = arith.constant 0 : i32
    return %arg0, %c0_i32, %c0_i32_0 : i32, i32, i32
  }
}

module attributes {stable_mosaic.version = 11 : i64} {
  func.func @_matmul_stats_kernel(%arg0: i32, %arg1: i32, %arg2: memref<128x64xbf16, #tpu.memory_space<vmem>>, %arg3: memref<64x16xbf16, #tpu.memory_space<vmem>>, %arg4: memref<128x16xf32, #tpu.memory_space<vmem>>, %arg5: memref<1x1x16xf32, #tpu.memory_space<vmem>>, %arg6: memref<1x1x16xf32, #tpu.memory_space<vmem>>, %arg7: memref<1x16xf32, #tpu.memory_space<vmem>>, %arg8: memref<1x16xf32, #tpu.memory_space<vmem>>) attributes {dimension_semantics = [#tpu.dimension_semantics<parallel>, #tpu.dimension_semantics<arbitrary>], iteration_bounds = array<i64: 1, 1>, scalar_prefetch = 0 : i64, scratch_operands = 2 : i64, tpu.core_type = #tpu.core_type<tc>, window_params = [{transform_indices = @transform_0, window_bounds = array<i64: 128, 64>}, {pipeline_mode = #tpu.pipeline_mode<synchronous>, transform_indices = @transform_1, window_bounds = array<i64: 64, 16>}, {transform_indices = @transform_2, window_bounds = array<i64: 128, 16>}, {transform_indices = @transform_3, window_bounds = array<i64: 1, 1, 16>}, {transform_indices = @transform_4, window_bounds = array<i64: 1, 1, 16>}]} {
    %c0_i32 = arith.constant 0 : i32
    %0 = arith.cmpi eq, %arg1, %c0_i32 : i32
    %1 = arith.extui %0 : i1 to i32
    %c0_i32_0 = arith.constant 0 : i32
    %2 = arith.cmpi ne, %1, %c0_i32_0 : i32
    scf.if %2 {
      %cst_18 = arith.constant 0.000000e+00 : f32
      %21 = vector.broadcast %cst_18 : f32 to vector<1x16xf32>
      %c0_19 = arith.constant 0 : index
      %c0_20 = arith.constant 0 : index
      %22 = vector.load %arg7[%c0_19, %c0_20] : memref<1x16xf32, #tpu.memory_space<vmem>>, vector<1x16xf32>
      tpu.vector_store %arg7[%c0_19, %c0_20], %21 {strides = array<i32>} : memref<1x16xf32, #tpu.memory_space<vmem>>, vector<1x16xf32>,
      %cst_21 = arith.constant 0.000000e+00 : f32
      %23 = vector.broadcast %cst_21 : f32 to vector<1x16xf32>
      %c0_22 = arith.constant 0 : index
      %c0_23 = arith.constant 0 : index
      %24 = vector.load %arg8[%c0_22, %c0_23] : memref<1x16xf32, #tpu.memory_space<vmem>>, vector<1x16xf32>
      tpu.vector_store %arg8[%c0_22, %c0_23], %23 {strides = array<i32>} : memref<1x16xf32, #tpu.memory_space<vmem>>, vector<1x16xf32>,
    } else {
    }
    %c0 = arith.constant 0 : index
    %c0_1 = arith.constant 0 : index
    %3 = vector.load %arg2[%c0, %c0_1] : memref<128x64xbf16, #tpu.memory_space<vmem>>, vector<128x64xbf16>
    %c0_2 = arith.constant 0 : index
    %c0_3 = arith.constant 0 : index
    %4 = vector.load %arg3[%c0_2, %c0_3] : memref<64x16xbf16, #tpu.memory_space<vmem>>, vector<64x16xbf16>
    %cst = arith.constant dense<0.000000e+00> : vector<128x16xf32>
    %5 = tpu.matmul %3, %4, %cst {dimension_numbers = #tpu.dot_dimension_numbers<[1], [0], [0], [1], [0, 0, 1, 1], [], []>} : vector<128x64xbf16>, vector<64x16xbf16>, vector<128x16xf32> -> vector<128x16xf32>
    %c0_4 = arith.constant 0 : index
    %c0_5 = arith.constant 0 : index
    %6 = vector.load %arg4[%c0_4, %c0_5] : memref<128x16xf32, #tpu.memory_space<vmem>>, vector<128x16xf32>
    tpu.vector_store %arg4[%c0_4, %c0_5], %5 {strides = array<i32>} : memref<128x16xf32, #tpu.memory_space<vmem>>, vector<128x16xf32>,
    %c0_6 = arith.constant 0 : index
    %c0_7 = arith.constant 0 : index
    %7 = vector.load %arg7[%c0_6, %c0_7] : memref<1x16xf32, #tpu.memory_space<vmem>>, vector<1x16xf32>
    %cst_8 = arith.constant dense<0.000000e+00> : vector<16xf32>
    %8 = vector.multi_reduction <add>, %5, %cst_8 [0] : vector<128x16xf32> to vector<16xf32>
    %9 = vector.shape_cast %8 : vector<16xf32> to vector<1x16xf32>
    %10 = arith.addf %7, %9 : vector<1x16xf32>
    %c0_9 = arith.constant 0 : index
    %c0_10 = arith.constant 0 : index
    %11 = vector.load %arg7[%c0_9, %c0_10] : memref<1x16xf32, #tpu.memory_space<vmem>>, vector<1x16xf32>
    tpu.vector_store %arg7[%c0_9, %c0_10], %10 {strides = array<i32>} : memref<1x16xf32, #tpu.memory_space<vmem>>, vector<1x16xf32>,
    %c0_11 = arith.constant 0 : index
    %c0_12 = arith.constant 0 : index
    %12 = vector.load %arg8[%c0_11, %c0_12] : memref<1x16xf32, #tpu.memory_space<vmem>>, vector<1x16xf32>
    %13 = arith.mulf %5, %5 : vector<128x16xf32>
    %cst_13 = arith.constant dense<0.000000e+00> : vector<16xf32>
    %14 = vector.multi_reduction <add>, %13, %cst_13 [0] : vector<128x16xf32> to vector<16xf32>
    %15 = vector.shape_cast %14 : vector<16xf32> to vector<1x16xf32>
    %16 = arith.addf %12, %15 : vector<1x16xf32>
    %c0_14 = arith.constant 0 : index
    %c0_15 = arith.constant 0 : index
    %17 = vector.load %arg8[%c0_14, %c0_15] : memref<1x16xf32, #tpu.memory_space<vmem>>, vector<1x16xf32>
    tpu.vector_store %arg8[%c0_14, %c0_15], %16 {strides = array<i32>} : memref<1x16xf32, #tpu.memory_space<vmem>>, vector<1x16xf32>,
    %c0_i32_16 = arith.constant 0 : i32
    %18 = arith.cmpi eq, %arg1, %c0_i32_16 : i32
    %19 = arith.extui %18 : i1 to i32
    %c0_i32_17 = arith.constant 0 : i32
    %20 = arith.cmpi ne, %19, %c0_i32_17 : i32
    scf.if %20 {
      %c0_18 = arith.constant 0 : index
      %c0_19 = arith.constant 0 : index
      %21 = vector.load %arg7[%c0_18, %c0_19] : memref<1x16xf32, #tpu.memory_space<vmem>>, vector<1x16xf32>
      %22 = vector.shape_cast %21 : vector<1x16xf32> to vector<1x1x16xf32>
      %c0_20 = arith.constant 0 : index
      %c0_21 = arith.constant 0 : index
      %c0_22 = arith.constant 0 : index
      %23 = vector.load %arg5[%c0_20, %c0_21, %c0_22] : memref<1x1x16xf32, #tpu.memory_space<vmem>>, vector<1x1x16xf32>
      tpu.vector_store %arg5[%c0_20, %c0_21, %c0_22], %22 {strides = array<i32>} : memref<1x1x16xf32, #tpu.memory_space<vmem>>, vector<1x1x16xf32>,
      %c0_23 = arith.constant 0 : index
      %c0_24 = arith.constant 0 : index
      %24 = vector.load %arg8[%c0_23, %c0_24] : memref<1x16xf32, #tpu.memory_space<vmem>>, vector<1x16xf32>
      %25 = vector.shape_cast %24 : vector<1x16xf32> to vector<1x1x16xf32>
      %c0_25 = arith.constant 0 : index
      %c0_26 = arith.constant 0 : index
      %c0_27 = arith.constant 0 : index
      %26 = vector.load %arg6[%c0_25, %c0_26, %c0_27] : memref<1x1x16xf32, #tpu.memory_space<vmem>>, vector<1x1x16xf32>
      tpu.vector_store %arg6[%c0_25, %c0_26, %c0_27], %25 {strides = array<i32>} : memref<1x1x16xf32, #tpu.memory_space<vmem>>, vector<1x1x16xf32>,
    } else {
    }
    return
  }
  func.func @transform_0(%arg0: i32, %arg1: i32) -> (i32, i32) {
    %c1_i32 = arith.constant 1 : i32
    %0 = arith.muli %arg0, %c1_i32 : i32
    %1 = arith.addi %0, %arg1 : i32
    %c0_i32 = arith.constant 0 : i32
    %c0_i32_0 = arith.constant 0 : i32
    return %1, %c0_i32 : i32, i32
  }
  func.func @transform_1(%arg0: i32, %arg1: i32) -> (i32, i32) {
    %c0_i32 = arith.constant 0 : i32
    %c0_i32_0 = arith.constant 0 : i32
    %c0_i32_1 = arith.constant 0 : i32
    return %c0_i32, %c0_i32_0 : i32, i32
  }
  func.func @transform_2(%arg0: i32, %arg1: i32) -> (i32, i32) {
    %c1_i32 = arith.constant 1 : i32
    %0 = arith.muli %arg0, %c1_i32 : i32
    %1 = arith.addi %0, %arg1 : i32
    %c0_i32 = arith.constant 0 : i32
    %c0_i32_0 = arith.constant 0 : i32
    return %1, %c0_i32 : i32, i32
  }
  func.func @transform_3(%arg0: i32, %arg1: i32) -> (i32, i32, i32) {
    %c0_i32 = arith.constant 0 : i32
    %c0_i32_0 = arith.constant 0 : i32
    %c0_i32_1 = arith.constant 0 : i32
    return %arg0, %c0_i32, %c0_i32_0 : i32, i32, i32
  }
  func.func @transform_4(%arg0: i32, %arg1: i32) -> (i32, i32, i32) {
    %c0_i32 = arith.constant 0 : i32
    %c0_i32_0 = arith.constant 0 : i32
    %c0_i32_1 = arith.constant 0 : i32
    return %arg0, %c0_i32, %c0_i32_0 : i32, i32, i32
  }
}

module attributes {stable_mosaic.version = 11 : i64} {
  func.func @_matmul_stats_kernel(%arg0: i32, %arg1: i32, %arg2: memref<128x32xbf16, #tpu.memory_space<vmem>>, %arg3: memref<32x16xbf16, #tpu.memory_space<vmem>>, %arg4: memref<128x16xf32, #tpu.memory_space<vmem>>, %arg5: memref<1x1x16xf32, #tpu.memory_space<vmem>>, %arg6: memref<1x1x16xf32, #tpu.memory_space<vmem>>, %arg7: memref<1x16xf32, #tpu.memory_space<vmem>>, %arg8: memref<1x16xf32, #tpu.memory_space<vmem>>) attributes {dimension_semantics = [#tpu.dimension_semantics<parallel>, #tpu.dimension_semantics<arbitrary>], iteration_bounds = array<i64: 1, 1>, scalar_prefetch = 0 : i64, scratch_operands = 2 : i64, tpu.core_type = #tpu.core_type<tc>, window_params = [{transform_indices = @transform_0, window_bounds = array<i64: 128, 32>}, {pipeline_mode = #tpu.pipeline_mode<synchronous>, transform_indices = @transform_1, window_bounds = array<i64: 32, 16>}, {transform_indices = @transform_2, window_bounds = array<i64: 128, 16>}, {transform_indices = @transform_3, window_bounds = array<i64: 1, 1, 16>}, {transform_indices = @transform_4, window_bounds = array<i64: 1, 1, 16>}]} {
    %c0_i32 = arith.constant 0 : i32
    %0 = arith.cmpi eq, %arg1, %c0_i32 : i32
    %1 = arith.extui %0 : i1 to i32
    %c0_i32_0 = arith.constant 0 : i32
    %2 = arith.cmpi ne, %1, %c0_i32_0 : i32
    scf.if %2 {
      %cst_18 = arith.constant 0.000000e+00 : f32
      %21 = vector.broadcast %cst_18 : f32 to vector<1x16xf32>
      %c0_19 = arith.constant 0 : index
      %c0_20 = arith.constant 0 : index
      %22 = vector.load %arg7[%c0_19, %c0_20] : memref<1x16xf32, #tpu.memory_space<vmem>>, vector<1x16xf32>
      tpu.vector_store %arg7[%c0_19, %c0_20], %21 {strides = array<i32>} : memref<1x16xf32, #tpu.memory_space<vmem>>, vector<1x16xf32>,
      %cst_21 = arith.constant 0.000000e+00 : f32
      %23 = vector.broadcast %cst_21 : f32 to vector<1x16xf32>
      %c0_22 = arith.constant 0 : index
      %c0_23 = arith.constant 0 : index
      %24 = vector.load %arg8[%c0_22, %c0_23] : memref<1x16xf32, #tpu.memory_space<vmem>>, vector<1x16xf32>
      tpu.vector_store %arg8[%c0_22, %c0_23], %23 {strides = array<i32>} : memref<1x16xf32, #tpu.memory_space<vmem>>, vector<1x16xf32>,
    } else {
    }
    %c0 = arith.constant 0 : index
    %c0_1 = arith.constant 0 : index
    %3 = vector.load %arg2[%c0, %c0_1] : memref<128x32xbf16, #tpu.memory_space<vmem>>, vector<128x32xbf16>
    %c0_2 = arith.constant 0 : index
    %c0_3 = arith.constant 0 : index
    %4 = vector.load %arg3[%c0_2, %c0_3] : memref<32x16xbf16, #tpu.memory_space<vmem>>, vector<32x16xbf16>
    %cst = arith.constant dense<0.000000e+00> : vector<128x16xf32>
    %5 = tpu.matmul %3, %4, %cst {dimension_numbers = #tpu.dot_dimension_numbers<[1], [0], [0], [1], [0, 0, 1, 1], [], []>} : vector<128x32xbf16>, vector<32x16xbf16>, vector<128x16xf32> -> vector<128x16xf32>
    %c0_4 = arith.constant 0 : index
    %c0_5 = arith.constant 0 : index
    %6 = vector.load %arg4[%c0_4, %c0_5] : memref<128x16xf32, #tpu.memory_space<vmem>>, vector<128x16xf32>
    tpu.vector_store %arg4[%c0_4, %c0_5], %5 {strides = array<i32>} : memref<128x16xf32, #tpu.memory_space<vmem>>, vector<128x16xf32>,
    %c0_6 = arith.constant 0 : index
    %c0_7 = arith.constant 0 : index
    %7 = vector.load %arg7[%c0_6, %c0_7] : memref<1x16xf32, #tpu.memory_space<vmem>>, vector<1x16xf32>
    %cst_8 = arith.constant dense<0.000000e+00> : vector<16xf32>
    %8 = vector.multi_reduction <add>, %5, %cst_8 [0] : vector<128x16xf32> to vector<16xf32>
    %9 = vector.shape_cast %8 : vector<16xf32> to vector<1x16xf32>
    %10 = arith.addf %7, %9 : vector<1x16xf32>
    %c0_9 = arith.constant 0 : index
    %c0_10 = arith.constant 0 : index
    %11 = vector.load %arg7[%c0_9, %c0_10] : memref<1x16xf32, #tpu.memory_space<vmem>>, vector<1x16xf32>
    tpu.vector_store %arg7[%c0_9, %c0_10], %10 {strides = array<i32>} : memref<1x16xf32, #tpu.memory_space<vmem>>, vector<1x16xf32>,
    %c0_11 = arith.constant 0 : index
    %c0_12 = arith.constant 0 : index
    %12 = vector.load %arg8[%c0_11, %c0_12] : memref<1x16xf32, #tpu.memory_space<vmem>>, vector<1x16xf32>
    %13 = arith.mulf %5, %5 : vector<128x16xf32>
    %cst_13 = arith.constant dense<0.000000e+00> : vector<16xf32>
    %14 = vector.multi_reduction <add>, %13, %cst_13 [0] : vector<128x16xf32> to vector<16xf32>
    %15 = vector.shape_cast %14 : vector<16xf32> to vector<1x16xf32>
    %16 = arith.addf %12, %15 : vector<1x16xf32>
    %c0_14 = arith.constant 0 : index
    %c0_15 = arith.constant 0 : index
    %17 = vector.load %arg8[%c0_14, %c0_15] : memref<1x16xf32, #tpu.memory_space<vmem>>, vector<1x16xf32>
    tpu.vector_store %arg8[%c0_14, %c0_15], %16 {strides = array<i32>} : memref<1x16xf32, #tpu.memory_space<vmem>>, vector<1x16xf32>,
    %c0_i32_16 = arith.constant 0 : i32
    %18 = arith.cmpi eq, %arg1, %c0_i32_16 : i32
    %19 = arith.extui %18 : i1 to i32
    %c0_i32_17 = arith.constant 0 : i32
    %20 = arith.cmpi ne, %19, %c0_i32_17 : i32
    scf.if %20 {
      %c0_18 = arith.constant 0 : index
      %c0_19 = arith.constant 0 : index
      %21 = vector.load %arg7[%c0_18, %c0_19] : memref<1x16xf32, #tpu.memory_space<vmem>>, vector<1x16xf32>
      %22 = vector.shape_cast %21 : vector<1x16xf32> to vector<1x1x16xf32>
      %c0_20 = arith.constant 0 : index
      %c0_21 = arith.constant 0 : index
      %c0_22 = arith.constant 0 : index
      %23 = vector.load %arg5[%c0_20, %c0_21, %c0_22] : memref<1x1x16xf32, #tpu.memory_space<vmem>>, vector<1x1x16xf32>
      tpu.vector_store %arg5[%c0_20, %c0_21, %c0_22], %22 {strides = array<i32>} : memref<1x1x16xf32, #tpu.memory_space<vmem>>, vector<1x1x16xf32>,
      %c0_23 = arith.constant 0 : index
      %c0_24 = arith.constant 0 : index
      %24 = vector.load %arg8[%c0_23, %c0_24] : memref<1x16xf32, #tpu.memory_space<vmem>>, vector<1x16xf32>
      %25 = vector.shape_cast %24 : vector<1x16xf32> to vector<1x1x16xf32>
      %c0_25 = arith.constant 0 : index
      %c0_26 = arith.constant 0 : index
      %c0_27 = arith.constant 0 : index
      %26 = vector.load %arg6[%c0_25, %c0_26, %c0_27] : memref<1x1x16xf32, #tpu.memory_space<vmem>>, vector<1x1x16xf32>
      tpu.vector_store %arg6[%c0_25, %c0_26, %c0_27], %25 {strides = array<i32>} : memref<1x1x16xf32, #tpu.memory_space<vmem>>, vector<1x1x16xf32>,
    } else {
    }
    return
  }
  func.func @transform_0(%arg0: i32, %arg1: i32) -> (i32, i32) {
    %c1_i32 = arith.constant 1 : i32
    %0 = arith.muli %arg0, %c1_i32 : i32
    %1 = arith.addi %0, %arg1 : i32
    %c0_i32 = arith.constant 0 : i32
    %c0_i32_0 = arith.constant 0 : i32
    return %1, %c0_i32 : i32, i32
  }
  func.func @transform_1(%arg0: i32, %arg1: i32) -> (i32, i32) {
    %c0_i32 = arith.constant 0 : i32
    %c0_i32_0 = arith.constant 0 : i32
    %c0_i32_1 = arith.constant 0 : i32
    return %c0_i32, %c0_i32_0 : i32, i32
  }
  func.func @transform_2(%arg0: i32, %arg1: i32) -> (i32, i32) {
    %c1_i32 = arith.constant 1 : i32
    %0 = arith.muli %arg0, %c1_i32 : i32
    %1 = arith.addi %0, %arg1 : i32
    %c0_i32 = arith.constant 0 : i32
    %c0_i32_0 = arith.constant 0 : i32
    return %1, %c0_i32 : i32, i32
  }
  func.func @transform_3(%arg0: i32, %arg1: i32) -> (i32, i32, i32) {
    %c0_i32 = arith.constant 0 : i32
    %c0_i32_0 = arith.constant 0 : i32
    %c0_i32_1 = arith.constant 0 : i32
    return %arg0, %c0_i32, %c0_i32_0 : i32, i32, i32
  }
  func.func @transform_4(%arg0: i32, %arg1: i32) -> (i32, i32, i32) {
    %c0_i32 = arith.constant 0 : i32
    %c0_i32_0 = arith.constant 0 : i32
    %c0_i32_1 = arith.constant 0 : i32
    return %arg0, %c0_i32, %c0_i32_0 : i32, i32, i32
  }
}

module attributes {stable_mosaic.version = 11 : i64} {
  func.func @_final_conv_kernel(%arg0: i32, %arg1: memref<128x784xbf16, #tpu.memory_space<vmem>>, %arg2: memref<784x128xbf16, #tpu.memory_space<vmem>>, %arg3: memref<1x128xf32, #tpu.memory_space<vmem>>, %arg4: memref<128x128xf32, #tpu.memory_space<vmem>>) attributes {dimension_semantics = [#tpu.dimension_semantics<parallel>], iteration_bounds = array<i64: 4>, scalar_prefetch = 0 : i64, scratch_operands = 0 : i64, tpu.core_type = #tpu.core_type<tc>, window_params = [{transform_indices = @transform_0, window_bounds = array<i64: 128, 784>}, {pipeline_mode = #tpu.pipeline_mode<synchronous>, transform_indices = @transform_1, window_bounds = array<i64: 784, 128>}, {pipeline_mode = #tpu.pipeline_mode<synchronous>, transform_indices = @transform_2, window_bounds = array<i64: 1, 128>}, {transform_indices = @transform_3, window_bounds = array<i64: 128, 128>}]} {
    %c0 = arith.constant 0 : index
    %c0_0 = arith.constant 0 : index
    %0 = vector.load %arg1[%c0, %c0_0] : memref<128x784xbf16, #tpu.memory_space<vmem>>, vector<128x784xbf16>
    %c0_1 = arith.constant 0 : index
    %c0_2 = arith.constant 0 : index
    %1 = vector.load %arg2[%c0_1, %c0_2] : memref<784x128xbf16, #tpu.memory_space<vmem>>, vector<784x128xbf16>
    %cst = arith.constant dense<0.000000e+00> : vector<128x128xf32>
    %2 = tpu.matmul %0, %1, %cst {dimension_numbers = #tpu.dot_dimension_numbers<[1], [0], [0], [1], [0, 0, 1, 1], [], []>} : vector<128x784xbf16>, vector<784x128xbf16>, vector<128x128xf32> -> vector<128x128xf32>
    %c0_3 = arith.constant 0 : index
    %c0_4 = arith.constant 0 : index
    %3 = vector.load %arg3[%c0_3, %c0_4] : memref<1x128xf32, #tpu.memory_space<vmem>>, vector<1x128xf32>
    %4 = vector.broadcast %3 : vector<1x128xf32> to vector<128x128xf32>
    %5 = arith.addf %2, %4 : vector<128x128xf32>
    %6 = math.tanh %5 : vector<128x128xf32>
    %cst_5 = arith.constant 5.000000e-01 : f32
    %7 = vector.broadcast %cst_5 : f32 to vector<128x128xf32>
    %8 = arith.mulf %6, %7 : vector<128x128xf32>
    %cst_6 = arith.constant 5.000000e-01 : f32
    %9 = vector.broadcast %cst_6 : f32 to vector<128x128xf32>
    %10 = arith.addf %8, %9 : vector<128x128xf32>
    %c0_7 = arith.constant 0 : index
    %c0_8 = arith.constant 0 : index
    %11 = vector.load %arg4[%c0_7, %c0_8] : memref<128x128xf32, #tpu.memory_space<vmem>>, vector<128x128xf32>
    tpu.vector_store %arg4[%c0_7, %c0_8], %10 {strides = array<i32>} : memref<128x128xf32, #tpu.memory_space<vmem>>, vector<128x128xf32>,
    return
  }
  func.func @transform_0(%arg0: i32) -> (i32, i32) {
    %c0_i32 = arith.constant 0 : i32
    %c0_i32_0 = arith.constant 0 : i32
    return %arg0, %c0_i32 : i32, i32
  }
  func.func @transform_1(%arg0: i32) -> (i32, i32) {
    %c0_i32 = arith.constant 0 : i32
    %c0_i32_0 = arith.constant 0 : i32
    %c0_i32_1 = arith.constant 0 : i32
    return %c0_i32, %c0_i32_0 : i32, i32
  }
  func.func @transform_2(%arg0: i32) -> (i32, i32) {
    %c0_i32 = arith.constant 0 : i32
    %c0_i32_0 = arith.constant 0 : i32
    %c0_i32_1 = arith.constant 0 : i32
    return %c0_i32, %c0_i32_0 : i32, i32
  }
  func.func @transform_3(%arg0: i32) -> (i32, i32) {
    %c0_i32 = arith.constant 0 : i32
    %c0_i32_0 = arith.constant 0 : i32
    return %arg0, %c0_i32 : i32, i32
  }
}

</mosaic_0001>

<bundles_post_ra>
// kernel: resnet_generator_pallas.26
= control target key start
LH: loop header
LB: loop body
LE: loop exit
PB: predicated region body
PF: predicated region fallthrough
CT: control target
= control target key end

     0   :  { %s470_s12 = smov 0   ;;  %s585_s0 = inlined_call_operand.vmem [shape: f32[512,16], index: 0, kind: input, shape index: {}]   ;;  %s586_s1 = inlined_call_operand.vmem [shape: f32[1,16], index: 1, kind: input, shape index: {}]   ;;  %s587_s2 = inlined_call_operand.vmem [shape: f32[1,16], index: 2, kind: input, shape index: {}]   ;;  %s588_s3 = inlined_call_operand.vmem [shape: bf16[512,16], index: 3, kind: output, shape index: {}]  }
   0x1 LB: > { %s389_s13 = sadd.s32 4294967295, %s448_s12   ;;  %p393_p0 = scmp.ge.s32.totalorder %s448_s12, 1  ;;  %s448_s12 = sphi %s470_s12, %s13_s12  }
   0x2   : > { %p138_p1 = scmp.lt.s32.totalorder %s448_s12, 5 }
   0x4   : > { %p139_p2 = pnand %p393_p0, %p138_p1 }
   0x5   : > { %s394_s14 = sshll.u32 (!%p139_p2), %s389_s13, 4  ;;  %v484_v0 = vld [vmem:[%s586_s1] ss:$0 sm:$0xff] (!%p139_p2)  ;;  %vm316_vm0 = vcmask (!%p139_p2), 125952  }
   0x6   : > { %142 = sbr.rel (%p139_p2) target bundleno = 38 (0x26), region = 32  ;;  %p163_p3 = scmp.lt.s32.totalorder (!%p139_p2), %s394_s14, 63  ;;  %v494_v1 = vld [vmem:[%s587_s2] ss:$0 sm:$0xff] (!%p139_p2) }
   0xd   : > { %s590_s14 = smov (!%p163_p3, %s394_s14), 63 }
   0xe   : > { %s395_s15 = sshll.u32 %s590_s14, 3  ;;  %s397_s23 = sshll.u32 %s590_s14, 2 }
   0xf   : > { %s489_s20 = scalar_lea.vmem %s585_s0, %s395_s15  ;;  %s523_s26 = scalar_lea.vmem %s588_s3, %s397_s23 }
  0x10   : > { %v174_v2 = vld [vmem:[%s489_s20] sm:$0xff]  ;;  %v175_v3 = vld [vmem:[%s489_s20 + $0x8] sm:$0xff]  ;;  %v176_v4 = vld [vmem:[%s489_s20 + $0x10] sm:$0xff] }
  0x11   : > { %v197_v5 = vmul.f32 %v484_v0, %v174_v2  ;;  %v198_v6 = vmul.f32 %v484_v0, %v175_v3  ;;  %v199_v7 = vmul.f32 %v484_v0, %v176_v4  ;;  %v177_v8 = vld [vmem:[%s489_s20 + $0x18] sm:$0xff]  ;;  %v178_v9 = vld [vmem:[%s489_s20 + $0x20] sm:$0xff]  ;;  %v179_v10 = vld [vmem:[%s489_s20 + $0x28] sm:$0xff] }
  0x12   : > { %v200_v11 = vmul.f32 %v484_v0, %v177_v8  ;;  %v201_v12 = vmul.f32 %v484_v0, %v178_v9  ;;  %v202_v13 = vmul.f32 %v484_v0, %v179_v10  ;;  %v180_v14 = vld [vmem:[%s489_s20 + $0x30] sm:$0xff]  ;;  %v181_v15 = vld [vmem:[%s489_s20 + $0x38] sm:$0xff]  ;;  %v182_v32 = vld [vmem:[%s489_s20 + $0x40] sm:$0xff] }
  0x13   : > { %v220_v16 = vadd.f32 %v494_v1, %v197_v5  ;;  %v221_v17 = vadd.f32 %v494_v1, %v198_v6  ;;  %v222_v18 = vadd.f32 %v494_v1, %v199_v7  ;;  %v203_v19 = vmul.f32 %v484_v0, %v180_v14  ;;  %v183_v33 = vld [vmem:[%s489_s20 + $0x48] sm:$0xff]  ;;  %v184_v34 = vld [vmem:[%s489_s20 + $0x50] sm:$0xff]  ;;  %v185_v39 = vld [vmem:[%s489_s20 + $0x58] sm:$0xff] }
  0x14   : > { %v223_v20 = vadd.f32 %v494_v1, %v200_v11  ;;  %v224_v21 = vadd.f32 %v494_v1, %v201_v12  ;;  %v225_v22 = vadd.f32 %v494_v1, %v202_v13  ;;  %v204_v23 = vmul.f32 %v484_v0, %v181_v15  ;;  %v186_v40 = vld [vmem:[%s489_s20 + $0x60] sm:$0xff]  ;;  %v187_v41 = vld [vmem:[%s489_s20 + $0x68] sm:$0xff]  ;;  %v188_v46 = vld [vmem:[%s489_s20 + $0x70] sm:$0xff] }
  0x15   : > { %v236_v24 = vmax.f32 %v220_v16, 0.0  ;;  %v237_v25 = vmax.f32 %v221_v17, 0.0  ;;  %v238_v26 = vmax.f32 %v222_v18, 0.0  ;;  %v226_v27 = vadd.f32 %v494_v1, %v203_v19  ;;  %v189_v51 = vld [vmem:[%s489_s20 + $0x78] sm:$0xff] }
  0x16   : > { %v239_v28 = vmax.f32 %v223_v20, 0.0  ;;  %v240_v29 = vmax.f32 %v224_v21, 0.0  ;;  %v241_v30 = vmax.f32 %v225_v22, 0.0  ;;  %v227_v31 = vadd.f32 %v494_v1, %v204_v23 }
  0x17   : > { %v418_v35 = vpack.c.bf16 %v236_v24, %v236_v24  ;;  %v419_v36 = vpack.c.bf16 %v237_v25, %v237_v25  ;;  %v420_v37 = vpack.c.bf16 %v238_v26, %v238_v26  ;;  %v242_v38 = vmax.f32 %v226_v27, 0.0 }
  0x18   : > { %v421_v42 = vpack.c.bf16 %v239_v28, %v239_v28  ;;  %v422_v43 = vpack.c.bf16 %v240_v29, %v240_v29  ;;  %v423_v44 = vpack.c.bf16 %v241_v30, %v241_v30  ;;  %v243_v45 = vmax.f32 %v227_v31, 0.0 }
  0x19   : > { %317 = vst.msk [vmem:[%s523_s26] sm:$0xf] %vm316_vm0, %v418_v35  ;;  %318 = vst.msk [vmem:[%s523_s26 + $0x4] sm:$0xf] %vm316_vm0, %v419_v36  ;;  %v424_v47 = vpack.c.bf16 %v242_v38, %v242_v38  ;;  %v205_v48 = vmul.f32 %v484_v0, %v182_v32  ;;  %v206_v49 = vmul.f32 %v484_v0, %v183_v33 }
  0x1a   : > { %319 = vst.msk [vmem:[%s523_s26 + $0x8] sm:$0xf] %vm316_vm0, %v420_v37  ;;  %v207_v50 = vmul.f32 %v484_v0, %v184_v34  ;;  %320 = vst.msk [vmem:[%s523_s26 + $0xc] sm:$0xf] %vm316_vm0, %v421_v42  ;;  %v425_v52 = vpack.c.bf16 %v243_v45, %v243_v45  ;;  %v208_v53 = vmul.f32 %v484_v0, %v185_v39 }
  0x1b   : > { %321 = vst.msk [vmem:[%s523_s26 + $0x10] sm:$0xf] %vm316_vm0, %v422_v43  ;;  %322 = vst.msk [vmem:[%s523_s26 + $0x14] sm:$0xf] %vm316_vm0, %v423_v44  ;;  %v209_v54 = vmul.f32 %v484_v0, %v186_v40  ;;  %v210_v55 = vmul.f32 %v484_v0, %v187_v41  ;;  %v228_v56 = vadd.f32 %v494_v1, %v205_v48 }
  0x1c   : > { %323 = vst.msk [vmem:[%s523_s26 + $0x18] sm:$0xf] %vm316_vm0, %v424_v47  ;;  %v229_v57 = vadd.f32 %v494_v1, %v206_v49  ;;  %v230_v58 = vadd.f32 %v494_v1, %v207_v50  ;;  %v211_v59 = vmul.f32 %v484_v0, %v188_v46  ;;  %324 = vst.msk [vmem:[%s523_s26 + $0x1c] sm:$0xf] %vm316_vm0, %v425_v52 }
  0x1d   : > { %v231_v60 = vadd.f32 %v494_v1, %v208_v53  ;;  %v232_v61 = vadd.f32 %v494_v1, %v209_v54  ;;  %v233_v62 = vadd.f32 %v494_v1, %v210_v55  ;;  %v212_v63 = vmul.f32 %v484_v0, %v189_v51 }
  0x1e   : > { %v244_v2 = vmax.f32 %v228_v56, 0.0  ;;  %v245_v3 = vmax.f32 %v229_v57, 0.0  ;;  %v246_v4 = vmax.f32 %v230_v58, 0.0  ;;  %v234_v5 = vadd.f32 %v494_v1, %v211_v59 }
  0x1f   : > { %v247_v6 = vmax.f32 %v231_v60, 0.0  ;;  %v248_v7 = vmax.f32 %v232_v61, 0.0  ;;  %v249_v8 = vmax.f32 %v233_v62, 0.0  ;;  %v235_v9 = vadd.f32 %v494_v1, %v212_v63 }
  0x20   : > { %v426_v10 = vpack.c.bf16 %v244_v2, %v244_v2  ;;  %v427_v11 = vpack.c.bf16 %v245_v3, %v245_v3  ;;  %v428_v0 = vpack.c.bf16 %v246_v4, %v246_v4  ;;  %v250_v12 = vmax.f32 %v234_v5, 0.0 }
  0x21   : > { %v429_v13 = vpack.c.bf16 %v247_v6, %v247_v6  ;;  %v430_v14 = vpack.c.bf16 %v248_v7, %v248_v7  ;;  %v431_v15 = vpack.c.bf16 %v249_v8, %v249_v8  ;;  %v251_v16 = vmax.f32 %v235_v9, 0.0 }
  0x22   : > { %325 = vst.msk [vmem:[%s523_s26 + $0x20] sm:$0xf] %vm316_vm0, %v426_v10  ;;  %326 = vst.msk [vmem:[%s523_s26 + $0x24] sm:$0xf] %vm316_vm0, %v427_v11  ;;  %v432_v17 = vpack.c.bf16 %v250_v12, %v250_v12 }
  0x23   : > { %327 = vst.msk [vmem:[%s523_s26 + $0x28] sm:$0xf] %vm316_vm0, %v428_v0  ;;  %328 = vst.msk [vmem:[%s523_s26 + $0x2c] sm:$0xf] %vm316_vm0, %v429_v13  ;;  %v433_v1 = vpack.c.bf16 %v251_v16, %v251_v16 }
  0x24   : > { %329 = vst.msk [vmem:[%s523_s26 + $0x30] sm:$0xf] %vm316_vm0, %v430_v14  ;;  %330 = vst.msk [vmem:[%s523_s26 + $0x34] sm:$0xf] %vm316_vm0, %v431_v15 }
  0x25   : > { %331 = vst.msk [vmem:[%s523_s26 + $0x38] sm:$0xf] %vm316_vm0, %v432_v17  ;;  %332 = vst.msk [vmem:[%s523_s26 + $0x3c] sm:$0xf] %vm316_vm0, %v433_v1 }
  0x26 PF: > { %s13_s12 = sadd.s32 1, %s448_s12  }
  0x27   : > { %p10_p4 = scmp.ge.s32.totalorder %s13_s12, 6  }
  0x29   :  { %12 = sbr.rel (!%p10_p4) target bundleno = 1 (0x1), region = 62 }

// kernel: resnet_generator_pallas.25
= control target key start
LH: loop header
LB: loop body
LE: loop exit
PB: predicated region body
PF: predicated region fallthrough
CT: control target
= control target key end

     0   :  { %s1024_s15 = smov 0   ;;  %s1026_s16 = smov 0   ;;  %s1252_s0 = inlined_call_operand.vmem [shape: bf16[512,147], index: 0, kind: input, shape index: {}]   ;;  %s1253_s1 = inlined_call_operand.vmem [shape: bf16[147,16], index: 1, kind: input, shape index: {}]   ;;  %s1254_s2 = inlined_call_operand.vmem [shape: f32[512,16], index: 2, kind: output, shape index: {0}]   ;;  %s1255_s3 = inlined_call_operand.vmem [shape: f32[2,1,16], index: 3, kind: output, shape index: {1}]   ;;  %s1256_s4 = inlined_call_operand.vmem [shape: f32[2,1,16], index: 4, kind: output, shape index: {2}]  }
   0x1   :  { %s1028_s17 = smov 0   ;;  %s1030_s18 = smov 0  }
   0x2   :  { %s1032_s19 = smov 0  }
   0x3 LB: > { %s24_s20 = sadd.s32 1, %s986_s17  ;;  %s27_s21 = sadd.s32 1, %s990_s18  ;;  %s994_s19 = sphi %s1032_s19, %s15_s19   ;;  %s990_s18 = sphi %s1030_s18, %s1260_s18   ;;  %s986_s17 = sphi %s1028_s17, %s1259_s17   ;;  %s982_s16 = sphi %s1026_s16, %s1258_s16   ;;  %s978_s15 = sphi %s1024_s15, %s1257_s15  }
   0x4   : > { %p25_p0 = scmp.ge.s32.totalorder %s24_s20, 2  ;;  %p812_p1 = scmp.ge.s32.totalorder %s994_s19, 1 }
   0x5   : > { %p193_p2 = scmp.lt.s32.totalorder %s994_s19, 5 }
   0x6   : > { %s1262_s20 = smov (%p25_p0, %s24_s20), 0  ;;  %s1264_s21 = smov (!%p25_p0, %s27_s21), %s990_s18 }
   0x7   : > { %p194_p3 = pnand %p812_p1, %p193_p2  ;;  %p29_p4 = scmp.ge.s32.totalorder %s1264_s21, 2 }
   0x8   : > { %s813_s22 = sshll.u32 (!%p194_p3), %s982_s16, 1  ;;  %p251_p5 = scmp.lt.s32.totalorder (!%p194_p3), %s982_s16, 1 }
   0x9   : > { %s1266_s21 = smov (%p29_p4, %s1264_s21), 0  ;;  %197 = sbr.rel (%p194_p3) target bundleno = 348 (0x15c), region = 28 }
   0xa   : > { %s231_s23 = sadd.s32 (!%p194_p3), %s978_s15, %s813_s22  ;;  %p820_p7 = scmp.ne.s32.totalorder (!%p194_p3), %s978_s15, 0 }
   0xb   : > { %s814_s24 = sshll.u32 (!%p194_p3), %s231_s23, 4 }
   0xc   : > { %p233_p6 = scmp.lt.s32.totalorder (!%p194_p3), %s814_s24, 63 }
  0x10   : > { %s1268_s16 = smov (!%p251_p5, %s982_s16), 1  ;;  %s1270_s24 = smov (!%p233_p6, %s814_s24), 63 }
  0x11   : > { %s253_s27 = scalar_lea.vmem %s1255_s3, %s1268_s16  ;;  %s256_s30 = scalar_lea.vmem %s1256_s4, %s1268_s16  ;;  %vm262_vm0 = vcmask (!%p820_p7), 122880   ;;  %v996_v0 = vmov (!%p820_p7), 0.0  }
  0x12   : > { %s858_s5 = sshll.u32 %s1270_s24, 3  ;;  %261 = sbr.rel (%p820_p7) target bundleno = 25 (0x19), region = 32  ;;  %263 = vst.msk [vmem:[#allocation2] sm:$0x1] (!%p820_p7), %vm262_vm0, %v996_v0  ;;  %264 = vst.msk [vmem:[#allocation3] sm:$0x1] (!%p820_p7), %vm262_vm0, %v996_v0 }
  0x13   : > { %s1070_s8 = scalar_lea.vmem %s1252_s0, %s858_s5  ;;  %s1075_s11 = scalar_lea.vmem %s1254_s2, %s858_s5 }
  0x19 PF: > { %v922_v1 = vld [vmem:[%s1253_s1] sm:$0xff]   ;;  %v997_v2 = vmov 0   ;;  %v923_v3 = vld [vmem:[%s1253_s1 + $0x8] sm:$0xff]   ;;  %v924_v4 = vld [vmem:[%s1253_s1 + $0x10] sm:$0xff]   ;;  %vm429_vm1 = vcmask 154624   ;;  %vm454_vm2 = vcmask 1040384  }
  0x1a   : > { %461 = vmatprep.subr.bf16.mxu0 %v997_v2  ;;  %859 = vmatprep.subr.bf16.mxu1 %v997_v2  ;;  %v925_v5 = vld [vmem:[%s1253_s1 + $0x18] sm:$0xff]   ;;  %v934_v6 = vld [vmem:[%s1070_s8 + $0x4] ss:$8 sps:$4 sm:$0xff]   ;;  %v928_v10 = vld [vmem:[%s1253_s1 + $0x30] sm:$0xff]   ;;  %vm455_vm3 = vcmask 1041408   ;;  %v998_v12 = vmov 65535  }
  0x1b   : > { %462 = vmatpush1.bf16.msra.mxu0 %v922_v1  ;;  %869 = vmatpush1.bf16.msra.mxu1 %v922_v1  ;;  %v940_v7 = vld [vmem:[%s1070_s8 + $0x44] ss:$8 sps:$4 sm:$0xff]   ;;  %v929_v11 = vld [vmem:[%s1253_s1 + $0x38] sm:$0xff]   ;;  %v456_v13 = vsel %vm454_vm2, 4294967295, %v998_v12  ;;  %v932_v18 = vld [vmem:[%s1070_s8] ss:$8 sps:$4 sm:$0xff]  }
  0x1c   : > { %463 = vmatprep.subr.bf16.mxu0 %v997_v2  ;;  %860 = vmatprep.subr.bf16.mxu1 %v997_v2  ;;  %v926_v8 = vld [vmem:[%s1253_s1 + $0x20] sm:$0xff]   ;;  %v927_v9 = vld [vmem:[%s1253_s1 + $0x28] sm:$0xff]   ;;  %v457_v16 = vsel %vm455_vm3, %v456_v13, 0  ;;  %v935_v20 = vld [vmem:[%s1070_s8 + $0x14] ss:$8 sps:$4 sm:$0xff]   ;;  %vm558_vm4 = vcmask 130048  }
  0x1d   : > { %847 = vmatprep.mubr.msk.bf16.mxu0 %vm429_vm1, %v934_v6  ;;  %851 = vmatprep.mubr.msk.bf16.mxu1 %vm429_vm1, %v940_v7  ;;  %v930_v14 = vld [vmem:[%s1253_s1 + $0x40] sm:$0xff]   ;;  %v931_v15 = vld [vmem:[%s1253_s1 + $0x48] ss:$0 sps:$4 sm:$0x33]   ;;  %v944_v21 = vld [vmem:[%s1070_s8 + $0x54] ss:$8 sps:$4 sm:$0xff]  }
  0x1e   : > { %v459_v17 = vand.u32 %v931_v15, %v457_v16  ;;  %v938_v19 = vld [vmem:[%s1070_s8 + $0x40] ss:$8 sps:$4 sm:$0xff]   ;;  %v937_v22 = vld [vmem:[%s1070_s8 + $0x10] ss:$8 sps:$4 sm:$0xff]   ;;  %v941_v24 = vld [vmem:[%s1070_s8 + $0x24] ss:$8 sps:$4 sm:$0xff]  }
  0x1f   : > { %464 = vmatpush1.bf16.msra.mxu0 %v923_v3  ;;  %870 = vmatpush1.bf16.msra.mxu1 %v923_v3  ;;  %v946_v23 = vld [vmem:[%s1070_s8 + $0x50] ss:$8 sps:$4 sm:$0xff]   ;;  %v950_v25 = vld [vmem:[%s1070_s8 + $0x64] ss:$8 sps:$4 sm:$0xff]   ;;  %v943_v26 = vld [vmem:[%s1070_s8 + $0x20] ss:$8 sps:$4 sm:$0xff]  }
  0x20   : > { %465 = vmatprep.subr.bf16.mxu0 %v997_v2  ;;  %861 = vmatprep.subr.bf16.mxu1 %v997_v2  ;;  %v952_v27 = vld [vmem:[%s1070_s8 + $0x60] ss:$8 sps:$4 sm:$0xff]   ;;  %v947_v28 = vld [vmem:[%s1070_s8 + $0x34] ss:$8 sps:$4 sm:$0xff]   ;;  %v949_v30 = vld [vmem:[%s1070_s8 + $0x30] ss:$8 sps:$4 sm:$0xff]  }
  0x21   : > { %v953_v29 = vld [vmem:[%s1070_s8 + $0x74] ss:$8 sps:$4 sm:$0xff]   ;;  %v955_v31 = vld [vmem:[%s1070_s8 + $0x70] ss:$8 sps:$4 sm:$0xff]   ;;  %vm614_vm5 = vcmask 122880   ;;  %p855_p8 = scmp.ne.s32.totalorder %s978_s15, 1 }
  0x23   : > { %466 = vmatpush1.bf16.msra.mxu0 %v924_v4  ;;  %871 = vmatpush1.bf16.msra.mxu1 %v924_v4 }
  0x24   : > { %467 = vmatprep.subr.bf16.mxu0 %v997_v2  ;;  %862 = vmatprep.subr.bf16.mxu1 %v997_v2 }
  0x27   : > { %468 = vmatpush1.bf16.msra.mxu0 %v925_v5  ;;  %872 = vmatpush1.bf16.msra.mxu1 %v925_v5 }
  0x28   : > { %469 = vmatprep.subr.bf16.mxu0 %v997_v2  ;;  %863 = vmatprep.subr.bf16.mxu1 %v997_v2 }
  0x2b   : > { %470 = vmatpush1.bf16.msra.mxu0 %v926_v8  ;;  %873 = vmatpush1.bf16.msra.mxu1 %v926_v8 }
  0x2c   : > { %471 = vmatprep.subr.bf16.mxu0 %v997_v2  ;;  %864 = vmatprep.subr.bf16.mxu1 %v997_v2 }
  0x2f   : > { %472 = vmatpush1.bf16.msra.mxu0 %v927_v9  ;;  %874 = vmatpush1.bf16.msra.mxu1 %v927_v9 }
  0x30   : > { %473 = vmatprep.subr.bf16.mxu0 %v997_v2  ;;  %865 = vmatprep.subr.bf16.mxu1 %v997_v2 }
  0x33   : > { %474 = vmatpush1.bf16.msra.mxu0 %v928_v10  ;;  %875 = vmatpush1.bf16.msra.mxu1 %v928_v10 }
  0x34   : > { %475 = vmatprep.subr.bf16.mxu0 %v997_v2  ;;  %866 = vmatprep.subr.bf16.mxu1 %v997_v2 }
  0x37   : > { %476 = vmatpush1.bf16.msra.mxu0 %v929_v11  ;;  %876 = vmatpush1.bf16.msra.mxu1 %v929_v11 }
  0x38   : > { %477 = vmatprep.subr.bf16.mxu0 %v997_v2  ;;  %867 = vmatprep.subr.bf16.mxu1 %v997_v2 }
  0x3b   : > { %478 = vmatpush1.bf16.msra.mxu0 %v930_v14  ;;  %877 = vmatpush1.bf16.msra.mxu1 %v930_v14 }
  0x3c   : > { %479 = vmatprep.subr.bf16.mxu0 %v997_v2  ;;  %868 = vmatprep.subr.bf16.mxu1 %v997_v2 }
  0x3f   : > { %480 = vmatpush1.bf16.msra.mxu0 %v459_v17  ;;  %878 = vmatpush1.bf16.msra.mxu1 %v459_v17 }
  0x42   : > { %494 = vmatmul.mubr.bf16.vlgmr.msra.gmra.mrb[0].mxu0 %v932_v18  ;;  %526 = vmatmul.mubr.bf16.vlgmr.msra.gmra.mrb[0].mxu1 %v938_v19 }
  0x43   : > { %848 = vmatprep.mubr.msk.bf16.mxu0 %vm429_vm1, %v935_v20  ;;  %852 = vmatprep.mubr.msk.bf16.mxu1 %vm429_vm1, %v944_v21 }
  0x4a   : > { %502 = vmatmul.mubr.bf16.gmra.mrb[4].mxu0 %v937_v22  ;;  %534 = vmatmul.mubr.bf16.gmra.mrb[4].mxu1 %v946_v23 }
  0x4b   : > { %849 = vmatprep.mubr.msk.bf16.mxu0 %vm429_vm1, %v941_v24  ;;  %853 = vmatprep.mubr.msk.bf16.mxu1 %vm429_vm1, %v950_v25 }
  0x52   : > { %510 = vmatmul.mubr.bf16.gmra.mrb[8].mxu0 %v943_v26  ;;  %542 = vmatmul.mubr.bf16.gmra.mrb[8].mxu1 %v952_v27 }
  0x53   : > { %850 = vmatprep.mubr.msk.bf16.mxu0 %vm429_vm1, %v947_v28  ;;  %854 = vmatprep.mubr.msk.bf16.mxu1 %vm429_vm1, %v953_v29 }
  0x5a   : > { %518 = vmatmul.mubr.bf16.gmra.mrb[12].mxu0 %v949_v30  ;;  %550 = vmatmul.mubr.bf16.gmra.mrb[12].mxu1 %v955_v31 }
 0x115   : > { %v495_v32 = vpop.f32.mrb[0].mxu0  ;;  %v1132_v33 = vpop.f32.mrb[0].mxu1 }
 0x116   : > { %559 = vst.msk [vmem:[%s1075_s11] sm:$0xff] %vm558_vm4, %v495_v32  ;;  %v617_v34 = vmul.f32 %v495_v32, %v495_v32  ;;  %v497_v35 = vpop.f32.mrb[1].mxu0  ;;  %567 = vst.msk [vmem:[%s1075_s11 + $0x40] sm:$0xff] %vm558_vm4, %v1132_v33  ;;  %v529_v36 = vpop.f32.mrb[1].mxu1  ;;  %v576_v39 = vsel %vm558_vm4, %v495_v32, 0.0  ;;  %v625_v29 = vmul.f32 %v1132_v33, %v1132_v33 }
 0x117   : > { %v498_v37 = vpop.f32.mrb[2].mxu0  ;;  %v1139_v38 = vpop.f32.mrb[2].mxu1 }
 0x118   : > { %560 = vst.msk [vmem:[%s1075_s11 + $0x8] sm:$0xff] %vm558_vm4, %v498_v37  ;;  %v577_v40 = vsel %vm558_vm4, %v498_v37, 0.0  ;;  %v618_v41 = vmul.f32 %v498_v37, %v498_v37  ;;  %v500_v42 = vpop.f32.mrb[3].mxu0  ;;  %568 = vst.msk [vmem:[%s1075_s11 + $0x48] sm:$0xff] %vm558_vm4, %v1139_v38  ;;  %v532_v43 = vpop.f32.mrb[3].mxu1  ;;  %v633_v45 = vsel %vm558_vm4, %v617_v34, 0.0 }
 0x119   : > { %v578_v44 = vadd.f32 %v577_v40, %v576_v39  ;;  %v591_v39 = vsel %vm558_vm4, %v1132_v33, 0.0  ;;  %v626_v40 = vmul.f32 %v1139_v38, %v1139_v38 }
 0x11a   : > { %v634_v46 = vsel %vm558_vm4, %v618_v41, 0.0 }
 0x11b   : > { %v635_v47 = vadd.f32 %v634_v46, %v633_v45  ;;  %v593_v45 = vsel %vm558_vm4, %v1139_v38, 0.0 }
 0x11d   : > { %v503_v48 = vpop.f32.mrb[4].mxu0  ;;  %v1150_v49 = vpop.f32.mrb[4].mxu1 }
 0x11e   : > { %561 = vst.msk [vmem:[%s1075_s11 + $0x10] sm:$0xff] %vm558_vm4, %v503_v48  ;;  %v579_v50 = vsel %vm558_vm4, %v503_v48, 0.0  ;;  %v619_v51 = vmul.f32 %v503_v48, %v503_v48  ;;  %v505_v52 = vpop.f32.mrb[5].mxu0  ;;  %569 = vst.msk [vmem:[%s1075_s11 + $0x50] sm:$0xff] %vm558_vm4, %v1150_v49  ;;  %v537_v53 = vpop.f32.mrb[5].mxu1  ;;  %v627_v46 = vmul.f32 %v1150_v49, %v1150_v49  ;;  %v595_v33 = vsel %vm558_vm4, %v1150_v49, 0.0 }
 0x11f   : > { %v580_v54 = vadd.f32 %v579_v50, %v578_v44  ;;  %v506_v55 = vpop.f32.mrb[6].mxu0  ;;  %v1158_v56 = vpop.f32.mrb[6].mxu1  ;;  %v648_v44 = vsel %vm558_vm4, %v625_v29, 0.0  ;;  %v650_v50 = vsel %vm558_vm4, %v626_v40, 0.0 }
 0x120   : > { %v636_v57 = vsel %vm558_vm4, %v619_v51, 0.0  ;;  %562 = vst.msk [vmem:[%s1075_s11 + $0x18] sm:$0xff] %vm558_vm4, %v506_v55  ;;  %v581_v58 = vsel %vm558_vm4, %v506_v55, 0.0  ;;  %v620_v59 = vmul.f32 %v506_v55, %v506_v55  ;;  %v508_v60 = vpop.f32.mrb[7].mxu0  ;;  %570 = vst.msk [vmem:[%s1075_s11 + $0x58] sm:$0xff] %vm558_vm4, %v1158_v56  ;;  %v540_v61 = vpop.f32.mrb[7].mxu1  ;;  %v628_v51 = vmul.f32 %v1158_v56, %v1158_v56 }
 0x121   : > { %v637_v62 = vadd.f32 %v636_v57, %v635_v47  ;;  %v582_v63 = vadd.f32 %v581_v58, %v580_v54  ;;  %v652_v54 = vsel %vm558_vm4, %v627_v46, 0.0  ;;  %v597_v38 = vsel %vm558_vm4, %v1158_v56, 0.0 }
 0x122   : > { %v638_v0 = vsel %vm558_vm4, %v620_v59, 0.0  ;;  %v654_v59 = vsel %vm558_vm4, %v628_v51, 0.0 }
 0x123   : > { %v639_v1 = vadd.f32 %v638_v0, %v637_v62 }
 0x125   : > { %v511_v2 = vpop.f32.mrb[8].mxu0  ;;  %v1168_v3 = vpop.f32.mrb[8].mxu1 }
 0x126   : > { %563 = vst.msk [vmem:[%s1075_s11 + $0x20] sm:$0xff] %vm558_vm4, %v511_v2  ;;  %v583_v4 = vsel %vm558_vm4, %v511_v2, 0.0  ;;  %v621_v5 = vmul.f32 %v511_v2, %v511_v2  ;;  %v513_v6 = vpop.f32.mrb[9].mxu0  ;;  %571 = vst.msk [vmem:[%s1075_s11 + $0x60] sm:$0xff] %vm558_vm4, %v1168_v3  ;;  %v545_v7 = vpop.f32.mrb[9].mxu1  ;;  %v629_v55 = vmul.f32 %v1168_v3, %v1168_v3  ;;  %v599_v49 = vsel %vm558_vm4, %v1168_v3, 0.0 }
 0x127   : > { %v584_v8 = vadd.f32 %v583_v4, %v582_v63  ;;  %v514_v9 = vpop.f32.mrb[10].mxu0  ;;  %v546_v10 = vpop.f32.mrb[10].mxu1 }
 0x128   : > { %v640_v11 = vsel %vm558_vm4, %v621_v5, 0.0  ;;  %564 = vst.msk [vmem:[%s1075_s11 + $0x28] sm:$0xff] %vm558_vm4, %v514_v9  ;;  %v585_v12 = vsel %vm558_vm4, %v514_v9, 0.0  ;;  %v622_v13 = vmul.f32 %v514_v9, %v514_v9  ;;  %v516_v14 = vpop.f32.mrb[11].mxu0  ;;  %572 = vst.msk [vmem:[%s1075_s11 + $0x68] sm:$0xff] %vm558_vm4, %v546_v10  ;;  %v548_v15 = vpop.f32.mrb[11].mxu1  ;;  %v630_v60 = vmul.f32 %v546_v10, %v546_v10 }
 0x129   : > { %v641_v16 = vadd.f32 %v640_v11, %v639_v1  ;;  %v586_v17 = vadd.f32 %v585_v12, %v584_v8  ;;  %v656_v0 = vsel %vm558_vm4, %v629_v55, 0.0  ;;  %v601_v1 = vsel %vm558_vm4, %v546_v10, 0.0 }
 0x12a   : > { %v642_v18 = vsel %vm558_vm4, %v622_v13, 0.0  ;;  %v658_v5 = vsel %vm558_vm4, %v630_v60, 0.0 }
 0x12b   : > { %v643_v19 = vadd.f32 %v642_v18, %v641_v16 }
 0x12d   : > { %v519_v20 = vpop.f32.mrb[12].mxu0  ;;  %v551_v21 = vpop.f32.mrb[12].mxu1 }
 0x12e   : > { %565 = vst.msk [vmem:[%s1075_s11 + $0x30] sm:$0xff] %vm558_vm4, %v519_v20  ;;  %v587_v22 = vsel %vm558_vm4, %v519_v20, 0.0  ;;  %v623_v23 = vmul.f32 %v519_v20, %v519_v20  ;;  %v521_v24 = vpop.f32.mrb[13].mxu0  ;;  %573 = vst.msk [vmem:[%s1075_s11 + $0x70] sm:$0xff] %vm558_vm4, %v551_v21  ;;  %v553_v25 = vpop.f32.mrb[13].mxu1  ;;  %v631_v61 = vmul.f32 %v551_v21, %v551_v21  ;;  %v603_v56 = vsel %vm558_vm4, %v551_v21, 0.0 }
 0x12f   : > { %v588_v26 = vadd.f32 %v587_v22, %v586_v17  ;;  %v522_v27 = vpop.f32.mrb[14].mxu0  ;;  %v554_v28 = vpop.f32.mrb[14].mxu1 }
 0x130   : > { %v644_v30 = vsel %vm558_vm4, %v623_v23, 0.0  ;;  %566 = vst.msk [vmem:[%s1075_s11 + $0x38] sm:$0xff] %vm558_vm4, %v522_v27  ;;  %v589_v31 = vsel %vm558_vm4, %v522_v27, 0.0  ;;  %v624_v32 = vmul.f32 %v522_v27, %v522_v27  ;;  %v524_v34 = vpop.f32.mrb[15].mxu0  ;;  %574 = vst.msk [vmem:[%s1075_s11 + $0x78] sm:$0xff] %vm558_vm4, %v554_v28  ;;  %v556_v35 = vpop.f32.mrb[15].mxu1  ;;  %v632_v7 = vmul.f32 %v554_v28, %v554_v28 }
 0x131   : > { %v645_v36 = vadd.f32 %v644_v30, %v643_v19  ;;  %v590_v37 = vadd.f32 %v589_v31, %v588_v26  ;;  %v660_v6 = vsel %vm558_vm4, %v631_v61, 0.0  ;;  %v605_v3 = vsel %vm558_vm4, %v554_v28, 0.0  ;;  %v575_v23 = vld [vmem:[#allocation2] sm:$0x1]  ;;  %v616_v26 = vld [vmem:[#allocation3] sm:$0x1] }
 0x132   : > { %v646_v41 = vsel %vm558_vm4, %v624_v32, 0.0  ;;  %v662_v13 = vsel %vm558_vm4, %v632_v7, 0.0 }
 0x133   : > { %v592_v42 = vadd.f32 %v591_v39, %v590_v37  ;;  %v647_v43 = vadd.f32 %v646_v41, %v645_v36 }
 0x135   : > { %v594_v47 = vadd.f32 %v593_v45, %v592_v42  ;;  %v649_v48 = vadd.f32 %v648_v44, %v647_v43 }
 0x137   : > { %v651_v52 = vadd.f32 %v650_v50, %v649_v48  ;;  %v596_v53 = vadd.f32 %v595_v33, %v594_v47 }
 0x139   : > { %v598_v57 = vadd.f32 %v597_v38, %v596_v53  ;;  %v653_v58 = vadd.f32 %v652_v54, %v651_v52 }
 0x13b   : > { %v600_v62 = vadd.f32 %v599_v49, %v598_v57  ;;  %v655_v63 = vadd.f32 %v654_v59, %v653_v58 }
 0x13d   : > { %v657_v2 = vadd.f32 %v656_v0, %v655_v63  ;;  %v602_v4 = vadd.f32 %v601_v1, %v600_v62 }
 0x13f   : > { %v659_v8 = vadd.f32 %v658_v5, %v657_v2  ;;  %v604_v9 = vadd.f32 %v603_v56, %v602_v4 }
 0x141   : > { %v661_v11 = vadd.f32 %v660_v6, %v659_v8  ;;  %v606_v12 = vadd.f32 %v605_v3, %v604_v9 }
 0x143   : > { %v607_v14 = vrot.slane %v606_v12, 4  ;;  %v663_v15 = vadd.f32 %v662_v13, %v661_v11 }
 0x145   : > { %v608_v10 = vadd.f32 %v607_v14, %v606_v12  ;;  %v664_v16 = vrot.slane %v663_v15, 4 }
 0x147   : > { %v609_v17 = vrot.slane %v608_v10, 2  ;;  %v665_v18 = vadd.f32 %v664_v16, %v663_v15 }
 0x149   : > { %v610_v19 = vadd.f32 %v609_v17, %v608_v10  ;;  %v666_v20 = vrot.slane %v665_v18, 2 }
 0x14b   : > { %v611_v21 = vrot.slane %v610_v19, 1  ;;  %v667_v22 = vadd.f32 %v666_v20, %v665_v18 }
 0x14d   : > { %v612_v24 = vadd.f32 %v611_v21, %v610_v19  ;;  %v668_v25 = vrot.slane %v667_v22, 1  ;;  %675 = sbr.rel (%p855_p8) target bundleno = 348 (0x15c), region = 36 }
 0x14f   : > { %v613_v27 = vadd.f32 %v612_v24, %v575_v23  ;;  %v669_v28 = vadd.f32 %v668_v25, %v667_v22 }
 0x151   : > { %615 = vst.msk [vmem:[#allocation2] sm:$0x1] %vm614_vm5, %v613_v27  ;;  %v670_v29 = vadd.f32 %v669_v28, %v616_v26 }
 0x153   : > { %671 = vst.msk [vmem:[#allocation3] sm:$0x1] %vm614_vm5, %v670_v29 }
 0x158   : > { %v676_v30 = vld [vmem:[#allocation2] sm:$0x1] }
 0x159   : > { %677 = vst.msk [vmem:[%s253_s27] sm:$0x1] %vm614_vm5, %v676_v30 }
 0x15a   : > { %v678_v31 = vld [vmem:[#allocation3] sm:$0x1] }
 0x15b   : > { %679 = vst.msk [vmem:[%s256_s30] sm:$0x1] %vm614_vm5, %v678_v31 }
 0x15c PF: > { %s15_s19 = sadd.s32 1, %s994_s19   ;;  %s1257_s15 = smov %s986_s17 }
 0x15d   : > { %p12_p9 = scmp.ge.s32.totalorder %s15_s19, 6   ;;  %s1258_s16 = smov %s990_s18 }
 0x15e   : > { %s1259_s17 = smov %s1262_s20  ;;  %s1260_s18 = smov %s1266_s21 }
 0x15f   :  { %14 = sbr.rel (!%p12_p9) target bundleno = 3 (0x3), region = 90 }

// kernel: resnet_generator_pallas.27
= control target key start
LH: loop header
LB: loop body
LE: loop exit
PB: predicated region body
PF: predicated region fallthrough
CT: control target
= control target key end

     0   :  { %v590_v0 = vmov 0   ;;  %vm221_vm0 = vcmask 130048   ;;  %vm58_vm1 = vcmask 253952   ;;  %v591_v26 = vmov 0.0   ;;  %s838_s1 = inlined_call_operand.vmem [shape: bf16[144,32], index: 1, kind: input, shape index: {}]   ;;  %s839_s0 = inlined_call_operand.vmem [shape: bf16[128,144], index: 0, kind: input, shape index: {}]   ;;  %s840_s2 = inlined_call_operand.vmem [shape: f32[128,32], index: 2, kind: output, shape index: {0}]   ;;  %s841_s3 = inlined_call_operand.vmem [shape: f32[1,1,32], index: 3, kind: output, shape index: {1}]   ;;  %s842_s4 = inlined_call_operand.vmem [shape: f32[1,1,32], index: 4, kind: output, shape index: {2}]  }
   0x1   :  { %246 = vmatprep.subr.bf16.mxu0 %v590_v0  ;;  %v557_v1 = vld [vmem:[%s838_s1] sm:$0xff]   ;;  %537 = vmatprep.subr.bf16.mxu1 %v590_v0  ;;  %v558_v2 = vld [vmem:[%s838_s1 + $0x8] sm:$0xff]   ;;  %v559_v3 = vld [vmem:[%s838_s1 + $0x10] sm:$0xff]   ;;  %59 = vst.msk [vmem:[#allocation2] sm:$0x1] %vm58_vm1, %v591_v26  ;;  %vm343_vm2 = vcmask 261120  }
   0x2   :  { %247 = vmatpush1.bf16.msra.mxu0 %v557_v1  ;;  %546 = vmatpush1.bf16.msra.mxu1 %v557_v1  ;;  %v560_v4 = vld [vmem:[%s838_s1 + $0x18] sm:$0xff]   ;;  %v568_v5 = vld [vmem:[%s839_s0 + $0x4] ss:$8 sps:$4 sm:$0xff]   ;;  %v563_v9 = vld [vmem:[%s838_s1 + $0x30] sm:$0xff]   ;;  %60 = vst.msk [vmem:[#allocation3] sm:$0x1] %vm58_vm1, %v591_v26 }
   0x3   :  { %248 = vmatprep.subr.bf16.mxu0 %v590_v0  ;;  %538 = vmatprep.subr.bf16.mxu1 %v590_v0  ;;  %v574_v6 = vld [vmem:[%s839_s0 + $0x44] ss:$8 sps:$4 sm:$0xff]   ;;  %v564_v10 = vld [vmem:[%s838_s1 + $0x38] sm:$0xff]   ;;  %v566_v12 = vld [vmem:[%s839_s0] ss:$8 sps:$4 sm:$0xff]  }
   0x4   :  { %529 = vmatprep.mubr.msk.bf16.mxu0 %vm221_vm0, %v568_v5  ;;  %v561_v7 = vld [vmem:[%s838_s1 + $0x20] sm:$0xff]   ;;  %533 = vmatprep.mubr.msk.bf16.mxu1 %vm221_vm0, %v574_v6  ;;  %v562_v8 = vld [vmem:[%s838_s1 + $0x28] sm:$0xff]   ;;  %v569_v14 = vld [vmem:[%s839_s0 + $0x14] ss:$8 sps:$4 sm:$0xff]  }
   0x5   :  { %v565_v11 = vld [vmem:[%s838_s1 + $0x40] sm:$0xff]   ;;  %v578_v15 = vld [vmem:[%s839_s0 + $0x54] ss:$8 sps:$4 sm:$0xff]   ;;  %v571_v16 = vld [vmem:[%s839_s0 + $0x10] ss:$8 sps:$4 sm:$0xff]  }
   0x6   :  { %249 = vmatpush1.bf16.msra.mxu0 %v558_v2  ;;  %547 = vmatpush1.bf16.msra.mxu1 %v558_v2  ;;  %v572_v13 = vld [vmem:[%s839_s0 + $0x40] ss:$8 sps:$4 sm:$0xff]   ;;  %v580_v17 = vld [vmem:[%s839_s0 + $0x50] ss:$8 sps:$4 sm:$0xff]   ;;  %v575_v18 = vld [vmem:[%s839_s0 + $0x24] ss:$8 sps:$4 sm:$0xff]  }
   0x7   :  { %250 = vmatprep.subr.bf16.mxu0 %v590_v0  ;;  %539 = vmatprep.subr.bf16.mxu1 %v590_v0  ;;  %v584_v19 = vld [vmem:[%s839_s0 + $0x64] ss:$8 sps:$4 sm:$0xff]   ;;  %v577_v20 = vld [vmem:[%s839_s0 + $0x20] ss:$8 sps:$4 sm:$0xff]   ;;  %v581_v22 = vld [vmem:[%s839_s0 + $0x34] ss:$8 sps:$4 sm:$0xff]  }
   0x8   :  { %v586_v21 = vld [vmem:[%s839_s0 + $0x60] ss:$8 sps:$4 sm:$0xff]   ;;  %v587_v23 = vld [vmem:[%s839_s0 + $0x74] ss:$8 sps:$4 sm:$0xff]   ;;  %v583_v24 = vld [vmem:[%s839_s0 + $0x30] ss:$8 sps:$4 sm:$0xff]  }
   0x9   :  { %v589_v25 = vld [vmem:[%s839_s0 + $0x70] ss:$8 sps:$4 sm:$0xff]  }
   0xa   :  { %251 = vmatpush1.bf16.msra.mxu0 %v559_v3  ;;  %548 = vmatpush1.bf16.msra.mxu1 %v559_v3 }
   0xb   :  { %252 = vmatprep.subr.bf16.mxu0 %v590_v0  ;;  %540 = vmatprep.subr.bf16.mxu1 %v590_v0 }
   0xe   :  { %253 = vmatpush1.bf16.msra.mxu0 %v560_v4  ;;  %549 = vmatpush1.bf16.msra.mxu1 %v560_v4 }
   0xf   :  { %254 = vmatprep.subr.bf16.mxu0 %v590_v0  ;;  %541 = vmatprep.subr.bf16.mxu1 %v590_v0 }
  0x12   :  { %255 = vmatpush1.bf16.msra.mxu0 %v561_v7  ;;  %550 = vmatpush1.bf16.msra.mxu1 %v561_v7 }
  0x13   :  { %256 = vmatprep.subr.bf16.mxu0 %v590_v0  ;;  %542 = vmatprep.subr.bf16.mxu1 %v590_v0 }
  0x16   :  { %257 = vmatpush1.bf16.msra.mxu0 %v562_v8  ;;  %551 = vmatpush1.bf16.msra.mxu1 %v562_v8 }
  0x17   :  { %258 = vmatprep.subr.bf16.mxu0 %v590_v0  ;;  %543 = vmatprep.subr.bf16.mxu1 %v590_v0 }
  0x1a   :  { %259 = vmatpush1.bf16.msra.mxu0 %v563_v9  ;;  %552 = vmatpush1.bf16.msra.mxu1 %v563_v9 }
  0x1b   :  { %260 = vmatprep.subr.bf16.mxu0 %v590_v0  ;;  %544 = vmatprep.subr.bf16.mxu1 %v590_v0 }
  0x1e   :  { %261 = vmatpush1.bf16.msra.mxu0 %v564_v10  ;;  %553 = vmatpush1.bf16.msra.mxu1 %v564_v10 }
  0x1f   :  { %262 = vmatprep.subr.bf16.mxu0 %v590_v0  ;;  %545 = vmatprep.subr.bf16.mxu1 %v590_v0 }
  0x22   :  { %263 = vmatpush1.bf16.msra.mxu0 %v565_v11  ;;  %554 = vmatpush1.bf16.msra.mxu1 %v565_v11 }
  0x25   :  { %279 = vmatmul.mubr.bf16.vlgmr.msra.gmra.mrb[0].mxu0 %v566_v12  ;;  %311 = vmatmul.mubr.bf16.vlgmr.msra.gmra.mrb[0].mxu1 %v572_v13 }
  0x26   :  { %530 = vmatprep.mubr.msk.bf16.mxu0 %vm221_vm0, %v569_v14  ;;  %534 = vmatprep.mubr.msk.bf16.mxu1 %vm221_vm0, %v578_v15 }
  0x2d   :  { %287 = vmatmul.mubr.bf16.gmra.mrb[4].mxu0 %v571_v16  ;;  %319 = vmatmul.mubr.bf16.gmra.mrb[4].mxu1 %v580_v17 }
  0x2e   :  { %531 = vmatprep.mubr.msk.bf16.mxu0 %vm221_vm0, %v575_v18  ;;  %535 = vmatprep.mubr.msk.bf16.mxu1 %vm221_vm0, %v584_v19 }
  0x35   :  { %295 = vmatmul.mubr.bf16.gmra.mrb[8].mxu0 %v577_v20  ;;  %327 = vmatmul.mubr.bf16.gmra.mrb[8].mxu1 %v586_v21 }
  0x36   :  { %532 = vmatprep.mubr.msk.bf16.mxu0 %vm221_vm0, %v581_v22  ;;  %536 = vmatprep.mubr.msk.bf16.mxu1 %vm221_vm0, %v587_v23 }
  0x3d   :  { %303 = vmatmul.mubr.bf16.gmra.mrb[12].mxu0 %v583_v24  ;;  %335 = vmatmul.mubr.bf16.gmra.mrb[12].mxu1 %v589_v25 }
  0xf8   :  { %v280_v27 = vpop.f32.mrb[0].mxu0  ;;  %v702_v28 = vpop.f32.mrb[0].mxu1 }
  0xf9   :  { %344 = vst.msk [vmem:[%s840_s2] sm:$0xff] %vm343_vm2, %v280_v27  ;;  %v402_v29 = vmul.f32 %v280_v27, %v280_v27  ;;  %v282_v30 = vpop.f32.mrb[1].mxu0  ;;  %352 = vst.msk [vmem:[%s840_s2 + $0x40] sm:$0xff] %vm343_vm2, %v702_v28  ;;  %v314_v31 = vpop.f32.mrb[1].mxu1  ;;  %v361_v34 = vsel %vm343_vm2, %v280_v27, 0.0  ;;  %v410_v24 = vmul.f32 %v702_v28, %v702_v28 }
  0xfa   :  { %v283_v32 = vpop.f32.mrb[2].mxu0  ;;  %v713_v33 = vpop.f32.mrb[2].mxu1 }
  0xfb   :  { %345 = vst.msk [vmem:[%s840_s2 + $0x8] sm:$0xff] %vm343_vm2, %v283_v32  ;;  %v362_v35 = vsel %vm343_vm2, %v283_v32, 0.0  ;;  %v403_v36 = vmul.f32 %v283_v32, %v283_v32  ;;  %v285_v37 = vpop.f32.mrb[3].mxu0  ;;  %353 = vst.msk [vmem:[%s840_s2 + $0x48] sm:$0xff] %vm343_vm2, %v713_v33  ;;  %v317_v38 = vpop.f32.mrb[3].mxu1  ;;  %v418_v40 = vsel %vm343_vm2, %v402_v29, 0.0 }
  0xfc   :  { %v363_v39 = vadd.f32 %v362_v35, %v361_v34  ;;  %v376_v34 = vsel %vm343_vm2, %v702_v28, 0.0  ;;  %v411_v35 = vmul.f32 %v713_v33, %v713_v33 }
  0xfd   :  { %v419_v41 = vsel %vm343_vm2, %v403_v36, 0.0 }
  0xfe   :  { %v420_v42 = vadd.f32 %v419_v41, %v418_v40  ;;  %v378_v40 = vsel %vm343_vm2, %v713_v33, 0.0 }
 0x100   :  { %v288_v43 = vpop.f32.mrb[4].mxu0  ;;  %v728_v44 = vpop.f32.mrb[4].mxu1 }
 0x101   :  { %346 = vst.msk [vmem:[%s840_s2 + $0x10] sm:$0xff] %vm343_vm2, %v288_v43  ;;  %v364_v45 = vsel %vm343_vm2, %v288_v43, 0.0  ;;  %v404_v46 = vmul.f32 %v288_v43, %v288_v43  ;;  %v290_v47 = vpop.f32.mrb[5].mxu0  ;;  %354 = vst.msk [vmem:[%s840_s2 + $0x50] sm:$0xff] %vm343_vm2, %v728_v44  ;;  %v322_v48 = vpop.f32.mrb[5].mxu1  ;;  %v412_v41 = vmul.f32 %v728_v44, %v728_v44  ;;  %v380_v28 = vsel %vm343_vm2, %v728_v44, 0.0 }
 0x102   :  { %v365_v49 = vadd.f32 %v364_v45, %v363_v39  ;;  %v291_v50 = vpop.f32.mrb[6].mxu0  ;;  %v740_v51 = vpop.f32.mrb[6].mxu1  ;;  %v433_v39 = vsel %vm343_vm2, %v410_v24, 0.0  ;;  %v435_v45 = vsel %vm343_vm2, %v411_v35, 0.0 }
 0x103   :  { %v421_v52 = vsel %vm343_vm2, %v404_v46, 0.0  ;;  %347 = vst.msk [vmem:[%s840_s2 + $0x18] sm:$0xff] %vm343_vm2, %v291_v50  ;;  %v366_v53 = vsel %vm343_vm2, %v291_v50, 0.0  ;;  %v405_v54 = vmul.f32 %v291_v50, %v291_v50  ;;  %v293_v55 = vpop.f32.mrb[7].mxu0  ;;  %355 = vst.msk [vmem:[%s840_s2 + $0x58] sm:$0xff] %vm343_vm2, %v740_v51  ;;  %v325_v56 = vpop.f32.mrb[7].mxu1  ;;  %v413_v46 = vmul.f32 %v740_v51, %v740_v51 }
 0x104   :  { %v422_v57 = vadd.f32 %v421_v52, %v420_v42  ;;  %v367_v58 = vadd.f32 %v366_v53, %v365_v49  ;;  %v437_v49 = vsel %vm343_vm2, %v412_v41, 0.0  ;;  %v382_v33 = vsel %vm343_vm2, %v740_v51, 0.0 }
 0x105   :  { %v423_v59 = vsel %vm343_vm2, %v405_v54, 0.0  ;;  %v439_v54 = vsel %vm343_vm2, %v413_v46, 0.0 }
 0x106   :  { %v424_v60 = vadd.f32 %v423_v59, %v422_v57 }
 0x108   :  { %v296_v61 = vpop.f32.mrb[8].mxu0  ;;  %v754_v62 = vpop.f32.mrb[8].mxu1 }
 0x109   :  { %348 = vst.msk [vmem:[%s840_s2 + $0x20] sm:$0xff] %vm343_vm2, %v296_v61  ;;  %v368_v63 = vsel %vm343_vm2, %v296_v61, 0.0  ;;  %v406_v0 = vmul.f32 %v296_v61, %v296_v61  ;;  %v298_v1 = vpop.f32.mrb[9].mxu0  ;;  %356 = vst.msk [vmem:[%s840_s2 + $0x60] sm:$0xff] %vm343_vm2, %v754_v62  ;;  %v330_v2 = vpop.f32.mrb[9].mxu1  ;;  %v414_v50 = vmul.f32 %v754_v62, %v754_v62  ;;  %v384_v44 = vsel %vm343_vm2, %v754_v62, 0.0 }
 0x10a   :  { %v369_v3 = vadd.f32 %v368_v63, %v367_v58  ;;  %v299_v4 = vpop.f32.mrb[10].mxu0  ;;  %v331_v5 = vpop.f32.mrb[10].mxu1 }
 0x10b   :  { %v425_v6 = vsel %vm343_vm2, %v406_v0, 0.0  ;;  %349 = vst.msk [vmem:[%s840_s2 + $0x28] sm:$0xff] %vm343_vm2, %v299_v4  ;;  %v370_v7 = vsel %vm343_vm2, %v299_v4, 0.0  ;;  %v407_v8 = vmul.f32 %v299_v4, %v299_v4  ;;  %v301_v9 = vpop.f32.mrb[11].mxu0  ;;  %357 = vst.msk [vmem:[%s840_s2 + $0x68] sm:$0xff] %vm343_vm2, %v331_v5  ;;  %v333_v10 = vpop.f32.mrb[11].mxu1  ;;  %v415_v55 = vmul.f32 %v331_v5, %v331_v5 }
 0x10c   :  { %v426_v11 = vadd.f32 %v425_v6, %v424_v60  ;;  %v371_v12 = vadd.f32 %v370_v7, %v369_v3  ;;  %v441_v59 = vsel %vm343_vm2, %v414_v50, 0.0  ;;  %v386_v60 = vsel %vm343_vm2, %v331_v5, 0.0 }
 0x10d   :  { %v427_v13 = vsel %vm343_vm2, %v407_v8, 0.0  ;;  %v443_v0 = vsel %vm343_vm2, %v415_v55, 0.0 }
 0x10e   :  { %v428_v14 = vadd.f32 %v427_v13, %v426_v11 }
 0x110   :  { %v304_v15 = vpop.f32.mrb[12].mxu0  ;;  %v336_v16 = vpop.f32.mrb[12].mxu1 }
 0x111   :  { %350 = vst.msk [vmem:[%s840_s2 + $0x30] sm:$0xff] %vm343_vm2, %v304_v15  ;;  %v372_v17 = vsel %vm343_vm2, %v304_v15, 0.0  ;;  %v408_v18 = vmul.f32 %v304_v15, %v304_v15  ;;  %v306_v19 = vpop.f32.mrb[13].mxu0  ;;  %358 = vst.msk [vmem:[%s840_s2 + $0x70] sm:$0xff] %vm343_vm2, %v336_v16  ;;  %v338_v20 = vpop.f32.mrb[13].mxu1  ;;  %v416_v56 = vmul.f32 %v336_v16, %v336_v16  ;;  %v388_v51 = vsel %vm343_vm2, %v336_v16, 0.0 }
 0x112   :  { %v373_v21 = vadd.f32 %v372_v17, %v371_v12  ;;  %v307_v22 = vpop.f32.mrb[14].mxu0  ;;  %v339_v23 = vpop.f32.mrb[14].mxu1 }
 0x113   :  { %v429_v25 = vsel %vm343_vm2, %v408_v18, 0.0  ;;  %351 = vst.msk [vmem:[%s840_s2 + $0x38] sm:$0xff] %vm343_vm2, %v307_v22  ;;  %v374_v26 = vsel %vm343_vm2, %v307_v22, 0.0  ;;  %v409_v27 = vmul.f32 %v307_v22, %v307_v22  ;;  %v309_v29 = vpop.f32.mrb[15].mxu0  ;;  %359 = vst.msk [vmem:[%s840_s2 + $0x78] sm:$0xff] %vm343_vm2, %v339_v23  ;;  %v341_v30 = vpop.f32.mrb[15].mxu1  ;;  %v417_v2 = vmul.f32 %v339_v23, %v339_v23 }
 0x114   :  { %v430_v31 = vadd.f32 %v429_v25, %v428_v14  ;;  %v375_v32 = vadd.f32 %v374_v26, %v373_v21  ;;  %v445_v1 = vsel %vm343_vm2, %v416_v56, 0.0  ;;  %v390_v62 = vsel %vm343_vm2, %v339_v23, 0.0  ;;  %v360_v18 = vld [vmem:[#allocation2] sm:$0x1]  ;;  %v401_v21 = vld [vmem:[#allocation3] sm:$0x1] }
 0x115   :  { %v431_v36 = vsel %vm343_vm2, %v409_v27, 0.0  ;;  %v447_v8 = vsel %vm343_vm2, %v417_v2, 0.0 }
 0x116   :  { %v377_v37 = vadd.f32 %v376_v34, %v375_v32  ;;  %v432_v38 = vadd.f32 %v431_v36, %v430_v31 }
 0x118   :  { %v379_v42 = vadd.f32 %v378_v40, %v377_v37  ;;  %v434_v43 = vadd.f32 %v433_v39, %v432_v38 }
 0x11a   :  { %v436_v47 = vadd.f32 %v435_v45, %v434_v43  ;;  %v381_v48 = vadd.f32 %v380_v28, %v379_v42 }
 0x11c   :  { %v383_v52 = vadd.f32 %v382_v33, %v381_v48  ;;  %v438_v53 = vadd.f32 %v437_v49, %v436_v47 }
 0x11e   :  { %v385_v57 = vadd.f32 %v384_v44, %v383_v52  ;;  %v440_v58 = vadd.f32 %v439_v54, %v438_v53 }
 0x120   :  { %v442_v61 = vadd.f32 %v441_v59, %v440_v58  ;;  %v387_v63 = vadd.f32 %v386_v60, %v385_v57 }
 0x122   :  { %v444_v3 = vadd.f32 %v443_v0, %v442_v61  ;;  %v389_v4 = vadd.f32 %v388_v51, %v387_v63 }
 0x124   :  { %v446_v6 = vadd.f32 %v445_v1, %v444_v3  ;;  %v391_v7 = vadd.f32 %v390_v62, %v389_v4 }
 0x126   :  { %v392_v9 = vrot.slane %v391_v7, 4  ;;  %v448_v10 = vadd.f32 %v447_v8, %v446_v6 }
 0x128   :  { %v393_v5 = vadd.f32 %v392_v9, %v391_v7  ;;  %v449_v11 = vrot.slane %v448_v10, 4 }
 0x12a   :  { %v394_v12 = vrot.slane %v393_v5, 2  ;;  %v450_v13 = vadd.f32 %v449_v11, %v448_v10 }
 0x12c   :  { %v395_v14 = vadd.f32 %v394_v12, %v393_v5  ;;  %v451_v15 = vrot.slane %v450_v13, 2 }
 0x12e   :  { %v396_v16 = vrot.slane %v395_v14, 1  ;;  %v452_v17 = vadd.f32 %v451_v15, %v450_v13 }
 0x130   :  { %v397_v19 = vadd.f32 %v396_v16, %v395_v14  ;;  %v453_v20 = vrot.slane %v452_v17, 1 }
 0x132   :  { %v398_v22 = vadd.f32 %v397_v19, %v360_v18  ;;  %v454_v23 = vadd.f32 %v453_v20, %v452_v17 }
 0x134   :  { %400 = vst.msk [vmem:[#allocation2] sm:$0x1] %vm58_vm1, %v398_v22  ;;  %v455_v24 = vadd.f32 %v454_v23, %v401_v21 }
 0x136   :  { %456 = vst.msk [vmem:[#allocation3] sm:$0x1] %vm58_vm1, %v455_v24 }
 0x13b   :  { %v460_v25 = vld [vmem:[#allocation2] sm:$0x1] }
 0x13c   :  { %461 = vst.msk [vmem:[%s841_s3] sm:$0x1] %vm58_vm1, %v460_v25 }
 0x13d   :  { %v462_v26 = vld [vmem:[#allocation3] sm:$0x1] }
 0x13e   :  { %463 = vst.msk [vmem:[%s842_s4] sm:$0x1] %vm58_vm1, %v462_v26 }

// kernel: resnet_generator_pallas.28
= control target key start
LH: loop header
LB: loop body
LE: loop exit
PB: predicated region body
PF: predicated region fallthrough
CT: control target
= control target key end

     0   :  { %vm156_vm0 = vcmask 257024   ;;  %s385_s0 = inlined_call_operand.vmem [shape: f32[128,32], index: 0, kind: input, shape index: {}]   ;;  %s386_s1 = inlined_call_operand.vmem [shape: f32[1,32], index: 1, kind: input, shape index: {}]   ;;  %s387_s2 = inlined_call_operand.vmem [shape: f32[1,32], index: 2, kind: input, shape index: {}]   ;;  %s388_s3 = inlined_call_operand.vmem [shape: bf16[128,32], index: 3, kind: output, shape index: {}]  }
   0x1   :  { %v14_v0 = vld [vmem:[%s385_s0] sm:$0xff]  ;;  %v15_v4 = vld [vmem:[%s385_s0 + $0x8] sm:$0xff]  ;;  %v16_v5 = vld [vmem:[%s385_s0 + $0x10] sm:$0xff] }
   0x2   :  { %v237_v1 = vld [vmem:[%s386_s1] ss:$0 sm:$0xff]  ;;  %v17_v6 = vld [vmem:[%s385_s0 + $0x18] sm:$0xff]  ;;  %v19_v11 = vld [vmem:[%s385_s0 + $0x28] sm:$0xff] }
   0x3   :  { %v242_v2 = vld [vmem:[%s387_s2] ss:$0 sm:$0xff]  ;;  %v37_v3 = vmul.f32 %v237_v1, %v14_v0  ;;  %v38_v7 = vmul.f32 %v237_v1, %v15_v4  ;;  %v39_v8 = vmul.f32 %v237_v1, %v16_v5  ;;  %v40_v9 = vmul.f32 %v237_v1, %v17_v6  ;;  %v20_v12 = vld [vmem:[%s385_s0 + $0x30] sm:$0xff]  ;;  %v21_v17 = vld [vmem:[%s385_s0 + $0x38] sm:$0xff] }
   0x4   :  { %v18_v10 = vld [vmem:[%s385_s0 + $0x20] sm:$0xff]  ;;  %v42_v15 = vmul.f32 %v237_v1, %v19_v11  ;;  %v43_v16 = vmul.f32 %v237_v1, %v20_v12  ;;  %v44_v21 = vmul.f32 %v237_v1, %v21_v17  ;;  %v23_v35 = vld [vmem:[%s385_s0 + $0x48] sm:$0xff]  ;;  %v24_v36 = vld [vmem:[%s385_s0 + $0x50] sm:$0xff] }
   0x5   :  { %v60_v13 = vadd.f32 %v242_v2, %v37_v3  ;;  %v41_v14 = vmul.f32 %v237_v1, %v18_v10  ;;  %v61_v18 = vadd.f32 %v242_v2, %v38_v7  ;;  %v62_v19 = vadd.f32 %v242_v2, %v39_v8  ;;  %v22_v30 = vld [vmem:[%s385_s0 + $0x40] sm:$0xff]  ;;  %v25_v37 = vld [vmem:[%s385_s0 + $0x58] sm:$0xff]  ;;  %v27_v43 = vld [vmem:[%s385_s0 + $0x68] sm:$0xff] }
   0x6   :  { %v63_v20 = vadd.f32 %v242_v2, %v40_v9  ;;  %v65_v24 = vadd.f32 %v242_v2, %v42_v15  ;;  %v66_v25 = vadd.f32 %v242_v2, %v43_v16  ;;  %v67_v29 = vadd.f32 %v242_v2, %v44_v21  ;;  %v26_v42 = vld [vmem:[%s385_s0 + $0x60] sm:$0xff]  ;;  %v28_v44 = vld [vmem:[%s385_s0 + $0x70] sm:$0xff]  ;;  %v29_v49 = vld [vmem:[%s385_s0 + $0x78] sm:$0xff] }
   0x7   :  { %v76_v22 = vmax.f32 %v60_v13, 0.0  ;;  %v64_v23 = vadd.f32 %v242_v2, %v41_v14  ;;  %v77_v26 = vmax.f32 %v61_v18, 0.0  ;;  %v78_v27 = vmax.f32 %v62_v19, 0.0 }
   0x8   :  { %v79_v28 = vmax.f32 %v63_v20, 0.0  ;;  %v81_v33 = vmax.f32 %v65_v24, 0.0  ;;  %v82_v34 = vmax.f32 %v66_v25, 0.0  ;;  %v83_v41 = vmax.f32 %v67_v29, 0.0 }
   0x9   :  { %v195_v31 = vpack.c.bf16 %v76_v22, %v76_v22  ;;  %v80_v32 = vmax.f32 %v64_v23, 0.0  ;;  %v196_v38 = vpack.c.bf16 %v77_v26, %v77_v26  ;;  %v197_v39 = vpack.c.bf16 %v78_v27, %v78_v27 }
   0xa   :  { %v198_v40 = vpack.c.bf16 %v79_v28, %v79_v28  ;;  %v200_v46 = vpack.c.bf16 %v81_v33, %v81_v33  ;;  %v201_v47 = vpack.c.bf16 %v82_v34, %v82_v34  ;;  %v45_v48 = vmul.f32 %v237_v1, %v22_v30 }
   0xb   :  { %157 = vst.msk [vmem:[%s388_s3] sm:$0xf] %vm156_vm0, %v195_v31  ;;  %v199_v45 = vpack.c.bf16 %v80_v32, %v80_v32  ;;  %158 = vst.msk [vmem:[%s388_s3 + $0x4] sm:$0xf] %vm156_vm0, %v196_v38  ;;  %v202_v50 = vpack.c.bf16 %v83_v41, %v83_v41  ;;  %v46_v51 = vmul.f32 %v237_v1, %v23_v35 }
   0xc   :  { %159 = vst.msk [vmem:[%s388_s3 + $0x8] sm:$0xf] %vm156_vm0, %v197_v39  ;;  %160 = vst.msk [vmem:[%s388_s3 + $0xc] sm:$0xf] %vm156_vm0, %v198_v40  ;;  %v47_v52 = vmul.f32 %v237_v1, %v24_v36  ;;  %v48_v53 = vmul.f32 %v237_v1, %v25_v37  ;;  %v68_v54 = vadd.f32 %v242_v2, %v45_v48 }
   0xd   :  { %161 = vst.msk [vmem:[%s388_s3 + $0x10] sm:$0xf] %vm156_vm0, %v199_v45  ;;  %162 = vst.msk [vmem:[%s388_s3 + $0x14] sm:$0xf] %vm156_vm0, %v200_v46  ;;  %v49_v55 = vmul.f32 %v237_v1, %v26_v42  ;;  %v50_v56 = vmul.f32 %v237_v1, %v27_v43  ;;  %v51_v57 = vmul.f32 %v237_v1, %v28_v44 }
   0xe   :  { %163 = vst.msk [vmem:[%s388_s3 + $0x18] sm:$0xf] %vm156_vm0, %v201_v47  ;;  %164 = vst.msk [vmem:[%s388_s3 + $0x1c] sm:$0xf] %vm156_vm0, %v202_v50  ;;  %v69_v58 = vadd.f32 %v242_v2, %v46_v51  ;;  %v70_v59 = vadd.f32 %v242_v2, %v47_v52  ;;  %v71_v60 = vadd.f32 %v242_v2, %v48_v53  ;;  %v84_v62 = vmax.f32 %v68_v54, 0.0 }
   0xf   :  { %v52_v61 = vmul.f32 %v237_v1, %v29_v49  ;;  %v72_v63 = vadd.f32 %v242_v2, %v49_v55  ;;  %v73_v0 = vadd.f32 %v242_v2, %v50_v56  ;;  %v74_v3 = vadd.f32 %v242_v2, %v51_v57 }
  0x10   :  { %v85_v4 = vmax.f32 %v69_v58, 0.0  ;;  %v86_v5 = vmax.f32 %v70_v59, 0.0  ;;  %v87_v6 = vmax.f32 %v71_v60, 0.0  ;;  %v203_v8 = vpack.c.bf16 %v84_v62, %v84_v62 }
  0x11   :  { %v75_v7 = vadd.f32 %v242_v2, %v52_v61  ;;  %v88_v9 = vmax.f32 %v72_v63, 0.0  ;;  %v89_v10 = vmax.f32 %v73_v0, 0.0  ;;  %v90_v11 = vmax.f32 %v74_v3, 0.0 }
  0x12   :  { %v204_v12 = vpack.c.bf16 %v85_v4, %v85_v4  ;;  %v205_v13 = vpack.c.bf16 %v86_v5, %v86_v5  ;;  %v206_v14 = vpack.c.bf16 %v87_v6, %v87_v6  ;;  %165 = vst.msk [vmem:[%s388_s3 + $0x20] sm:$0xf] %vm156_vm0, %v203_v8 }
  0x13   :  { %v91_v1 = vmax.f32 %v75_v7, 0.0  ;;  %v207_v15 = vpack.c.bf16 %v88_v9, %v88_v9  ;;  %v208_v16 = vpack.c.bf16 %v89_v10, %v89_v10  ;;  %v209_v17 = vpack.c.bf16 %v90_v11, %v90_v11 }
  0x14   :  { %166 = vst.msk [vmem:[%s388_s3 + $0x24] sm:$0xf] %vm156_vm0, %v204_v12  ;;  %167 = vst.msk [vmem:[%s388_s3 + $0x28] sm:$0xf] %vm156_vm0, %v205_v13 }
  0x15   :  { %168 = vst.msk [vmem:[%s388_s3 + $0x2c] sm:$0xf] %vm156_vm0, %v206_v14  ;;  %v210_v2 = vpack.c.bf16 %v91_v1, %v91_v1  ;;  %169 = vst.msk [vmem:[%s388_s3 + $0x30] sm:$0xf] %vm156_vm0, %v207_v15 }
  0x16   :  { %170 = vst.msk [vmem:[%s388_s3 + $0x34] sm:$0xf] %vm156_vm0, %v208_v16  ;;  %171 = vst.msk [vmem:[%s388_s3 + $0x38] sm:$0xf] %vm156_vm0, %v209_v17 }
  0x17   :  { %172 = vst.msk [vmem:[%s388_s3 + $0x3c] sm:$0xf] %vm156_vm0, %v210_v2 }

// kernel: resnet_generator_pallas.30
= control target key start
LH: loop header
LB: loop body
LE: loop exit
PB: predicated region body
PF: predicated region fallthrough
CT: control target
= control target key end

     0   :  { %vm60_vm0 = vcmask 519168   ;;  %s129_s0 = inlined_call_operand.vmem [shape: f32[32,64], index: 0, kind: input, shape index: {}]   ;;  %s130_s1 = inlined_call_operand.vmem [shape: f32[1,64], index: 1, kind: input, shape index: {}]   ;;  %s131_s2 = inlined_call_operand.vmem [shape: f32[1,64], index: 2, kind: input, shape index: {}]   ;;  %s132_s3 = inlined_call_operand.vmem [shape: bf16[32,64], index: 3, kind: output, shape index: {}]  }
   0x1   :  { %v14_v0 = vld [vmem:[%s129_s0] sm:$0xff]  ;;  %v15_v4 = vld [vmem:[%s129_s0 + $0x8] sm:$0xff]  ;;  %v16_v5 = vld [vmem:[%s129_s0 + $0x10] sm:$0xff] }
   0x2   :  { %v69_v1 = vld [vmem:[%s130_s1] ss:$0 sm:$0xff]  ;;  %v17_v6 = vld [vmem:[%s129_s0 + $0x18] sm:$0xff] }
   0x3   :  { %v70_v2 = vld [vmem:[%s131_s2] ss:$0 sm:$0xff]  ;;  %v25_v3 = vmul.f32 %v69_v1, %v14_v0  ;;  %v26_v7 = vmul.f32 %v69_v1, %v15_v4  ;;  %v27_v8 = vmul.f32 %v69_v1, %v16_v5  ;;  %v28_v9 = vmul.f32 %v69_v1, %v17_v6 }
   0x5   :  { %v36_v10 = vadd.f32 %v70_v2, %v25_v3  ;;  %v37_v11 = vadd.f32 %v70_v2, %v26_v7  ;;  %v38_v12 = vadd.f32 %v70_v2, %v27_v8  ;;  %v39_v13 = vadd.f32 %v70_v2, %v28_v9 }
   0x7   :  { %v40_v14 = vmax.f32 %v36_v10, 0.0  ;;  %v41_v15 = vmax.f32 %v37_v11, 0.0  ;;  %v42_v16 = vmax.f32 %v38_v12, 0.0  ;;  %v43_v17 = vmax.f32 %v39_v13, 0.0 }
   0x9   :  { %v75_v18 = vpack.c.bf16 %v40_v14, %v40_v14  ;;  %v76_v19 = vpack.c.bf16 %v41_v15, %v41_v15  ;;  %v77_v20 = vpack.c.bf16 %v42_v16, %v42_v16  ;;  %v78_v21 = vpack.c.bf16 %v43_v17, %v43_v17 }
   0xb   :  { %61 = vst.msk [vmem:[%s132_s3] sm:$0xf] %vm60_vm0, %v75_v18  ;;  %62 = vst.msk [vmem:[%s132_s3 + $0x4] sm:$0xf] %vm60_vm0, %v76_v19 }
   0xc   :  { %63 = vst.msk [vmem:[%s132_s3 + $0x8] sm:$0xf] %vm60_vm0, %v77_v20  ;;  %64 = vst.msk [vmem:[%s132_s3 + $0xc] sm:$0xf] %vm60_vm0, %v78_v21 }

// kernel: resnet_generator_pallas.29
= control target key start
LH: loop header
LB: loop body
LE: loop exit
PB: predicated region body
PF: predicated region fallthrough
CT: control target
= control target key end

     0   :  { %vm243_vm0 = vcmask 261120   ;;  %vm58_vm1 = vcmask 516096   ;;  %v530_v24 = vmov 0.0   ;;  %vm348_vm2 = vcmask 523264   ;;  %s664_s1 = inlined_call_operand.vmem [shape: bf16[288,64], index: 1, kind: input, shape index: {}]   ;;  %s665_s0 = inlined_call_operand.vmem [shape: bf16[32,288], index: 0, kind: input, shape index: {}]   ;;  %s666_s2 = inlined_call_operand.vmem [shape: f32[32,64], index: 2, kind: output, shape index: {0}]   ;;  %s667_s3 = inlined_call_operand.vmem [shape: f32[1,1,64], index: 3, kind: output, shape index: {1}]   ;;  %s668_s4 = inlined_call_operand.vmem [shape: f32[1,1,64], index: 4, kind: output, shape index: {2}]  }
   0x1   :  { %v504_v0 = vld [vmem:[%s664_s1 + $0x40] sm:$0xff]   ;;  %v506_v2 = vld [vmem:[%s664_s1 + $0x48] sm:$0xff]   ;;  %v508_v4 = vld [vmem:[%s664_s1 + $0x50] sm:$0xff]   ;;  %59 = vst.msk [vmem:[#allocation2] sm:$0x1] %vm58_vm1, %v530_v24 }
   0x2   :  { %v505_v1 = vld [vmem:[%s664_s1] sm:$0xff]   ;;  %463 = vmatprep.subr.bf16.mxu0 %v504_v0  ;;  %v507_v3 = vld [vmem:[%s664_s1 + $0x8] sm:$0xff]   ;;  %v509_v5 = vld [vmem:[%s664_s1 + $0x10] sm:$0xff]   ;;  %60 = vst.msk [vmem:[#allocation3] sm:$0x1] %vm58_vm1, %v530_v24 }
   0x3   :  { %464 = vmatpush3.bf16.msra.mxu0 %v505_v1  ;;  %v510_v6 = vld [vmem:[%s664_s1 + $0x58] sm:$0xff]   ;;  %v512_v8 = vld [vmem:[%s664_s1 + $0x60] sm:$0xff]   ;;  %v514_v11 = vld [vmem:[%s664_s1 + $0x68] sm:$0xff]  }
   0x4   :  { %465 = vmatprep.subr.bf16.mxu0 %v506_v2  ;;  %v511_v7 = vld [vmem:[%s664_s1 + $0x18] sm:$0xff]   ;;  %v518_v9 = vld [vmem:[%s664_s1 + $0x80] sm:$0xff]   ;;  %v515_v12 = vld [vmem:[%s664_s1 + $0x28] sm:$0xff]  }
   0x5   :  { %v513_v10 = vld [vmem:[%s664_s1 + $0x20] sm:$0xff]   ;;  %495 = vmatprep.subr.bf16.mxu1 %v518_v9  ;;  %v521_v13 = vld [vmem:[%s664_s1 + $0x88] sm:$0xff]   ;;  %v516_v14 = vld [vmem:[%s664_s1 + $0x70] sm:$0xff]  }
   0x6   :  { %496 = vmatpush3.bf16.msra.mxu1 %v518_v9  ;;  %v524_v15 = vld [vmem:[%s665_s0 + $0x4] ss:$12 sps:$4 sm:$0xff]   ;;  %v525_v16 = vld [vmem:[%s665_s0 + $0x8] ss:$12 sps:$4 sm:$0xff]   ;;  %v526_v17 = vld [vmem:[%s665_s0 + $0x20] ss:$12 sps:$4 sm:$0xff]  }
   0x7   :  { %466 = vmatpush3.bf16.msra.mxu0 %v507_v3  ;;  %497 = vmatprep.subr.bf16.mxu1 %v521_v13  ;;  %v517_v18 = vld [vmem:[%s664_s1 + $0x30] sm:$0xff]   ;;  %v519_v19 = vld [vmem:[%s664_s1 + $0x78] sm:$0xff]   ;;  %v522_v21 = vld [vmem:[%s665_s0] ss:$12 sps:$4 sm:$0xff]  }
   0x8   :  { %467 = vmatprep.subr.bf16.mxu0 %v508_v4  ;;  %282 = vmatprep.mubr.bf16.mxu0 %v524_v15  ;;  %v520_v20 = vld [vmem:[%s664_s1 + $0x38] sm:$0xff]  }
   0x9   :  { %499 = vmatprep.mubr.msk.bf16.mxu1 %vm243_vm0, %v525_v16  ;;  %v527_v22 = vld [vmem:[%s665_s0 + $0x1c] ss:$12 sps:$4 sm:$0xff]   ;;  %v529_v23 = vld [vmem:[%s665_s0 + $0x18] ss:$12 sps:$4 sm:$0xff]  }
   0xa   :  { %498 = vmatpush3.bf16.msra.mxu1 %v521_v13 }
   0xb   :  { %468 = vmatpush3.bf16.msra.mxu0 %v509_v5 }
   0xc   :  { %469 = vmatprep.subr.bf16.mxu0 %v510_v6 }
   0xd   :  { %500 = vmatmul.mubr.msk.bf16.vlgmr.msra.gmra.mrb[0].mxu1 %vm243_vm0, %v526_v17 }
   0xf   :  { %470 = vmatpush3.bf16.msra.mxu0 %v511_v7 }
  0x10   :  { %471 = vmatprep.subr.bf16.mxu0 %v512_v8  ;;  %v353_v8 = vld [vmem:[#allocation2] sm:$0x1] }
  0x13   :  { %472 = vmatpush3.bf16.msra.mxu0 %v513_v10 }
  0x14   :  { %473 = vmatprep.subr.bf16.mxu0 %v514_v11  ;;  %v370_v11 = vld [vmem:[#allocation3] sm:$0x1] }
  0x17   :  { %474 = vmatpush3.bf16.msra.mxu0 %v515_v12 }
  0x18   :  { %475 = vmatprep.subr.bf16.mxu0 %v516_v14 }
  0x1b   :  { %476 = vmatpush3.bf16.msra.mxu0 %v517_v18 }
  0x1c   :  { %477 = vmatprep.subr.bf16.mxu0 %v519_v19 }
  0x1f   :  { %478 = vmatpush3.bf16.msra.mxu0 %v520_v20 }
  0x22   :  { %283 = vmatmul.mubr.bf16.vlgmr.msra.gmra.mrb[0].mxu0 %v522_v21 }
  0x23   :  { %290 = vmatprep.mubr.bf16.mxu0 %v527_v22 }
  0x2a   :  { %291 = vmatmul.mubr.bf16.gmra.mrb[4].mxu0 %v529_v23 }
  0xe0   :  { %v501_v25 = vpop.f32.mrb[0].mxu1 }
  0xe1   :  { %v333_v26 = vpop.f32.mrb[1].mxu1 }
  0xe2   :  { %v502_v27 = vpop.f32.mrb[2].mxu1 }
  0xe3   :  { %v336_v28 = vpop.f32.mrb[3].mxu1 }
  0xf5   :  { %v479_v29 = vpop.f32.mrb[0].mxu0 }
  0xf6   :  { %v480_v30 = vpop.f32.mrb[1].mxu0 }
  0xf7   :  { %v481_v31 = vadd.f32 %v480_v30, %v479_v29  ;;  %v482_v32 = vpop.f32.mrb[2].mxu0 }
  0xf8   :  { %v483_v33 = vpop.f32.mrb[3].mxu0 }
  0xf9   :  { %v484_v34 = vadd.f32 %v483_v33, %v482_v32  ;;  %v334_v35 = vadd.f32 %v481_v31, %v333_v26 }
  0xfb   :  { %349 = vst.msk [vmem:[%s666_s2] sm:$0xff] %vm348_vm2, %v334_v35  ;;  %v371_v36 = vmul.f32 %v334_v35, %v334_v35  ;;  %v337_v37 = vadd.f32 %v484_v34, %v336_v28  ;;  %v354_v38 = vsel %vm348_vm2, %v334_v35, 0.0 }
  0xfd   :  { %350 = vst.msk [vmem:[%s666_s2 + $0x8] sm:$0xff] %vm348_vm2, %v337_v37  ;;  %v355_v39 = vsel %vm348_vm2, %v337_v37, 0.0  ;;  %v372_v40 = vmul.f32 %v337_v37, %v337_v37  ;;  %v485_v41 = vpop.f32.mrb[4].mxu0  ;;  %v375_v44 = vsel %vm348_vm2, %v371_v36, 0.0 }
  0xfe   :  { %v356_v42 = vadd.f32 %v355_v39, %v354_v38  ;;  %v486_v43 = vpop.f32.mrb[5].mxu0 }
  0xff   :  { %v376_v45 = vsel %vm348_vm2, %v372_v40, 0.0  ;;  %v487_v46 = vadd.f32 %v486_v43, %v485_v41  ;;  %v488_v47 = vpop.f32.mrb[6].mxu0 }
 0x100   :  { %v377_v48 = vadd.f32 %v376_v45, %v375_v44  ;;  %v489_v49 = vpop.f32.mrb[7].mxu0 }
 0x101   :  { %v342_v50 = vadd.f32 %v501_v25, %v487_v46  ;;  %v490_v51 = vadd.f32 %v489_v49, %v488_v47 }
 0x103   :  { %351 = vst.msk [vmem:[%s666_s2 + $0x10] sm:$0xff] %vm348_vm2, %v342_v50  ;;  %v357_v52 = vsel %vm348_vm2, %v342_v50, 0.0  ;;  %v373_v53 = vmul.f32 %v342_v50, %v342_v50  ;;  %v345_v54 = vadd.f32 %v502_v27, %v490_v51 }
 0x104   :  { %v358_v55 = vadd.f32 %v357_v52, %v356_v42 }
 0x105   :  { %v378_v56 = vsel %vm348_vm2, %v373_v53, 0.0  ;;  %352 = vst.msk [vmem:[%s666_s2 + $0x18] sm:$0xff] %vm348_vm2, %v345_v54  ;;  %v359_v57 = vsel %vm348_vm2, %v345_v54, 0.0  ;;  %v374_v58 = vmul.f32 %v345_v54, %v345_v54 }
 0x106   :  { %v379_v59 = vadd.f32 %v378_v56, %v377_v48  ;;  %v360_v60 = vadd.f32 %v359_v57, %v358_v55 }
 0x107   :  { %v380_v61 = vsel %vm348_vm2, %v374_v58, 0.0 }
 0x108   :  { %v361_v62 = vrot.slane %v360_v60, 4  ;;  %v381_v63 = vadd.f32 %v380_v61, %v379_v59 }
 0x10a   :  { %v362_v0 = vadd.f32 %v361_v62, %v360_v60  ;;  %v382_v1 = vrot.slane %v381_v63, 4 }
 0x10c   :  { %v363_v2 = vrot.slane %v362_v0, 2  ;;  %v383_v3 = vadd.f32 %v382_v1, %v381_v63 }
 0x10e   :  { %v364_v4 = vadd.f32 %v363_v2, %v362_v0  ;;  %v384_v5 = vrot.slane %v383_v3, 2 }
 0x110   :  { %v365_v6 = vrot.slane %v364_v4, 1  ;;  %v385_v7 = vadd.f32 %v384_v5, %v383_v3 }
 0x112   :  { %v366_v9 = vadd.f32 %v365_v6, %v364_v4  ;;  %v386_v10 = vrot.slane %v385_v7, 1 }
 0x114   :  { %v367_v12 = vadd.f32 %v366_v9, %v353_v8  ;;  %v387_v13 = vadd.f32 %v386_v10, %v385_v7 }
 0x116   :  { %369 = vst.msk [vmem:[#allocation2] sm:$0x1] %vm58_vm1, %v367_v12  ;;  %v388_v14 = vadd.f32 %v387_v13, %v370_v11 }
 0x118   :  { %389 = vst.msk [vmem:[#allocation3] sm:$0x1] %vm58_vm1, %v388_v14 }
 0x11d   :  { %v393_v15 = vld [vmem:[#allocation2] sm:$0x1] }
 0x11e   :  { %394 = vst.msk [vmem:[%s667_s3] sm:$0x1] %vm58_vm1, %v393_v15 }
 0x11f   :  { %v395_v16 = vld [vmem:[#allocation3] sm:$0x1] }
 0x120   :  { %396 = vst.msk [vmem:[%s668_s4] sm:$0x1] %vm58_vm1, %v395_v16 }

// kernel: resnet_generator_pallas.34
= control target key start
LH: loop header
LB: loop body
LE: loop exit
PB: predicated region body
PF: predicated region fallthrough
CT: control target
= control target key end

     0   :  { %vm71_vm0 = vcmask 519168   ;;  %s160_s0 = inlined_call_operand.vmem [shape: f32[32,64], index: 0, kind: input, shape index: {}]   ;;  %s161_s1 = inlined_call_operand.vmem [shape: f32[1,64], index: 1, kind: input, shape index: {}]   ;;  %s162_s2 = inlined_call_operand.vmem [shape: f32[1,64], index: 2, kind: input, shape index: {}]   ;;  %s163_s3 = inlined_call_operand.vmem [shape: bf16[32,64], index: 3, kind: input, shape index: {}]   ;;  %s164_s4 = inlined_call_operand.vmem [shape: bf16[32,64], index: 4, kind: output, shape index: {}]  }
   0x1   :  { %v17_v0 = vld [vmem:[%s160_s0] sm:$0xff]  ;;  %v18_v5 = vld [vmem:[%s160_s0 + $0x8] sm:$0xff]  ;;  %v19_v6 = vld [vmem:[%s160_s0 + $0x10] sm:$0xff] }
   0x2   :  { %v80_v1 = vld [vmem:[%s161_s1] ss:$0 sm:$0xff]  ;;  %v98_v11 = vld [vmem:[%s163_s3 + $0x8] sm:$0xff]   ;;  %v20_v12 = vld [vmem:[%s160_s0 + $0x18] sm:$0xff] }
   0x3   :  { %v81_v2 = vld [vmem:[%s162_s2] ss:$0 sm:$0xff]  ;;  %v28_v3 = vmul.f32 %v80_v1, %v17_v0  ;;  %v29_v8 = vmul.f32 %v80_v1, %v18_v5  ;;  %v30_v10 = vmul.f32 %v80_v1, %v19_v6  ;;  %v96_v14 = vunpack.c.l.bf16 %v98_v11 }
   0x4   :  { %v91_v4 = vld [vmem:[%s163_s3] sm:$0xff]   ;;  %v31_v15 = vmul.f32 %v80_v1, %v20_v12  ;;  %v97_v16 = vunpack.c.h.bf16 %v98_v11 }
   0x5   :  { %v92_v7 = vunpack.c.l.bf16 %v91_v4  ;;  %v93_v9 = vunpack.c.h.bf16 %v91_v4  ;;  %v39_v13 = vadd.f32 %v81_v2, %v28_v3  ;;  %v40_v17 = vadd.f32 %v81_v2, %v29_v8 }
   0x6   :  { %v41_v18 = vadd.f32 %v81_v2, %v30_v10  ;;  %v42_v20 = vadd.f32 %v81_v2, %v31_v15 }
   0x7   :  { %v51_v19 = vadd.f32 %v92_v7, %v39_v13  ;;  %v52_v21 = vadd.f32 %v93_v9, %v40_v17 }
   0x8   :  { %v53_v22 = vadd.f32 %v96_v14, %v41_v18  ;;  %v54_v24 = vadd.f32 %v97_v16, %v42_v20 }
   0x9   :  { %v86_v23 = vpack.c.bf16 %v51_v19, %v51_v19  ;;  %v87_v25 = vpack.c.bf16 %v52_v21, %v52_v21 }
   0xa   :  { %v88_v26 = vpack.c.bf16 %v53_v22, %v53_v22  ;;  %v89_v27 = vpack.c.bf16 %v54_v24, %v54_v24 }
   0xb   :  { %72 = vst.msk [vmem:[%s164_s4] sm:$0xf] %vm71_vm0, %v86_v23  ;;  %73 = vst.msk [vmem:[%s164_s4 + $0x4] sm:$0xf] %vm71_vm0, %v87_v25 }
   0xc   :  { %74 = vst.msk [vmem:[%s164_s4 + $0x8] sm:$0xf] %vm71_vm0, %v88_v26  ;;  %75 = vst.msk [vmem:[%s164_s4 + $0xc] sm:$0xf] %vm71_vm0, %v89_v27 }

// kernel: resnet_generator_pallas.31
= control target key start
LH: loop header
LB: loop body
LE: loop exit
PB: predicated region body
PF: predicated region fallthrough
CT: control target
= control target key end

     0   :  { %vm411_vm0 = vcmask 523264   ;;  %vm58_vm1 = vcmask 516096   ;;  %v826_v46 = vmov 0.0   ;;  %s1028_s1 = inlined_call_operand.vmem [shape: bf16[576,64], index: 1, kind: input, shape index: {}]   ;;  %s1029_s0 = inlined_call_operand.vmem [shape: bf16[32,576], index: 0, kind: input, shape index: {}]   ;;  %s1030_s2 = inlined_call_operand.vmem [shape: f32[32,64], index: 2, kind: output, shape index: {0}]   ;;  %s1031_s3 = inlined_call_operand.vmem [shape: f32[1,1,64], index: 3, kind: output, shape index: {1}]   ;;  %s1032_s4 = inlined_call_operand.vmem [shape: f32[1,1,64], index: 4, kind: output, shape index: {2}]  }
   0x1   :  { %v776_v0 = vld [vmem:[%s1028_s1 + $0x40] sm:$0xff]   ;;  %v780_v4 = vld [vmem:[%s1028_s1 + $0x48] sm:$0xff]   ;;  %v784_v8 = vld [vmem:[%s1028_s1 + $0x50] sm:$0xff]   ;;  %59 = vst.msk [vmem:[#allocation2] sm:$0x1] %vm58_vm1, %v826_v46 }
   0x2   :  { %v777_v1 = vld [vmem:[%s1028_s1 + $0xc0] sm:$0xff]   ;;  %701 = vmatprep.subr.bf16.mxu0 %v776_v0  ;;  %v781_v5 = vld [vmem:[%s1028_s1 + $0xc8] sm:$0xff]   ;;  %v785_v9 = vld [vmem:[%s1028_s1 + $0xd0] sm:$0xff]   ;;  %60 = vst.msk [vmem:[#allocation3] sm:$0x1] %vm58_vm1, %v826_v46 }
   0x3   :  { %v778_v2 = vld [vmem:[%s1028_s1] sm:$0xff]   ;;  %729 = vmatprep.subr.bf16.mxu1 %v777_v1  ;;  %v782_v6 = vld [vmem:[%s1028_s1 + $0x8] sm:$0xff]   ;;  %v786_v10 = vld [vmem:[%s1028_s1 + $0x10] sm:$0xff]  }
   0x4   :  { %v779_v3 = vld [vmem:[%s1028_s1 + $0x80] sm:$0xff]   ;;  %702 = vmatpush3.bf16.msra.mxu0 %v778_v2  ;;  %v783_v7 = vld [vmem:[%s1028_s1 + $0x88] sm:$0xff]   ;;  %v787_v11 = vld [vmem:[%s1028_s1 + $0x90] sm:$0xff]  }
   0x5   :  { %730 = vmatpush3.bf16.msra.mxu1 %v779_v3  ;;  %703 = vmatprep.subr.bf16.mxu0 %v780_v4  ;;  %v788_v12 = vld [vmem:[%s1028_s1 + $0x58] sm:$0xff]   ;;  %v792_v16 = vld [vmem:[%s1028_s1 + $0x60] sm:$0xff]   ;;  %v796_v20 = vld [vmem:[%s1028_s1 + $0x68] sm:$0xff]  }
   0x6   :  { %731 = vmatprep.subr.bf16.mxu1 %v781_v5  ;;  %v789_v13 = vld [vmem:[%s1028_s1 + $0xd8] sm:$0xff]   ;;  %v793_v17 = vld [vmem:[%s1028_s1 + $0xe0] sm:$0xff]   ;;  %v797_v21 = vld [vmem:[%s1028_s1 + $0xe8] sm:$0xff]  }
   0x7   :  { %v790_v14 = vld [vmem:[%s1028_s1 + $0x18] sm:$0xff]   ;;  %v794_v18 = vld [vmem:[%s1028_s1 + $0x20] sm:$0xff]   ;;  %v798_v22 = vld [vmem:[%s1028_s1 + $0x28] sm:$0xff]  }
   0x8   :  { %704 = vmatpush3.bf16.msra.mxu0 %v782_v6  ;;  %v791_v15 = vld [vmem:[%s1028_s1 + $0x98] sm:$0xff]   ;;  %v795_v19 = vld [vmem:[%s1028_s1 + $0xa0] sm:$0xff]   ;;  %v799_v23 = vld [vmem:[%s1028_s1 + $0xa8] sm:$0xff]  }
   0x9   :  { %732 = vmatpush3.bf16.msra.mxu1 %v783_v7  ;;  %705 = vmatprep.subr.bf16.mxu0 %v784_v8  ;;  %v800_v24 = vld [vmem:[%s1028_s1 + $0x70] sm:$0xff]   ;;  %v804_v28 = vld [vmem:[%s1028_s1 + $0x78] sm:$0xff]   ;;  %v813_v35 = vld [vmem:[%s1029_s0 + $0xc] ss:$20 sps:$4 sm:$0xff]  }
   0xa   :  { %733 = vmatprep.subr.bf16.mxu1 %v785_v9  ;;  %v801_v25 = vld [vmem:[%s1028_s1 + $0xf0] sm:$0xff]   ;;  %v805_v29 = vld [vmem:[%s1028_s1 + $0xf8] sm:$0xff]   ;;  %v814_v36 = vld [vmem:[%s1028_s1 + $0x100] sm:$0xff]   ;;  %499 = vmatprep.mubr.bf16.mxu1 %v813_v35 }
   0xb   :  { %v802_v26 = vld [vmem:[%s1028_s1 + $0x30] sm:$0xff]   ;;  %v806_v30 = vld [vmem:[%s1028_s1 + $0x38] sm:$0xff]   ;;  %v815_v37 = vld [vmem:[%s1028_s1 + $0x108] sm:$0xff]  }
   0xc   :  { %706 = vmatpush3.bf16.msra.mxu0 %v786_v10  ;;  %v803_v27 = vld [vmem:[%s1028_s1 + $0xb0] sm:$0xff]   ;;  %v807_v31 = vld [vmem:[%s1028_s1 + $0xb8] sm:$0xff]   ;;  %v816_v38 = vld [vmem:[%s1029_s0 + $0x2c] ss:$20 sps:$4 sm:$0xff]  }
   0xd   :  { %734 = vmatpush3.bf16.msra.mxu1 %v787_v11  ;;  %707 = vmatprep.subr.bf16.mxu0 %v788_v12  ;;  %v808_v32 = vld [vmem:[%s1029_s0] ss:$20 sps:$4 sm:$0xff]   ;;  %v810_v33 = vld [vmem:[%s1029_s0 + $0x4] ss:$20 sps:$4 sm:$0xff]   ;;  %v811_v34 = vld [vmem:[%s1029_s0 + $0x8] ss:$20 sps:$4 sm:$0xff]  }
   0xe   :  { %735 = vmatprep.subr.bf16.mxu1 %v789_v13  ;;  %450 = vmatprep.mubr.bf16.mxu0 %v810_v33  ;;  %v818_v39 = vld [vmem:[%s1029_s0 + $0x34] ss:$20 sps:$4 sm:$0xff]   ;;  %v821_v42 = vld [vmem:[%s1029_s0 + $0x30] ss:$20 sps:$4 sm:$0xff]   ;;  %v823_v44 = vld [vmem:[%s1028_s1 + $0x118] sm:$0xff]  }
   0xf   :  { %v820_v40 = vld [vmem:[%s1029_s0 + $0x28] ss:$20 sps:$4 sm:$0xff]   ;;  %v822_v41 = vld [vmem:[%s1028_s1 + $0x110] sm:$0xff]   ;;  %v825_v45 = vld [vmem:[%s1029_s0 + $0x38] ss:$20 sps:$4 sm:$0xff]  }
  0x10   :  { %708 = vmatpush3.bf16.msra.mxu0 %v790_v14  ;;  %v824_v43 = vld [vmem:[%s1029_s0 + $0x10] ss:$20 sps:$4 sm:$0xff]   ;;  %v569_v46 = vld [vmem:[#allocation2] sm:$0x1] }
  0x11   :  { %736 = vmatpush3.bf16.msra.mxu1 %v791_v15  ;;  %709 = vmatprep.subr.bf16.mxu0 %v792_v16 }
  0x12   :  { %737 = vmatprep.subr.bf16.mxu1 %v793_v17 }
  0x14   :  { %710 = vmatpush3.bf16.msra.mxu0 %v794_v18 }
  0x15   :  { %738 = vmatpush3.bf16.msra.mxu1 %v795_v19  ;;  %711 = vmatprep.subr.bf16.mxu0 %v796_v20 }
  0x16   :  { %739 = vmatprep.subr.bf16.mxu1 %v797_v21 }
  0x18   :  { %712 = vmatpush3.bf16.msra.mxu0 %v798_v22 }
  0x19   :  { %740 = vmatpush3.bf16.msra.mxu1 %v799_v23  ;;  %713 = vmatprep.subr.bf16.mxu0 %v800_v24 }
  0x1a   :  { %741 = vmatprep.subr.bf16.mxu1 %v801_v25 }
  0x1c   :  { %714 = vmatpush3.bf16.msra.mxu0 %v802_v26 }
  0x1d   :  { %742 = vmatpush3.bf16.msra.mxu1 %v803_v27  ;;  %715 = vmatprep.subr.bf16.mxu0 %v804_v28 }
  0x1e   :  { %743 = vmatprep.subr.bf16.mxu1 %v805_v29 }
  0x20   :  { %716 = vmatpush3.bf16.msra.mxu0 %v806_v30 }
  0x21   :  { %744 = vmatpush3.bf16.msra.mxu1 %v807_v31  ;;  %763 = vmatprep.subr.bf16.mxu0 %v814_v36 }
  0x23   :  { %451 = vmatmul.mubr.bf16.vlgmr.msra.gmra.mrb[0].mxu0 %v808_v32 }
  0x24   :  { %500 = vmatmul.mubr.bf16.vlgmr.msra.gmra.mrb[0].mxu1 %v811_v34  ;;  %764 = vmatpush3.bf16.msra.mxu0 %v814_v36 }
  0x25   :  { %765 = vmatprep.subr.bf16.mxu0 %v815_v37  ;;  %458 = vmatprep.mubr.bf16.mxu0 %v816_v38 }
  0x26   :  { %507 = vmatprep.mubr.bf16.mxu1 %v818_v39 }
  0x28   :  { %766 = vmatpush3.bf16.msra.mxu0 %v815_v37 }
  0x29   :  { %767 = vmatprep.subr.bf16.mxu0 %v822_v41 }
  0x2b   :  { %459 = vmatmul.mubr.bf16.gmra.mrb[4].mxu0 %v820_v40 }
  0x2c   :  { %508 = vmatmul.mubr.bf16.gmra.mrb[4].mxu1 %v821_v42  ;;  %771 = vmatprep.mubr.msk.bf16.mxu0 %vm411_vm0, %v824_v43 }
  0x2d   :  { %768 = vmatpush3.bf16.msra.mxu0 %v822_v41 }
  0x2e   :  { %769 = vmatprep.subr.bf16.mxu0 %v823_v44 }
  0x31   :  { %770 = vmatpush3.bf16.msra.mxu0 %v823_v44 }
  0x34   :  { %772 = vmatmul.mubr.msk.bf16.vlgmr.msra.gmra.mrb[8].mxu0 %vm411_vm0, %v825_v45 }
  0xf6   :  { %v717_v47 = vpop.f32.mrb[0].mxu0 }
  0xf7   :  { %v745_v48 = vpop.f32.mrb[0].mxu1  ;;  %v718_v49 = vpop.f32.mrb[1].mxu0 }
  0xf8   :  { %v719_v50 = vadd.f32 %v718_v49, %v717_v47  ;;  %v746_v51 = vpop.f32.mrb[1].mxu1  ;;  %v720_v52 = vpop.f32.mrb[2].mxu0  ;;  %v586_v49 = vld [vmem:[#allocation3] sm:$0x1] }
  0xf9   :  { %v747_v53 = vadd.f32 %v746_v51, %v745_v48  ;;  %v748_v54 = vpop.f32.mrb[2].mxu1  ;;  %v721_v55 = vpop.f32.mrb[3].mxu0 }
  0xfa   :  { %v722_v56 = vadd.f32 %v721_v55, %v720_v52  ;;  %v749_v57 = vpop.f32.mrb[3].mxu1 }
  0xfb   :  { %v750_v58 = vadd.f32 %v749_v57, %v748_v54  ;;  %v502_v59 = vadd.f32 %v747_v53, %v719_v50 }
  0xfd   :  { %v505_v60 = vadd.f32 %v750_v58, %v722_v56 }
  0xfe   :  { %v723_v61 = vpop.f32.mrb[4].mxu0 }
  0xff   :  { %v751_v62 = vpop.f32.mrb[4].mxu1  ;;  %v724_v63 = vpop.f32.mrb[5].mxu0 }
 0x100   :  { %v725_v0 = vadd.f32 %v724_v63, %v723_v61  ;;  %v752_v1 = vpop.f32.mrb[5].mxu1  ;;  %v726_v2 = vpop.f32.mrb[6].mxu0 }
 0x101   :  { %v753_v3 = vadd.f32 %v752_v1, %v751_v62  ;;  %v754_v4 = vpop.f32.mrb[6].mxu1  ;;  %v727_v5 = vpop.f32.mrb[7].mxu0 }
 0x102   :  { %v728_v6 = vadd.f32 %v727_v5, %v726_v2  ;;  %v755_v7 = vpop.f32.mrb[7].mxu1 }
 0x103   :  { %v756_v8 = vadd.f32 %v755_v7, %v754_v4  ;;  %v510_v9 = vadd.f32 %v753_v3, %v725_v0 }
 0x105   :  { %v513_v10 = vadd.f32 %v756_v8, %v728_v6 }
 0x107   :  { %v773_v11 = vpop.f32.mrb[8].mxu0 }
 0x108   :  { %v559_v12 = vadd.f32 %v773_v11, %v510_v9  ;;  %v550_v13 = vpop.f32.mrb[9].mxu0 }
 0x109   :  { %v551_v14 = vadd.f32 %v550_v13, %v502_v59  ;;  %v774_v15 = vpop.f32.mrb[10].mxu0 }
 0x10a   :  { %567 = vst.msk [vmem:[%s1030_s2 + $0x10] sm:$0xff] %vm411_vm0, %v559_v12  ;;  %v562_v16 = vadd.f32 %v774_v15, %v513_v10  ;;  %v553_v17 = vpop.f32.mrb[11].mxu0  ;;  %v589_v20 = vmul.f32 %v559_v12, %v559_v12  ;;  %v573_v25 = vsel %vm411_vm0, %v559_v12, 0.0 }
 0x10b   :  { %565 = vst.msk [vmem:[%s1030_s2] sm:$0xff] %vm411_vm0, %v551_v14  ;;  %v587_v18 = vmul.f32 %v551_v14, %v551_v14  ;;  %v554_v19 = vadd.f32 %v553_v17, %v505_v60  ;;  %v570_v21 = vsel %vm411_vm0, %v551_v14, 0.0 }
 0x10c   :  { %568 = vst.msk [vmem:[%s1030_s2 + $0x18] sm:$0xff] %vm411_vm0, %v562_v16  ;;  %v590_v27 = vmul.f32 %v562_v16, %v562_v16  ;;  %v594_v31 = vsel %vm411_vm0, %v589_v20, 0.0  ;;  %v575_v32 = vsel %vm411_vm0, %v562_v16, 0.0 }
 0x10d   :  { %566 = vst.msk [vmem:[%s1030_s2 + $0x8] sm:$0xff] %vm411_vm0, %v554_v19  ;;  %v571_v22 = vsel %vm411_vm0, %v554_v19, 0.0  ;;  %v588_v23 = vmul.f32 %v554_v19, %v554_v19  ;;  %v591_v26 = vsel %vm411_vm0, %v587_v18, 0.0 }
 0x10e   :  { %v572_v24 = vadd.f32 %v571_v22, %v570_v21  ;;  %v596_v35 = vsel %vm411_vm0, %v590_v27, 0.0 }
 0x10f   :  { %v592_v28 = vsel %vm411_vm0, %v588_v23, 0.0 }
 0x110   :  { %v574_v29 = vadd.f32 %v573_v25, %v572_v24  ;;  %v593_v30 = vadd.f32 %v592_v28, %v591_v26 }
 0x112   :  { %v576_v33 = vadd.f32 %v575_v32, %v574_v29  ;;  %v595_v34 = vadd.f32 %v594_v31, %v593_v30 }
 0x114   :  { %v577_v36 = vrot.slane %v576_v33, 4  ;;  %v597_v37 = vadd.f32 %v596_v35, %v595_v34 }
 0x116   :  { %v578_v38 = vadd.f32 %v577_v36, %v576_v33  ;;  %v598_v39 = vrot.slane %v597_v37, 4 }
 0x118   :  { %v579_v40 = vrot.slane %v578_v38, 2  ;;  %v599_v41 = vadd.f32 %v598_v39, %v597_v37 }
 0x11a   :  { %v580_v42 = vadd.f32 %v579_v40, %v578_v38  ;;  %v600_v43 = vrot.slane %v599_v41, 2 }
 0x11c   :  { %v581_v44 = vrot.slane %v580_v42, 1  ;;  %v601_v45 = vadd.f32 %v600_v43, %v599_v41 }
 0x11e   :  { %v582_v47 = vadd.f32 %v581_v44, %v580_v42  ;;  %v602_v48 = vrot.slane %v601_v45, 1 }
 0x120   :  { %v583_v50 = vadd.f32 %v582_v47, %v569_v46  ;;  %v603_v51 = vadd.f32 %v602_v48, %v601_v45 }
 0x122   :  { %585 = vst.msk [vmem:[#allocation2] sm:$0x1] %vm58_vm1, %v583_v50  ;;  %v604_v52 = vadd.f32 %v603_v51, %v586_v49 }
 0x124   :  { %605 = vst.msk [vmem:[#allocation3] sm:$0x1] %vm58_vm1, %v604_v52 }
 0x129   :  { %v609_v53 = vld [vmem:[#allocation2] sm:$0x1] }
 0x12a   :  { %610 = vst.msk [vmem:[%s1031_s3] sm:$0x1] %vm58_vm1, %v609_v53 }
 0x12b   :  { %v611_v54 = vld [vmem:[#allocation3] sm:$0x1] }
 0x12c   :  { %612 = vst.msk [vmem:[%s1032_s4] sm:$0x1] %vm58_vm1, %v611_v54 }

// kernel: resnet_generator_pallas.42
= control target key start
LH: loop header
LB: loop body
LE: loop exit
PB: predicated region body
PF: predicated region fallthrough
CT: control target
= control target key end

     0   :  { %vm58_vm0 = vcmask 253952   ;;  %v438_v20 = vmov 0.0   ;;  %vm262_vm1 = vcmask 261120   ;;  %s560_s1 = inlined_call_operand.vmem [shape: bf16[256,32], index: 1, kind: input, shape index: {}]   ;;  %s561_s0 = inlined_call_operand.vmem [shape: bf16[32,256], index: 0, kind: input, shape index: {}]   ;;  %s562_s2 = inlined_call_operand.vmem [shape: f32[32,32], index: 2, kind: output, shape index: {0}]   ;;  %s563_s3 = inlined_call_operand.vmem [shape: f32[1,1,32], index: 3, kind: output, shape index: {1}]   ;;  %s564_s4 = inlined_call_operand.vmem [shape: f32[1,1,32], index: 4, kind: output, shape index: {2}]  }
   0x1   :  { %v416_v0 = vld [vmem:[%s560_s1 + $0x40] sm:$0xff]   ;;  %v418_v2 = vld [vmem:[%s560_s1 + $0x48] sm:$0xff]   ;;  %v420_v4 = vld [vmem:[%s560_s1 + $0x50] sm:$0xff]   ;;  %59 = vst.msk [vmem:[#allocation2] sm:$0x1] %vm58_vm0, %v438_v20 }
   0x2   :  { %v417_v1 = vld [vmem:[%s560_s1] sm:$0xff]   ;;  %371 = vmatprep.subr.bf16.mxu0 %v416_v0  ;;  %399 = vmatprep.subr.bf16.mxu1 %v416_v0  ;;  %v419_v3 = vld [vmem:[%s560_s1 + $0x8] sm:$0xff]   ;;  %v421_v5 = vld [vmem:[%s560_s1 + $0x10] sm:$0xff]   ;;  %60 = vst.msk [vmem:[#allocation3] sm:$0x1] %vm58_vm0, %v438_v20 }
   0x3   :  { %372 = vmatpush3.bf16.msra.mxu0 %v417_v1  ;;  %407 = vmatpush3.bf16.msra.mxu1 %v417_v1  ;;  %v422_v6 = vld [vmem:[%s560_s1 + $0x58] sm:$0xff]   ;;  %v424_v8 = vld [vmem:[%s560_s1 + $0x60] sm:$0xff]   ;;  %v426_v10 = vld [vmem:[%s560_s1 + $0x68] sm:$0xff]  }
   0x4   :  { %373 = vmatprep.subr.bf16.mxu0 %v418_v2  ;;  %400 = vmatprep.subr.bf16.mxu1 %v418_v2  ;;  %v423_v7 = vld [vmem:[%s560_s1 + $0x18] sm:$0xff]   ;;  %v425_v9 = vld [vmem:[%s560_s1 + $0x20] sm:$0xff]   ;;  %v427_v13 = vld [vmem:[%s560_s1 + $0x28] sm:$0xff]  }
   0x5   :  { %v434_v11 = vld [vmem:[%s561_s0 + $0x4] ss:$8 sps:$4 sm:$0xff]   ;;  %v437_v12 = vld [vmem:[%s561_s0 + $0x14] ss:$8 sps:$4 sm:$0xff]   ;;  %v432_v18 = vld [vmem:[%s561_s0] ss:$8 sps:$4 sm:$0xff]  }
   0x6   :  { %v428_v14 = vld [vmem:[%s560_s1 + $0x70] sm:$0xff]   ;;  %245 = vmatprep.mubr.bf16.mxu0 %v434_v11  ;;  %253 = vmatprep.mubr.bf16.mxu1 %v437_v12  ;;  %v430_v16 = vld [vmem:[%s560_s1 + $0x78] sm:$0xff]  }
   0x7   :  { %374 = vmatpush3.bf16.msra.mxu0 %v419_v3  ;;  %408 = vmatpush3.bf16.msra.mxu1 %v419_v3  ;;  %v429_v15 = vld [vmem:[%s560_s1 + $0x30] sm:$0xff]   ;;  %v431_v17 = vld [vmem:[%s560_s1 + $0x38] sm:$0xff]  }
   0x8   :  { %375 = vmatprep.subr.bf16.mxu0 %v420_v4  ;;  %401 = vmatprep.subr.bf16.mxu1 %v420_v4  ;;  %v435_v19 = vld [vmem:[%s561_s0 + $0x10] ss:$8 sps:$4 sm:$0xff]   ;;  %v267_v60 = vld [vmem:[#allocation2] sm:$0x1] }
   0x9   :  { %v284_v63 = vld [vmem:[#allocation3] sm:$0x1] }
   0xb   :  { %376 = vmatpush3.bf16.msra.mxu0 %v421_v5  ;;  %409 = vmatpush3.bf16.msra.mxu1 %v421_v5 }
   0xc   :  { %377 = vmatprep.subr.bf16.mxu0 %v422_v6  ;;  %402 = vmatprep.subr.bf16.mxu1 %v422_v6 }
   0xf   :  { %378 = vmatpush3.bf16.msra.mxu0 %v423_v7  ;;  %410 = vmatpush3.bf16.msra.mxu1 %v423_v7 }
  0x10   :  { %379 = vmatprep.subr.bf16.mxu0 %v424_v8  ;;  %403 = vmatprep.subr.bf16.mxu1 %v424_v8 }
  0x13   :  { %380 = vmatpush3.bf16.msra.mxu0 %v425_v9  ;;  %411 = vmatpush3.bf16.msra.mxu1 %v425_v9 }
  0x14   :  { %381 = vmatprep.subr.bf16.mxu0 %v426_v10  ;;  %404 = vmatprep.subr.bf16.mxu1 %v426_v10 }
  0x17   :  { %382 = vmatpush3.bf16.msra.mxu0 %v427_v13  ;;  %412 = vmatpush3.bf16.msra.mxu1 %v427_v13 }
  0x18   :  { %383 = vmatprep.subr.bf16.mxu0 %v428_v14  ;;  %405 = vmatprep.subr.bf16.mxu1 %v428_v14 }
  0x1b   :  { %384 = vmatpush3.bf16.msra.mxu0 %v429_v15  ;;  %413 = vmatpush3.bf16.msra.mxu1 %v429_v15 }
  0x1c   :  { %385 = vmatprep.subr.bf16.mxu0 %v430_v16  ;;  %406 = vmatprep.subr.bf16.mxu1 %v430_v16 }
  0x1f   :  { %386 = vmatpush3.bf16.msra.mxu0 %v431_v17  ;;  %414 = vmatpush3.bf16.msra.mxu1 %v431_v17 }
  0x22   :  { %246 = vmatmul.mubr.bf16.vlgmr.msra.gmra.mrb[0].mxu0 %v432_v18  ;;  %254 = vmatmul.mubr.bf16.vlgmr.msra.gmra.mrb[0].mxu1 %v435_v19 }
  0xf5   :  { %v387_v21 = vpop.f32.mrb[0].mxu0  ;;  %v393_v22 = vpop.f32.mrb[0].mxu1 }
  0xf6   :  { %v388_v23 = vpop.f32.mrb[1].mxu0  ;;  %v394_v24 = vpop.f32.mrb[1].mxu1 }
  0xf7   :  { %v389_v25 = vadd.f32 %v388_v23, %v387_v21  ;;  %v390_v26 = vpop.f32.mrb[2].mxu0  ;;  %v395_v27 = vadd.f32 %v394_v24, %v393_v22  ;;  %v396_v28 = vpop.f32.mrb[2].mxu1 }
  0xf8   :  { %v391_v29 = vpop.f32.mrb[3].mxu0  ;;  %v397_v30 = vpop.f32.mrb[3].mxu1 }
  0xf9   :  { %263 = vst.msk [vmem:[%s562_s2] sm:$0xff] %vm262_vm1, %v389_v25  ;;  %265 = vst.msk [vmem:[%s562_s2 + $0x10] sm:$0xff] %vm262_vm1, %v395_v27  ;;  %v285_v31 = vmul.f32 %v389_v25, %v389_v25  ;;  %v287_v32 = vmul.f32 %v395_v27, %v395_v27  ;;  %v392_v33 = vadd.f32 %v391_v29, %v390_v26  ;;  %v268_v35 = vsel %vm262_vm1, %v389_v25, 0.0 }
  0xfa   :  { %v398_v34 = vadd.f32 %v397_v30, %v396_v28  ;;  %v271_v36 = vsel %vm262_vm1, %v395_v27, 0.0 }
  0xfb   :  { %264 = vst.msk [vmem:[%s562_s2 + $0x8] sm:$0xff] %vm262_vm1, %v392_v33  ;;  %v269_v37 = vsel %vm262_vm1, %v392_v33, 0.0  ;;  %v286_v38 = vmul.f32 %v392_v33, %v392_v33  ;;  %v289_v40 = vsel %vm262_vm1, %v285_v31, 0.0  ;;  %v292_v41 = vsel %vm262_vm1, %v287_v32, 0.0 }
  0xfc   :  { %266 = vst.msk [vmem:[%s562_s2 + $0x18] sm:$0xff] %vm262_vm1, %v398_v34  ;;  %v270_v39 = vadd.f32 %v269_v37, %v268_v35  ;;  %v288_v43 = vmul.f32 %v398_v34, %v398_v34  ;;  %v273_v46 = vsel %vm262_vm1, %v398_v34, 0.0 }
  0xfd   :  { %v290_v42 = vsel %vm262_vm1, %v286_v38, 0.0 }
  0xfe   :  { %v291_v44 = vadd.f32 %v290_v42, %v289_v40  ;;  %v272_v45 = vadd.f32 %v271_v36, %v270_v39  ;;  %v294_v49 = vsel %vm262_vm1, %v288_v43, 0.0 }
 0x100   :  { %v274_v47 = vadd.f32 %v273_v46, %v272_v45  ;;  %v293_v48 = vadd.f32 %v292_v41, %v291_v44 }
 0x102   :  { %v275_v50 = vrot.slane %v274_v47, 4  ;;  %v295_v51 = vadd.f32 %v294_v49, %v293_v48 }
 0x104   :  { %v276_v52 = vadd.f32 %v275_v50, %v274_v47  ;;  %v296_v53 = vrot.slane %v295_v51, 4 }
 0x106   :  { %v277_v54 = vrot.slane %v276_v52, 2  ;;  %v297_v55 = vadd.f32 %v296_v53, %v295_v51 }
 0x108   :  { %v278_v56 = vadd.f32 %v277_v54, %v276_v52  ;;  %v298_v57 = vrot.slane %v297_v55, 2 }
 0x10a   :  { %v279_v58 = vrot.slane %v278_v56, 1  ;;  %v299_v59 = vadd.f32 %v298_v57, %v297_v55 }
 0x10c   :  { %v280_v61 = vadd.f32 %v279_v58, %v278_v56  ;;  %v300_v62 = vrot.slane %v299_v59, 1 }
 0x10e   :  { %v281_v0 = vadd.f32 %v280_v61, %v267_v60  ;;  %v301_v1 = vadd.f32 %v300_v62, %v299_v59 }
 0x110   :  { %283 = vst.msk [vmem:[#allocation2] sm:$0x1] %vm58_vm0, %v281_v0  ;;  %v302_v2 = vadd.f32 %v301_v1, %v284_v63 }
 0x112   :  { %303 = vst.msk [vmem:[#allocation3] sm:$0x1] %vm58_vm0, %v302_v2 }
 0x117   :  { %v307_v3 = vld [vmem:[#allocation2] sm:$0x1] }
 0x118   :  { %308 = vst.msk [vmem:[%s563_s3] sm:$0x1] %vm58_vm0, %v307_v3 }
 0x119   :  { %v309_v4 = vld [vmem:[#allocation3] sm:$0x1] }
 0x11a   :  { %310 = vst.msk [vmem:[%s564_s4] sm:$0x1] %vm58_vm0, %v309_v4 }

// kernel: resnet_generator_pallas.39
= control target key start
LH: loop header
LB: loop body
LE: loop exit
PB: predicated region body
PF: predicated region fallthrough
CT: control target
= control target key end

     0   :  { %vm104_vm0 = vcmask 523264   ;;  %vm55_vm1 = vcmask 253952   ;;  %v282_v6 = vmov 0.0   ;;  %vm160_vm2 = vcmask 261120   ;;  %s362_s1 = inlined_call_operand.vmem [shape: bf16[64,32], index: 1, kind: input, shape index: {}]   ;;  %s363_s0 = inlined_call_operand.vmem [shape: bf16[32,64], index: 0, kind: input, shape index: {}]   ;;  %s364_s2 = inlined_call_operand.vmem [shape: f32[32,32], index: 2, kind: output, shape index: {0}]   ;;  %s365_s3 = inlined_call_operand.vmem [shape: f32[1,1,32], index: 3, kind: output, shape index: {1}]   ;;  %s366_s4 = inlined_call_operand.vmem [shape: f32[1,1,32], index: 4, kind: output, shape index: {2}]  }
   0x1   :  { %v276_v0 = vld [vmem:[%s362_s1] sm:$0xff]   ;;  %v277_v1 = vld [vmem:[%s362_s1 + $0x8] sm:$0xff]   ;;  %v278_v2 = vld [vmem:[%s362_s1 + $0x10] sm:$0xff]   ;;  %56 = vst.msk [vmem:[#allocation2] sm:$0x1] %vm55_vm1, %v282_v6 }
   0x2   :  { %263 = vmatprep.subr.bf16.mxu0 %v276_v0  ;;  %v280_v3 = vld [vmem:[%s363_s0] sm:$0xff]   ;;  %v279_v4 = vld [vmem:[%s362_s1 + $0x18] sm:$0xff]   ;;  %v281_v5 = vld [vmem:[%s363_s0 + $0x8] sm:$0xff]   ;;  %57 = vst.msk [vmem:[#allocation3] sm:$0x1] %vm55_vm1, %v282_v6 }
   0x3   :  { %264 = vmatpush3.bf16.msra.mxu0 %v276_v0  ;;  %271 = vmatprep.mubr.msk.bf16.mxu0 %vm104_vm0, %v280_v3 }
   0x4   :  { %265 = vmatprep.subr.bf16.mxu0 %v277_v1 }
   0x7   :  { %266 = vmatpush3.bf16.msra.mxu0 %v277_v1 }
   0x8   :  { %267 = vmatprep.subr.bf16.mxu0 %v278_v2  ;;  %v165_v38 = vld [vmem:[#allocation2] sm:$0x1] }
   0x9   :  { %v182_v41 = vld [vmem:[#allocation3] sm:$0x1] }
   0xb   :  { %268 = vmatpush3.bf16.msra.mxu0 %v278_v2 }
   0xc   :  { %269 = vmatprep.subr.bf16.mxu0 %v279_v4 }
   0xf   :  { %270 = vmatpush3.bf16.msra.mxu0 %v279_v4 }
  0x12   :  { %272 = vmatmul.mubr.msk.bf16.vlgmr.msra.gmra.mrb[0].mxu0 %vm104_vm0, %v281_v5 }
  0xe5   :  { %v273_v7 = vpop.f32.mrb[0].mxu0 }
  0xe6   :  { %163 = vst.msk [vmem:[%s364_s2 + $0x10] sm:$0xff] %vm160_vm2, %v273_v7  ;;  %v145_v8 = vpop.f32.mrb[1].mxu0  ;;  %v185_v12 = vmul.f32 %v273_v7, %v273_v7  ;;  %v169_v17 = vsel %vm160_vm2, %v273_v7, 0.0 }
  0xe7   :  { %161 = vst.msk [vmem:[%s364_s2] sm:$0xff] %vm160_vm2, %v145_v8  ;;  %v183_v9 = vmul.f32 %v145_v8, %v145_v8  ;;  %v274_v10 = vpop.f32.mrb[2].mxu0  ;;  %v166_v13 = vsel %vm160_vm2, %v145_v8, 0.0 }
  0xe8   :  { %164 = vst.msk [vmem:[%s364_s2 + $0x18] sm:$0xff] %vm160_vm2, %v274_v10  ;;  %v148_v11 = vpop.f32.mrb[3].mxu0  ;;  %v186_v19 = vmul.f32 %v274_v10, %v274_v10  ;;  %v190_v23 = vsel %vm160_vm2, %v185_v12, 0.0  ;;  %v171_v24 = vsel %vm160_vm2, %v274_v10, 0.0 }
  0xe9   :  { %162 = vst.msk [vmem:[%s364_s2 + $0x8] sm:$0xff] %vm160_vm2, %v148_v11  ;;  %v167_v14 = vsel %vm160_vm2, %v148_v11, 0.0  ;;  %v184_v15 = vmul.f32 %v148_v11, %v148_v11  ;;  %v187_v18 = vsel %vm160_vm2, %v183_v9, 0.0 }
  0xea   :  { %v168_v16 = vadd.f32 %v167_v14, %v166_v13  ;;  %v192_v27 = vsel %vm160_vm2, %v186_v19, 0.0 }
  0xeb   :  { %v188_v20 = vsel %vm160_vm2, %v184_v15, 0.0 }
  0xec   :  { %v170_v21 = vadd.f32 %v169_v17, %v168_v16  ;;  %v189_v22 = vadd.f32 %v188_v20, %v187_v18 }
  0xee   :  { %v172_v25 = vadd.f32 %v171_v24, %v170_v21  ;;  %v191_v26 = vadd.f32 %v190_v23, %v189_v22 }
  0xf0   :  { %v173_v28 = vrot.slane %v172_v25, 4  ;;  %v193_v29 = vadd.f32 %v192_v27, %v191_v26 }
  0xf2   :  { %v174_v30 = vadd.f32 %v173_v28, %v172_v25  ;;  %v194_v31 = vrot.slane %v193_v29, 4 }
  0xf4   :  { %v175_v32 = vrot.slane %v174_v30, 2  ;;  %v195_v33 = vadd.f32 %v194_v31, %v193_v29 }
  0xf6   :  { %v176_v34 = vadd.f32 %v175_v32, %v174_v30  ;;  %v196_v35 = vrot.slane %v195_v33, 2 }
  0xf8   :  { %v177_v36 = vrot.slane %v176_v34, 1  ;;  %v197_v37 = vadd.f32 %v196_v35, %v195_v33 }
  0xfa   :  { %v178_v39 = vadd.f32 %v177_v36, %v176_v34  ;;  %v198_v40 = vrot.slane %v197_v37, 1 }
  0xfc   :  { %v179_v42 = vadd.f32 %v178_v39, %v165_v38  ;;  %v199_v43 = vadd.f32 %v198_v40, %v197_v37 }
  0xfe   :  { %181 = vst.msk [vmem:[#allocation2] sm:$0x1] %vm55_vm1, %v179_v42  ;;  %v200_v44 = vadd.f32 %v199_v43, %v182_v41 }
 0x100   :  { %201 = vst.msk [vmem:[#allocation3] sm:$0x1] %vm55_vm1, %v200_v44 }
 0x105   :  { %v205_v45 = vld [vmem:[#allocation2] sm:$0x1] }
 0x106   :  { %206 = vst.msk [vmem:[%s365_s3] sm:$0x1] %vm55_vm1, %v205_v45 }
 0x107   :  { %v207_v46 = vld [vmem:[#allocation3] sm:$0x1] }
 0x108   :  { %208 = vst.msk [vmem:[%s366_s4] sm:$0x1] %vm55_vm1, %v207_v46 }

// kernel: resnet_generator_pallas.41
= control target key start
LH: loop header
LB: loop body
LE: loop exit
PB: predicated region body
PF: predicated region fallthrough
CT: control target
= control target key end

     0   :  { %vm55_vm0 = vcmask 253952   ;;  %v327_v10 = vmov 0.0   ;;  %vm187_vm1 = vcmask 261120   ;;  %s419_s1 = inlined_call_operand.vmem [shape: bf16[128,32], index: 1, kind: input, shape index: {}]   ;;  %s420_s0 = inlined_call_operand.vmem [shape: bf16[32,128], index: 0, kind: input, shape index: {}]   ;;  %s421_s2 = inlined_call_operand.vmem [shape: f32[32,32], index: 2, kind: output, shape index: {0}]   ;;  %s422_s3 = inlined_call_operand.vmem [shape: f32[1,1,32], index: 3, kind: output, shape index: {1}]   ;;  %s423_s4 = inlined_call_operand.vmem [shape: f32[1,1,32], index: 4, kind: output, shape index: {2}]  }
   0x1   :  { %v317_v0 = vld [vmem:[%s419_s1] sm:$0xff]   ;;  %v318_v1 = vld [vmem:[%s419_s1 + $0x8] sm:$0xff]   ;;  %v319_v2 = vld [vmem:[%s419_s1 + $0x10] sm:$0xff]   ;;  %56 = vst.msk [vmem:[#allocation2] sm:$0x1] %vm55_vm0, %v327_v10 }
   0x2   :  { %296 = vmatprep.subr.bf16.mxu0 %v317_v0  ;;  %v320_v3 = vld [vmem:[%s419_s1 + $0x18] sm:$0xff]   ;;  %v325_v4 = vld [vmem:[%s420_s0] sm:$0xff]   ;;  %v322_v6 = vld [vmem:[%s419_s1 + $0x28] sm:$0xff]   ;;  %57 = vst.msk [vmem:[#allocation3] sm:$0x1] %vm55_vm0, %v327_v10 }
   0x3   :  { %297 = vmatpush3.bf16.msra.mxu0 %v317_v0  ;;  %312 = vmatprep.mubr.bf16.mxu0 %v325_v4  ;;  %v321_v5 = vld [vmem:[%s419_s1 + $0x20] sm:$0xff]   ;;  %v323_v7 = vld [vmem:[%s419_s1 + $0x30] sm:$0xff]   ;;  %v324_v8 = vld [vmem:[%s419_s1 + $0x38] sm:$0xff]  }
   0x4   :  { %298 = vmatprep.subr.bf16.mxu0 %v318_v1  ;;  %v326_v9 = vld [vmem:[%s420_s0 + $0x8] sm:$0xff]  }
   0x7   :  { %299 = vmatpush3.bf16.msra.mxu0 %v318_v1 }
   0x8   :  { %300 = vmatprep.subr.bf16.mxu0 %v319_v2  ;;  %v192_v42 = vld [vmem:[#allocation2] sm:$0x1] }
   0x9   :  { %v209_v45 = vld [vmem:[#allocation3] sm:$0x1] }
   0xb   :  { %301 = vmatpush3.bf16.msra.mxu0 %v319_v2 }
   0xc   :  { %302 = vmatprep.subr.bf16.mxu0 %v320_v3 }
   0xf   :  { %303 = vmatpush3.bf16.msra.mxu0 %v320_v3 }
  0x10   :  { %304 = vmatprep.subr.bf16.mxu0 %v321_v5 }
  0x13   :  { %305 = vmatpush3.bf16.msra.mxu0 %v321_v5 }
  0x14   :  { %306 = vmatprep.subr.bf16.mxu0 %v322_v6 }
  0x17   :  { %307 = vmatpush3.bf16.msra.mxu0 %v322_v6 }
  0x18   :  { %308 = vmatprep.subr.bf16.mxu0 %v323_v7 }
  0x1b   :  { %309 = vmatpush3.bf16.msra.mxu0 %v323_v7 }
  0x1c   :  { %310 = vmatprep.subr.bf16.mxu0 %v324_v8 }
  0x1f   :  { %311 = vmatpush3.bf16.msra.mxu0 %v324_v8 }
  0x22   :  { %313 = vmatmul.mubr.bf16.vlgmr.msra.gmra.mrb[0].mxu0 %v326_v9 }
  0xf5   :  { %v314_v11 = vpop.f32.mrb[0].mxu0 }
  0xf6   :  { %190 = vst.msk [vmem:[%s421_s2 + $0x10] sm:$0xff] %vm187_vm1, %v314_v11  ;;  %v172_v12 = vpop.f32.mrb[1].mxu0  ;;  %v212_v16 = vmul.f32 %v314_v11, %v314_v11  ;;  %v196_v21 = vsel %vm187_vm1, %v314_v11, 0.0 }
  0xf7   :  { %188 = vst.msk [vmem:[%s421_s2] sm:$0xff] %vm187_vm1, %v172_v12  ;;  %v210_v13 = vmul.f32 %v172_v12, %v172_v12  ;;  %v315_v14 = vpop.f32.mrb[2].mxu0  ;;  %v193_v17 = vsel %vm187_vm1, %v172_v12, 0.0 }
  0xf8   :  { %191 = vst.msk [vmem:[%s421_s2 + $0x18] sm:$0xff] %vm187_vm1, %v315_v14  ;;  %v175_v15 = vpop.f32.mrb[3].mxu0  ;;  %v213_v23 = vmul.f32 %v315_v14, %v315_v14  ;;  %v217_v27 = vsel %vm187_vm1, %v212_v16, 0.0  ;;  %v198_v28 = vsel %vm187_vm1, %v315_v14, 0.0 }
  0xf9   :  { %189 = vst.msk [vmem:[%s421_s2 + $0x8] sm:$0xff] %vm187_vm1, %v175_v15  ;;  %v194_v18 = vsel %vm187_vm1, %v175_v15, 0.0  ;;  %v211_v19 = vmul.f32 %v175_v15, %v175_v15  ;;  %v214_v22 = vsel %vm187_vm1, %v210_v13, 0.0 }
  0xfa   :  { %v195_v20 = vadd.f32 %v194_v18, %v193_v17  ;;  %v219_v31 = vsel %vm187_vm1, %v213_v23, 0.0 }
  0xfb   :  { %v215_v24 = vsel %vm187_vm1, %v211_v19, 0.0 }
  0xfc   :  { %v197_v25 = vadd.f32 %v196_v21, %v195_v20  ;;  %v216_v26 = vadd.f32 %v215_v24, %v214_v22 }
  0xfe   :  { %v199_v29 = vadd.f32 %v198_v28, %v197_v25  ;;  %v218_v30 = vadd.f32 %v217_v27, %v216_v26 }
 0x100   :  { %v200_v32 = vrot.slane %v199_v29, 4  ;;  %v220_v33 = vadd.f32 %v219_v31, %v218_v30 }
 0x102   :  { %v201_v34 = vadd.f32 %v200_v32, %v199_v29  ;;  %v221_v35 = vrot.slane %v220_v33, 4 }
 0x104   :  { %v202_v36 = vrot.slane %v201_v34, 2  ;;  %v222_v37 = vadd.f32 %v221_v35, %v220_v33 }
 0x106   :  { %v203_v38 = vadd.f32 %v202_v36, %v201_v34  ;;  %v223_v39 = vrot.slane %v222_v37, 2 }
 0x108   :  { %v204_v40 = vrot.slane %v203_v38, 1  ;;  %v224_v41 = vadd.f32 %v223_v39, %v222_v37 }
 0x10a   :  { %v205_v43 = vadd.f32 %v204_v40, %v203_v38  ;;  %v225_v44 = vrot.slane %v224_v41, 1 }
 0x10c   :  { %v206_v46 = vadd.f32 %v205_v43, %v192_v42  ;;  %v226_v47 = vadd.f32 %v225_v44, %v224_v41 }
 0x10e   :  { %208 = vst.msk [vmem:[#allocation2] sm:$0x1] %vm55_vm0, %v206_v46  ;;  %v227_v48 = vadd.f32 %v226_v47, %v209_v45 }
 0x110   :  { %228 = vst.msk [vmem:[#allocation3] sm:$0x1] %vm55_vm0, %v227_v48 }
 0x115   :  { %v232_v49 = vld [vmem:[#allocation2] sm:$0x1] }
 0x116   :  { %233 = vst.msk [vmem:[%s422_s3] sm:$0x1] %vm55_vm0, %v232_v49 }
 0x117   :  { %v234_v50 = vld [vmem:[#allocation3] sm:$0x1] }
 0x118   :  { %235 = vst.msk [vmem:[%s423_s4] sm:$0x1] %vm55_vm0, %v234_v50 }

// kernel: resnet_generator_pallas.46
= control target key start
LH: loop header
LB: loop body
LE: loop exit
PB: predicated region body
PF: predicated region fallthrough
CT: control target
= control target key end

     0   :  { %vm146_vm0 = vcmask 523264   ;;  %vm55_vm1 = vcmask 122880   ;;  %v506_v12 = vmov 0.0   ;;  %vm268_vm2 = vcmask 130048   ;;  %s702_s1 = inlined_call_operand.vmem [shape: bf16[64,16], index: 1, kind: input, shape index: {}]   ;;  %s703_s0 = inlined_call_operand.vmem [shape: bf16[128,64], index: 0, kind: input, shape index: {}]   ;;  %s704_s2 = inlined_call_operand.vmem [shape: f32[128,16], index: 2, kind: output, shape index: {0}]   ;;  %s705_s3 = inlined_call_operand.vmem [shape: f32[1,1,16], index: 3, kind: output, shape index: {1}]   ;;  %s706_s4 = inlined_call_operand.vmem [shape: f32[1,1,16], index: 4, kind: output, shape index: {2}]  }
   0x1   :  { %v494_v0 = vld [vmem:[%s702_s1] sm:$0xff]   ;;  %v495_v1 = vld [vmem:[%s702_s1 + $0x8] sm:$0xff]   ;;  %v496_v2 = vld [vmem:[%s702_s1 + $0x10] sm:$0xff]   ;;  %56 = vst.msk [vmem:[#allocation2] sm:$0x1] %vm55_vm1, %v506_v12 }
   0x2   :  { %461 = vmatprep.subr.bf16.mxu0 %v494_v0  ;;  %485 = vmatprep.subr.bf16.mxu1 %v494_v0  ;;  %v498_v3 = vld [vmem:[%s703_s0] sm:$0xff]   ;;  %v497_v4 = vld [vmem:[%s702_s1 + $0x18] sm:$0xff]   ;;  %v499_v6 = vld [vmem:[%s703_s0 + $0x8] sm:$0xff]   ;;  %57 = vst.msk [vmem:[#allocation3] sm:$0x1] %vm55_vm1, %v506_v12 }
   0x3   :  { %462 = vmatpush3.bf16.msra.mxu0 %v494_v0  ;;  %489 = vmatpush3.bf16.msra.mxu1 %v494_v0  ;;  %v502_v5 = vld [vmem:[%s703_s0 + $0x20] sm:$0xff]   ;;  %v503_v7 = vld [vmem:[%s703_s0 + $0x28] sm:$0xff]   ;;  %v500_v8 = vld [vmem:[%s703_s0 + $0x10] sm:$0xff]  }
   0x4   :  { %463 = vmatprep.subr.bf16.mxu0 %v495_v1  ;;  %486 = vmatprep.subr.bf16.mxu1 %v495_v1  ;;  %v504_v9 = vld [vmem:[%s703_s0 + $0x30] sm:$0xff]   ;;  %v501_v10 = vld [vmem:[%s703_s0 + $0x18] sm:$0xff]  }
   0x5   :  { %469 = vmatprep.mubr.msk.bf16.mxu0 %vm146_vm0, %v498_v3  ;;  %477 = vmatprep.mubr.msk.bf16.mxu1 %vm146_vm0, %v502_v5  ;;  %v505_v11 = vld [vmem:[%s703_s0 + $0x38] sm:$0xff]  }
   0x7   :  { %464 = vmatpush3.bf16.msra.mxu0 %v495_v1  ;;  %490 = vmatpush3.bf16.msra.mxu1 %v495_v1 }
   0x8   :  { %465 = vmatprep.subr.bf16.mxu0 %v496_v2  ;;  %487 = vmatprep.subr.bf16.mxu1 %v496_v2 }
   0xb   :  { %466 = vmatpush3.bf16.msra.mxu0 %v496_v2  ;;  %491 = vmatpush3.bf16.msra.mxu1 %v496_v2 }
   0xc   :  { %467 = vmatprep.subr.bf16.mxu0 %v497_v4  ;;  %488 = vmatprep.subr.bf16.mxu1 %v497_v4 }
   0xf   :  { %468 = vmatpush3.bf16.msra.mxu0 %v497_v4  ;;  %492 = vmatpush3.bf16.msra.mxu1 %v497_v4 }
  0x12   :  { %470 = vmatmul.mubr.msk.bf16.vlgmr.msra.gmra.mrb[0].mxu0 %vm146_vm0, %v499_v6  ;;  %478 = vmatmul.mubr.msk.bf16.vlgmr.msra.gmra.mrb[0].mxu1 %vm146_vm0, %v503_v7 }
  0x13   :  { %473 = vmatprep.mubr.msk.bf16.mxu0 %vm146_vm0, %v500_v8  ;;  %481 = vmatprep.mubr.msk.bf16.mxu1 %vm146_vm0, %v504_v9 }
  0x1a   :  { %474 = vmatmul.mubr.msk.bf16.gmra.mrb[4].mxu0 %vm146_vm0, %v501_v10  ;;  %482 = vmatmul.mubr.msk.bf16.gmra.mrb[4].mxu1 %vm146_vm0, %v505_v11 }
  0xe5   :  { %v471_v13 = vpop.f32.mrb[0].mxu0  ;;  %v578_v14 = vpop.f32.mrb[0].mxu1 }
  0xe6   :  { %271 = vst.msk [vmem:[%s704_s2 + $0x10] sm:$0xff] %vm268_vm2, %v471_v13  ;;  %v205_v15 = vpop.f32.mrb[1].mxu0  ;;  %279 = vst.msk [vmem:[%s704_s2 + $0x50] sm:$0xff] %vm268_vm2, %v578_v14  ;;  %v237_v16 = vpop.f32.mrb[1].mxu1  ;;  %v329_v22 = vmul.f32 %v471_v13, %v471_v13  ;;  %v289_v27 = vsel %vm268_vm2, %v471_v13, 0.0  ;;  %v337_v8 = vmul.f32 %v578_v14, %v578_v14  ;;  %v305_v12 = vsel %vm268_vm2, %v578_v14, 0.0 }
  0xe7   :  { %269 = vst.msk [vmem:[%s704_s2] sm:$0xff] %vm268_vm2, %v205_v15  ;;  %v327_v17 = vmul.f32 %v205_v15, %v205_v15  ;;  %v472_v18 = vpop.f32.mrb[2].mxu0  ;;  %277 = vst.msk [vmem:[%s704_s2 + $0x40] sm:$0xff] %vm268_vm2, %v237_v16  ;;  %v597_v19 = vpop.f32.mrb[2].mxu1  ;;  %v286_v23 = vsel %vm268_vm2, %v205_v15, 0.0  ;;  %v335_v59 = vmul.f32 %v237_v16, %v237_v16  ;;  %v301_v0 = vsel %vm268_vm2, %v237_v16, 0.0 }
  0xe8   :  { %272 = vst.msk [vmem:[%s704_s2 + $0x18] sm:$0xff] %vm268_vm2, %v472_v18  ;;  %v208_v20 = vpop.f32.mrb[3].mxu0  ;;  %280 = vst.msk [vmem:[%s704_s2 + $0x58] sm:$0xff] %vm268_vm2, %v597_v19  ;;  %v240_v21 = vpop.f32.mrb[3].mxu1  ;;  %v330_v29 = vmul.f32 %v472_v18, %v472_v18  ;;  %v346_v33 = vsel %vm268_vm2, %v329_v22, 0.0  ;;  %v291_v34 = vsel %vm268_vm2, %v472_v18, 0.0  ;;  %v338_v13 = vmul.f32 %v597_v19, %v597_v19 }
  0xe9   :  { %270 = vst.msk [vmem:[%s704_s2 + $0x8] sm:$0xff] %vm268_vm2, %v208_v20  ;;  %v287_v24 = vsel %vm268_vm2, %v208_v20, 0.0  ;;  %v328_v25 = vmul.f32 %v208_v20, %v208_v20  ;;  %278 = vst.msk [vmem:[%s704_s2 + $0x48] sm:$0xff] %vm268_vm2, %v240_v21  ;;  %v343_v28 = vsel %vm268_vm2, %v327_v17, 0.0  ;;  %v358_v4 = vsel %vm268_vm2, %v335_v59, 0.0 }
  0xea   :  { %v288_v26 = vadd.f32 %v287_v24, %v286_v23  ;;  %v348_v41 = vsel %vm268_vm2, %v330_v29, 0.0  ;;  %v336_v5 = vmul.f32 %v240_v21, %v240_v21  ;;  %v303_v9 = vsel %vm268_vm2, %v240_v21, 0.0 }
  0xeb   :  { %v344_v30 = vsel %vm268_vm2, %v328_v25, 0.0  ;;  %v362_v20 = vsel %vm268_vm2, %v337_v8, 0.0  ;;  %v307_v22 = vsel %vm268_vm2, %v597_v19, 0.0  ;;  %v364_v25 = vsel %vm268_vm2, %v338_v13, 0.0 }
  0xec   :  { %v290_v31 = vadd.f32 %v289_v27, %v288_v26  ;;  %v345_v32 = vadd.f32 %v344_v30, %v343_v28  ;;  %v360_v15 = vsel %vm268_vm2, %v336_v5, 0.0 }
  0xed   :  { %v475_v35 = vpop.f32.mrb[4].mxu0  ;;  %v623_v36 = vpop.f32.mrb[4].mxu1 }
  0xee   :  { %v347_v37 = vadd.f32 %v346_v33, %v345_v32  ;;  %275 = vst.msk [vmem:[%s704_s2 + $0x30] sm:$0xff] %vm268_vm2, %v475_v35  ;;  %v221_v38 = vpop.f32.mrb[5].mxu0  ;;  %v292_v39 = vadd.f32 %v291_v34, %v290_v31  ;;  %283 = vst.msk [vmem:[%s704_s2 + $0x70] sm:$0xff] %vm268_vm2, %v623_v36  ;;  %v253_v40 = vpop.f32.mrb[5].mxu1  ;;  %v333_v50 = vmul.f32 %v475_v35, %v475_v35  ;;  %v297_v56 = vsel %vm268_vm2, %v475_v35, 0.0 }
  0xef   :  { %273 = vst.msk [vmem:[%s704_s2 + $0x20] sm:$0xff] %vm268_vm2, %v221_v38  ;;  %v293_v42 = vsel %vm268_vm2, %v221_v38, 0.0  ;;  %v331_v43 = vmul.f32 %v221_v38, %v221_v38  ;;  %v476_v44 = vpop.f32.mrb[6].mxu0  ;;  %281 = vst.msk [vmem:[%s704_s2 + $0x60] sm:$0xff] %vm268_vm2, %v253_v40  ;;  %v484_v45 = vpop.f32.mrb[6].mxu1  ;;  %v339_v16 = vmul.f32 %v253_v40, %v253_v40  ;;  %v309_v21 = vsel %vm268_vm2, %v253_v40, 0.0 }
  0xf0   :  { %v294_v46 = vadd.f32 %v293_v42, %v292_v39  ;;  %v349_v47 = vadd.f32 %v348_v41, %v347_v37  ;;  %276 = vst.msk [vmem:[%s704_s2 + $0x38] sm:$0xff] %vm268_vm2, %v476_v44  ;;  %v224_v48 = vpop.f32.mrb[7].mxu0  ;;  %284 = vst.msk [vmem:[%s704_s2 + $0x78] sm:$0xff] %vm268_vm2, %v484_v45  ;;  %v256_v49 = vpop.f32.mrb[7].mxu1  ;;  %v334_v57 = vmul.f32 %v476_v44, %v476_v44  ;;  %v354_v62 = vsel %vm268_vm2, %v333_v50, 0.0 }
  0xf1   :  { %v350_v51 = vsel %vm268_vm2, %v331_v43, 0.0  ;;  %274 = vst.msk [vmem:[%s704_s2 + $0x28] sm:$0xff] %vm268_vm2, %v224_v48  ;;  %v295_v52 = vsel %vm268_vm2, %v224_v48, 0.0  ;;  %v332_v53 = vmul.f32 %v224_v48, %v224_v48  ;;  %282 = vst.msk [vmem:[%s704_s2 + $0x68] sm:$0xff] %vm268_vm2, %v256_v49  ;;  %v299_v63 = vsel %vm268_vm2, %v476_v44, 0.0 }
  0xf2   :  { %v351_v54 = vadd.f32 %v350_v51, %v349_v47  ;;  %v296_v55 = vadd.f32 %v295_v52, %v294_v46  ;;  %v356_v3 = vsel %vm268_vm2, %v334_v57, 0.0  ;;  %v366_v14 = vsel %vm268_vm2, %v339_v16, 0.0 }
  0xf3   :  { %v352_v58 = vsel %vm268_vm2, %v332_v53, 0.0  ;;  %v340_v26 = vmul.f32 %v256_v49, %v256_v49  ;;  %v341_v29 = vmul.f32 %v623_v36, %v623_v36  ;;  %v311_v30 = vsel %vm268_vm2, %v256_v49, 0.0  ;;  %v285_v53 = vld [vmem:[#allocation2] sm:$0x1] }
  0xf4   :  { %v298_v60 = vadd.f32 %v297_v56, %v296_v55  ;;  %v353_v61 = vadd.f32 %v352_v58, %v351_v54  ;;  %v313_v19 = vsel %vm268_vm2, %v623_v36, 0.0  ;;  %v342_v33 = vmul.f32 %v484_v45, %v484_v45  ;;  %v326_v56 = vld [vmem:[#allocation3] sm:$0x1] }
  0xf5   :  { %v368_v34 = vsel %vm268_vm2, %v340_v26, 0.0  ;;  %v370_v38 = vsel %vm268_vm2, %v341_v29, 0.0  ;;  %v315_v39 = vsel %vm268_vm2, %v484_v45, 0.0 }
  0xf6   :  { %v355_v1 = vadd.f32 %v354_v62, %v353_v61  ;;  %v300_v2 = vadd.f32 %v299_v63, %v298_v60  ;;  %v372_v42 = vsel %vm268_vm2, %v342_v33, 0.0 }
  0xf8   :  { %v302_v6 = vadd.f32 %v301_v0, %v300_v2  ;;  %v357_v7 = vadd.f32 %v356_v3, %v355_v1 }
  0xfa   :  { %v359_v10 = vadd.f32 %v358_v4, %v357_v7  ;;  %v304_v11 = vadd.f32 %v303_v9, %v302_v6 }
  0xfc   :  { %v306_v17 = vadd.f32 %v305_v12, %v304_v11  ;;  %v361_v18 = vadd.f32 %v360_v15, %v359_v10 }
  0xfe   :  { %v363_v23 = vadd.f32 %v362_v20, %v361_v18  ;;  %v308_v24 = vadd.f32 %v307_v22, %v306_v17 }
 0x100   :  { %v310_v27 = vadd.f32 %v309_v21, %v308_v24  ;;  %v365_v28 = vadd.f32 %v364_v25, %v363_v23 }
 0x102   :  { %v367_v31 = vadd.f32 %v366_v14, %v365_v28  ;;  %v312_v32 = vadd.f32 %v311_v30, %v310_v27 }
 0x104   :  { %v314_v35 = vadd.f32 %v313_v19, %v312_v32  ;;  %v369_v37 = vadd.f32 %v368_v34, %v367_v31 }
 0x106   :  { %v316_v40 = vadd.f32 %v315_v39, %v314_v35  ;;  %v371_v41 = vadd.f32 %v370_v38, %v369_v37 }
 0x108   :  { %v317_v43 = vrot.slane %v316_v40, 4  ;;  %v373_v44 = vadd.f32 %v372_v42, %v371_v41 }
 0x10a   :  { %v318_v46 = vadd.f32 %v317_v43, %v316_v40  ;;  %v374_v47 = vrot.slane %v373_v44, 4 }
 0x10c   :  { %v319_v48 = vrot.slane %v318_v46, 2  ;;  %v375_v49 = vadd.f32 %v374_v47, %v373_v44 }
 0x10e   :  { %v320_v36 = vadd.f32 %v319_v48, %v318_v46  ;;  %v376_v50 = vrot.slane %v375_v49, 2 }
 0x110   :  { %v321_v51 = vrot.slane %v320_v36, 1  ;;  %v377_v52 = vadd.f32 %v376_v50, %v375_v49 }
 0x112   :  { %v322_v54 = vadd.f32 %v321_v51, %v320_v36  ;;  %v378_v55 = vrot.slane %v377_v52, 1 }
 0x114   :  { %v323_v57 = vadd.f32 %v322_v54, %v285_v53  ;;  %v379_v45 = vadd.f32 %v378_v55, %v377_v52 }
 0x116   :  { %325 = vst.msk [vmem:[#allocation2] sm:$0x1] %vm55_vm1, %v323_v57  ;;  %v380_v58 = vadd.f32 %v379_v45, %v326_v56 }
 0x118   :  { %381 = vst.msk [vmem:[#allocation3] sm:$0x1] %vm55_vm1, %v380_v58 }
 0x11d   :  { %v385_v59 = vld [vmem:[#allocation2] sm:$0x1] }
 0x11e   :  { %386 = vst.msk [vmem:[%s705_s3] sm:$0x1] %vm55_vm1, %v385_v59 }
 0x11f   :  { %v387_v60 = vld [vmem:[#allocation3] sm:$0x1] }
 0x120   :  { %388 = vst.msk [vmem:[%s706_s4] sm:$0x1] %vm55_vm1, %v387_v60 }

// kernel: resnet_generator_pallas.47
= control target key start
LH: loop header
LB: loop body
LE: loop exit
PB: predicated region body
PF: predicated region fallthrough
CT: control target
= control target key end

     0   :  { %vm55_vm0 = vcmask 122880   ;;  %v541_v16 = vmov 0.0   ;;  %vm283_vm1 = vcmask 130048   ;;  %s741_s1 = inlined_call_operand.vmem [shape: bf16[128,16], index: 1, kind: input, shape index: {}]   ;;  %s742_s0 = inlined_call_operand.vmem [shape: bf16[128,128], index: 0, kind: input, shape index: {}]   ;;  %s743_s2 = inlined_call_operand.vmem [shape: f32[128,16], index: 2, kind: output, shape index: {0}]   ;;  %s744_s3 = inlined_call_operand.vmem [shape: f32[1,1,16], index: 3, kind: output, shape index: {1}]   ;;  %s745_s4 = inlined_call_operand.vmem [shape: f32[1,1,16], index: 4, kind: output, shape index: {2}]  }
   0x1   :  { %v525_v0 = vld [vmem:[%s741_s1] sm:$0xff]   ;;  %v526_v1 = vld [vmem:[%s741_s1 + $0x8] sm:$0xff]   ;;  %v527_v2 = vld [vmem:[%s741_s1 + $0x10] sm:$0xff]   ;;  %56 = vst.msk [vmem:[#allocation2] sm:$0x1] %vm55_vm0, %v541_v16 }
   0x2   :  { %476 = vmatprep.subr.bf16.mxu0 %v525_v0  ;;  %508 = vmatprep.subr.bf16.mxu1 %v525_v0  ;;  %v528_v3 = vld [vmem:[%s741_s1 + $0x18] sm:$0xff]   ;;  %v533_v4 = vld [vmem:[%s742_s0] sm:$0xff]   ;;  %v530_v7 = vld [vmem:[%s741_s1 + $0x28] sm:$0xff]   ;;  %57 = vst.msk [vmem:[#allocation3] sm:$0x1] %vm55_vm0, %v541_v16 }
   0x3   :  { %477 = vmatpush3.bf16.msra.mxu0 %v525_v0  ;;  %516 = vmatpush3.bf16.msra.mxu1 %v525_v0  ;;  %v529_v5 = vld [vmem:[%s741_s1 + $0x20] sm:$0xff]   ;;  %v531_v8 = vld [vmem:[%s741_s1 + $0x30] sm:$0xff]   ;;  %v532_v9 = vld [vmem:[%s741_s1 + $0x38] sm:$0xff]  }
   0x4   :  { %478 = vmatprep.subr.bf16.mxu0 %v526_v1  ;;  %509 = vmatprep.subr.bf16.mxu1 %v526_v1  ;;  %v537_v6 = vld [vmem:[%s742_s0 + $0x20] sm:$0xff]   ;;  %v534_v10 = vld [vmem:[%s742_s0 + $0x8] sm:$0xff]   ;;  %v535_v12 = vld [vmem:[%s742_s0 + $0x10] sm:$0xff]  }
   0x5   :  { %492 = vmatprep.mubr.bf16.mxu0 %v533_v4  ;;  %500 = vmatprep.mubr.bf16.mxu1 %v537_v6  ;;  %v538_v11 = vld [vmem:[%s742_s0 + $0x28] sm:$0xff]   ;;  %v539_v13 = vld [vmem:[%s742_s0 + $0x30] sm:$0xff]   ;;  %v536_v14 = vld [vmem:[%s742_s0 + $0x18] sm:$0xff]  }
   0x6   :  { %v540_v15 = vld [vmem:[%s742_s0 + $0x38] sm:$0xff]  }
   0x7   :  { %479 = vmatpush3.bf16.msra.mxu0 %v526_v1  ;;  %517 = vmatpush3.bf16.msra.mxu1 %v526_v1 }
   0x8   :  { %480 = vmatprep.subr.bf16.mxu0 %v527_v2  ;;  %510 = vmatprep.subr.bf16.mxu1 %v527_v2 }
   0xb   :  { %481 = vmatpush3.bf16.msra.mxu0 %v527_v2  ;;  %518 = vmatpush3.bf16.msra.mxu1 %v527_v2 }
   0xc   :  { %482 = vmatprep.subr.bf16.mxu0 %v528_v3  ;;  %511 = vmatprep.subr.bf16.mxu1 %v528_v3 }
   0xf   :  { %483 = vmatpush3.bf16.msra.mxu0 %v528_v3  ;;  %519 = vmatpush3.bf16.msra.mxu1 %v528_v3 }
  0x10   :  { %484 = vmatprep.subr.bf16.mxu0 %v529_v5  ;;  %512 = vmatprep.subr.bf16.mxu1 %v529_v5 }
  0x13   :  { %485 = vmatpush3.bf16.msra.mxu0 %v529_v5  ;;  %520 = vmatpush3.bf16.msra.mxu1 %v529_v5 }
  0x14   :  { %486 = vmatprep.subr.bf16.mxu0 %v530_v7  ;;  %513 = vmatprep.subr.bf16.mxu1 %v530_v7 }
  0x17   :  { %487 = vmatpush3.bf16.msra.mxu0 %v530_v7  ;;  %521 = vmatpush3.bf16.msra.mxu1 %v530_v7 }
  0x18   :  { %488 = vmatprep.subr.bf16.mxu0 %v531_v8  ;;  %514 = vmatprep.subr.bf16.mxu1 %v531_v8 }
  0x1b   :  { %489 = vmatpush3.bf16.msra.mxu0 %v531_v8  ;;  %522 = vmatpush3.bf16.msra.mxu1 %v531_v8 }
  0x1c   :  { %490 = vmatprep.subr.bf16.mxu0 %v532_v9  ;;  %515 = vmatprep.subr.bf16.mxu1 %v532_v9 }
  0x1f   :  { %491 = vmatpush3.bf16.msra.mxu0 %v532_v9  ;;  %523 = vmatpush3.bf16.msra.mxu1 %v532_v9 }
  0x22   :  { %493 = vmatmul.mubr.bf16.vlgmr.msra.gmra.mrb[0].mxu0 %v534_v10  ;;  %501 = vmatmul.mubr.bf16.vlgmr.msra.gmra.mrb[0].mxu1 %v538_v11 }
  0x23   :  { %496 = vmatprep.mubr.bf16.mxu0 %v535_v12  ;;  %504 = vmatprep.mubr.bf16.mxu1 %v539_v13 }
  0x2a   :  { %497 = vmatmul.mubr.bf16.gmra.mrb[4].mxu0 %v536_v14  ;;  %505 = vmatmul.mubr.bf16.gmra.mrb[4].mxu1 %v540_v15 }
  0xf5   :  { %v494_v17 = vpop.f32.mrb[0].mxu0  ;;  %v617_v18 = vpop.f32.mrb[0].mxu1 }
  0xf6   :  { %286 = vst.msk [vmem:[%s743_s2 + $0x10] sm:$0xff] %vm283_vm1, %v494_v17  ;;  %v220_v19 = vpop.f32.mrb[1].mxu0  ;;  %294 = vst.msk [vmem:[%s743_s2 + $0x50] sm:$0xff] %vm283_vm1, %v617_v18  ;;  %v252_v20 = vpop.f32.mrb[1].mxu1  ;;  %v344_v26 = vmul.f32 %v494_v17, %v494_v17  ;;  %v304_v31 = vsel %vm283_vm1, %v494_v17, 0.0  ;;  %v352_v12 = vmul.f32 %v617_v18, %v617_v18  ;;  %v320_v16 = vsel %vm283_vm1, %v617_v18, 0.0 }
  0xf7   :  { %284 = vst.msk [vmem:[%s743_s2] sm:$0xff] %vm283_vm1, %v220_v19  ;;  %v342_v21 = vmul.f32 %v220_v19, %v220_v19  ;;  %v495_v22 = vpop.f32.mrb[2].mxu0  ;;  %292 = vst.msk [vmem:[%s743_s2 + $0x40] sm:$0xff] %vm283_vm1, %v252_v20  ;;  %v636_v23 = vpop.f32.mrb[2].mxu1  ;;  %v301_v27 = vsel %vm283_vm1, %v220_v19, 0.0  ;;  %v350_v63 = vmul.f32 %v252_v20, %v252_v20  ;;  %v316_v4 = vsel %vm283_vm1, %v252_v20, 0.0 }
  0xf8   :  { %287 = vst.msk [vmem:[%s743_s2 + $0x18] sm:$0xff] %vm283_vm1, %v495_v22  ;;  %v223_v24 = vpop.f32.mrb[3].mxu0  ;;  %295 = vst.msk [vmem:[%s743_s2 + $0x58] sm:$0xff] %vm283_vm1, %v636_v23  ;;  %v255_v25 = vpop.f32.mrb[3].mxu1  ;;  %v345_v33 = vmul.f32 %v495_v22, %v495_v22  ;;  %v361_v37 = vsel %vm283_vm1, %v344_v26, 0.0  ;;  %v306_v38 = vsel %vm283_vm1, %v495_v22, 0.0  ;;  %v353_v17 = vmul.f32 %v636_v23, %v636_v23 }
  0xf9   :  { %285 = vst.msk [vmem:[%s743_s2 + $0x8] sm:$0xff] %vm283_vm1, %v223_v24  ;;  %v302_v28 = vsel %vm283_vm1, %v223_v24, 0.0  ;;  %v343_v29 = vmul.f32 %v223_v24, %v223_v24  ;;  %293 = vst.msk [vmem:[%s743_s2 + $0x48] sm:$0xff] %vm283_vm1, %v255_v25  ;;  %v358_v32 = vsel %vm283_vm1, %v342_v21, 0.0  ;;  %v373_v8 = vsel %vm283_vm1, %v350_v63, 0.0 }
  0xfa   :  { %v303_v30 = vadd.f32 %v302_v28, %v301_v27  ;;  %v363_v45 = vsel %vm283_vm1, %v345_v33, 0.0  ;;  %v351_v9 = vmul.f32 %v255_v25, %v255_v25  ;;  %v318_v13 = vsel %vm283_vm1, %v255_v25, 0.0 }
  0xfb   :  { %v359_v34 = vsel %vm283_vm1, %v343_v29, 0.0  ;;  %v377_v24 = vsel %vm283_vm1, %v352_v12, 0.0  ;;  %v322_v26 = vsel %vm283_vm1, %v636_v23, 0.0  ;;  %v379_v29 = vsel %vm283_vm1, %v353_v17, 0.0 }
  0xfc   :  { %v305_v35 = vadd.f32 %v304_v31, %v303_v30  ;;  %v360_v36 = vadd.f32 %v359_v34, %v358_v32  ;;  %v375_v19 = vsel %vm283_vm1, %v351_v9, 0.0 }
  0xfd   :  { %v498_v39 = vpop.f32.mrb[4].mxu0  ;;  %v662_v40 = vpop.f32.mrb[4].mxu1 }
  0xfe   :  { %v362_v41 = vadd.f32 %v361_v37, %v360_v36  ;;  %290 = vst.msk [vmem:[%s743_s2 + $0x30] sm:$0xff] %vm283_vm1, %v498_v39  ;;  %v236_v42 = vpop.f32.mrb[5].mxu0  ;;  %v307_v43 = vadd.f32 %v306_v38, %v305_v35  ;;  %298 = vst.msk [vmem:[%s743_s2 + $0x70] sm:$0xff] %vm283_vm1, %v662_v40  ;;  %v268_v44 = vpop.f32.mrb[5].mxu1  ;;  %v348_v54 = vmul.f32 %v498_v39, %v498_v39  ;;  %v312_v60 = vsel %vm283_vm1, %v498_v39, 0.0 }
  0xff   :  { %288 = vst.msk [vmem:[%s743_s2 + $0x20] sm:$0xff] %vm283_vm1, %v236_v42  ;;  %v308_v46 = vsel %vm283_vm1, %v236_v42, 0.0  ;;  %v346_v47 = vmul.f32 %v236_v42, %v236_v42  ;;  %v499_v48 = vpop.f32.mrb[6].mxu0  ;;  %296 = vst.msk [vmem:[%s743_s2 + $0x60] sm:$0xff] %vm283_vm1, %v268_v44  ;;  %v507_v49 = vpop.f32.mrb[6].mxu1  ;;  %v354_v20 = vmul.f32 %v268_v44, %v268_v44  ;;  %v324_v25 = vsel %vm283_vm1, %v268_v44, 0.0 }
 0x100   :  { %v309_v50 = vadd.f32 %v308_v46, %v307_v43  ;;  %v364_v51 = vadd.f32 %v363_v45, %v362_v41  ;;  %291 = vst.msk [vmem:[%s743_s2 + $0x38] sm:$0xff] %vm283_vm1, %v499_v48  ;;  %v239_v52 = vpop.f32.mrb[7].mxu0  ;;  %299 = vst.msk [vmem:[%s743_s2 + $0x78] sm:$0xff] %vm283_vm1, %v507_v49  ;;  %v271_v53 = vpop.f32.mrb[7].mxu1  ;;  %v349_v61 = vmul.f32 %v499_v48, %v499_v48  ;;  %v369_v2 = vsel %vm283_vm1, %v348_v54, 0.0 }
 0x101   :  { %v365_v55 = vsel %vm283_vm1, %v346_v47, 0.0  ;;  %289 = vst.msk [vmem:[%s743_s2 + $0x28] sm:$0xff] %vm283_vm1, %v239_v52  ;;  %v310_v56 = vsel %vm283_vm1, %v239_v52, 0.0  ;;  %v347_v57 = vmul.f32 %v239_v52, %v239_v52  ;;  %297 = vst.msk [vmem:[%s743_s2 + $0x68] sm:$0xff] %vm283_vm1, %v271_v53  ;;  %v314_v3 = vsel %vm283_vm1, %v499_v48, 0.0 }
 0x102   :  { %v366_v58 = vadd.f32 %v365_v55, %v364_v51  ;;  %v311_v59 = vadd.f32 %v310_v56, %v309_v50  ;;  %v371_v7 = vsel %vm283_vm1, %v349_v61, 0.0  ;;  %v381_v18 = vsel %vm283_vm1, %v354_v20, 0.0 }
 0x103   :  { %v367_v62 = vsel %vm283_vm1, %v347_v57, 0.0  ;;  %v355_v30 = vmul.f32 %v271_v53, %v271_v53  ;;  %v356_v33 = vmul.f32 %v662_v40, %v662_v40  ;;  %v326_v34 = vsel %vm283_vm1, %v271_v53, 0.0  ;;  %v300_v57 = vld [vmem:[#allocation2] sm:$0x1] }
 0x104   :  { %v313_v0 = vadd.f32 %v312_v60, %v311_v59  ;;  %v368_v1 = vadd.f32 %v367_v62, %v366_v58  ;;  %v328_v23 = vsel %vm283_vm1, %v662_v40, 0.0  ;;  %v357_v37 = vmul.f32 %v507_v49, %v507_v49  ;;  %v341_v60 = vld [vmem:[#allocation3] sm:$0x1] }
 0x105   :  { %v383_v38 = vsel %vm283_vm1, %v355_v30, 0.0  ;;  %v385_v42 = vsel %vm283_vm1, %v356_v33, 0.0  ;;  %v330_v43 = vsel %vm283_vm1, %v507_v49, 0.0 }
 0x106   :  { %v370_v5 = vadd.f32 %v369_v2, %v368_v1  ;;  %v315_v6 = vadd.f32 %v314_v3, %v313_v0  ;;  %v387_v46 = vsel %vm283_vm1, %v357_v37, 0.0 }
 0x108   :  { %v317_v10 = vadd.f32 %v316_v4, %v315_v6  ;;  %v372_v11 = vadd.f32 %v371_v7, %v370_v5 }
 0x10a   :  { %v374_v14 = vadd.f32 %v373_v8, %v372_v11  ;;  %v319_v15 = vadd.f32 %v318_v13, %v317_v10 }
 0x10c   :  { %v321_v21 = vadd.f32 %v320_v16, %v319_v15  ;;  %v376_v22 = vadd.f32 %v375_v19, %v374_v14 }
 0x10e   :  { %v378_v27 = vadd.f32 %v377_v24, %v376_v22  ;;  %v323_v28 = vadd.f32 %v322_v26, %v321_v21 }
 0x110   :  { %v325_v31 = vadd.f32 %v324_v25, %v323_v28  ;;  %v380_v32 = vadd.f32 %v379_v29, %v378_v27 }
 0x112   :  { %v382_v35 = vadd.f32 %v381_v18, %v380_v32  ;;  %v327_v36 = vadd.f32 %v326_v34, %v325_v31 }
 0x114   :  { %v329_v39 = vadd.f32 %v328_v23, %v327_v36  ;;  %v384_v41 = vadd.f32 %v383_v38, %v382_v35 }
 0x116   :  { %v331_v44 = vadd.f32 %v330_v43, %v329_v39  ;;  %v386_v45 = vadd.f32 %v385_v42, %v384_v41 }
 0x118   :  { %v332_v47 = vrot.slane %v331_v44, 4  ;;  %v388_v48 = vadd.f32 %v387_v46, %v386_v45 }
 0x11a   :  { %v333_v50 = vadd.f32 %v332_v47, %v331_v44  ;;  %v389_v51 = vrot.slane %v388_v48, 4 }
 0x11c   :  { %v334_v52 = vrot.slane %v333_v50, 2  ;;  %v390_v53 = vadd.f32 %v389_v51, %v388_v48 }
 0x11e   :  { %v335_v40 = vadd.f32 %v334_v52, %v333_v50  ;;  %v391_v54 = vrot.slane %v390_v53, 2 }
 0x120   :  { %v336_v55 = vrot.slane %v335_v40, 1  ;;  %v392_v56 = vadd.f32 %v391_v54, %v390_v53 }
 0x122   :  { %v337_v58 = vadd.f32 %v336_v55, %v335_v40  ;;  %v393_v59 = vrot.slane %v392_v56, 1 }
 0x124   :  { %v338_v61 = vadd.f32 %v337_v58, %v300_v57  ;;  %v394_v49 = vadd.f32 %v393_v59, %v392_v56 }
 0x126   :  { %340 = vst.msk [vmem:[#allocation2] sm:$0x1] %vm55_vm0, %v338_v61  ;;  %v395_v62 = vadd.f32 %v394_v49, %v341_v60 }
 0x128   :  { %396 = vst.msk [vmem:[#allocation3] sm:$0x1] %vm55_vm0, %v395_v62 }
 0x12d   :  { %v400_v63 = vld [vmem:[#allocation2] sm:$0x1] }
 0x12e   :  { %401 = vst.msk [vmem:[%s744_s3] sm:$0x1] %vm55_vm0, %v400_v63 }
 0x12f   :  { %v402_v0 = vld [vmem:[#allocation3] sm:$0x1] }
 0x130   :  { %403 = vst.msk [vmem:[%s745_s4] sm:$0x1] %vm55_vm0, %v402_v0 }

// kernel: resnet_generator_pallas.44
= control target key start
LH: loop header
LB: loop body
LE: loop exit
PB: predicated region body
PF: predicated region fallthrough
CT: control target
= control target key end

     0   :  { %vm130_vm0 = vcmask 261120   ;;  %vm55_vm1 = vcmask 122880   ;;  %v476_v10 = vmov 0.0   ;;  %vm252_vm2 = vcmask 130048   ;;  %s666_s1 = inlined_call_operand.vmem [shape: bf16[32,16], index: 1, kind: input, shape index: {}]   ;;  %s667_s0 = inlined_call_operand.vmem [shape: bf16[128,32], index: 0, kind: input, shape index: {}]   ;;  %s668_s2 = inlined_call_operand.vmem [shape: f32[128,16], index: 2, kind: output, shape index: {0}]   ;;  %s669_s3 = inlined_call_operand.vmem [shape: f32[1,1,16], index: 3, kind: output, shape index: {1}]   ;;  %s670_s4 = inlined_call_operand.vmem [shape: f32[1,1,16], index: 4, kind: output, shape index: {2}]  }
   0x1   :  { %v466_v0 = vld [vmem:[%s666_s1] sm:$0xff]   ;;  %v467_v1 = vld [vmem:[%s666_s1 + $0x8] sm:$0xff]   ;;  %v470_v4 = vld [vmem:[%s667_s0 + $0x10] sm:$0xff]   ;;  %56 = vst.msk [vmem:[#allocation2] sm:$0x1] %vm55_vm1, %v476_v10 }
   0x2   :  { %441 = vmatprep.subr.bf16.mxu0 %v466_v0  ;;  %v468_v2 = vld [vmem:[%s667_s0] sm:$0xff]   ;;  %461 = vmatprep.subr.bf16.mxu1 %v466_v0  ;;  %v469_v3 = vld [vmem:[%s667_s0 + $0x8] sm:$0xff]   ;;  %v474_v7 = vld [vmem:[%s667_s0 + $0x30] sm:$0xff]   ;;  %57 = vst.msk [vmem:[#allocation3] sm:$0x1] %vm55_vm1, %v476_v10 }
   0x3   :  { %442 = vmatpush3.bf16.msra.mxu0 %v466_v0  ;;  %463 = vmatpush3.bf16.msra.mxu1 %v466_v0  ;;  %v472_v5 = vld [vmem:[%s667_s0 + $0x20] sm:$0xff]   ;;  %v473_v6 = vld [vmem:[%s667_s0 + $0x28] sm:$0xff]   ;;  %v471_v8 = vld [vmem:[%s667_s0 + $0x18] sm:$0xff]  }
   0x4   :  { %443 = vmatprep.subr.bf16.mxu0 %v467_v1  ;;  %445 = vmatprep.mubr.msk.bf16.mxu0 %vm130_vm0, %v468_v2  ;;  %v475_v9 = vld [vmem:[%s667_s0 + $0x38] sm:$0xff]  }
   0x5   :  { %462 = vmatprep.subr.bf16.mxu1 %v467_v1  ;;  %453 = vmatprep.mubr.msk.bf16.mxu1 %vm130_vm0, %v472_v5 }
   0x7   :  { %444 = vmatpush3.bf16.msra.mxu0 %v467_v1  ;;  %464 = vmatpush3.bf16.msra.mxu1 %v467_v1 }
   0xa   :  { %446 = vmatmul.mubr.msk.bf16.vlgmr.msra.gmra.mrb[0].mxu0 %vm130_vm0, %v469_v3  ;;  %454 = vmatmul.mubr.msk.bf16.vlgmr.msra.gmra.mrb[0].mxu1 %vm130_vm0, %v473_v6 }
   0xb   :  { %449 = vmatprep.mubr.msk.bf16.mxu0 %vm130_vm0, %v470_v4  ;;  %457 = vmatprep.mubr.msk.bf16.mxu1 %vm130_vm0, %v474_v7 }
  0x12   :  { %450 = vmatmul.mubr.msk.bf16.gmra.mrb[4].mxu0 %vm130_vm0, %v471_v8  ;;  %458 = vmatmul.mubr.msk.bf16.gmra.mrb[4].mxu1 %vm130_vm0, %v475_v9 }
  0xdd   :  { %v447_v11 = vpop.f32.mrb[0].mxu0  ;;  %v542_v12 = vpop.f32.mrb[0].mxu1 }
  0xde   :  { %255 = vst.msk [vmem:[%s668_s2 + $0x10] sm:$0xff] %vm252_vm2, %v447_v11  ;;  %v189_v13 = vpop.f32.mrb[1].mxu0  ;;  %263 = vst.msk [vmem:[%s668_s2 + $0x50] sm:$0xff] %vm252_vm2, %v542_v12  ;;  %v221_v14 = vpop.f32.mrb[1].mxu1  ;;  %v313_v20 = vmul.f32 %v447_v11, %v447_v11  ;;  %v273_v25 = vsel %vm252_vm2, %v447_v11, 0.0  ;;  %v321_v6 = vmul.f32 %v542_v12, %v542_v12  ;;  %v289_v10 = vsel %vm252_vm2, %v542_v12, 0.0 }
  0xdf   :  { %253 = vst.msk [vmem:[%s668_s2] sm:$0xff] %vm252_vm2, %v189_v13  ;;  %v311_v15 = vmul.f32 %v189_v13, %v189_v13  ;;  %v448_v16 = vpop.f32.mrb[2].mxu0  ;;  %261 = vst.msk [vmem:[%s668_s2 + $0x40] sm:$0xff] %vm252_vm2, %v221_v14  ;;  %v561_v17 = vpop.f32.mrb[2].mxu1  ;;  %v270_v21 = vsel %vm252_vm2, %v189_v13, 0.0  ;;  %v319_v57 = vmul.f32 %v221_v14, %v221_v14  ;;  %v285_v62 = vsel %vm252_vm2, %v221_v14, 0.0 }
  0xe0   :  { %256 = vst.msk [vmem:[%s668_s2 + $0x18] sm:$0xff] %vm252_vm2, %v448_v16  ;;  %v192_v18 = vpop.f32.mrb[3].mxu0  ;;  %264 = vst.msk [vmem:[%s668_s2 + $0x58] sm:$0xff] %vm252_vm2, %v561_v17  ;;  %v224_v19 = vpop.f32.mrb[3].mxu1  ;;  %v314_v27 = vmul.f32 %v448_v16, %v448_v16  ;;  %v330_v31 = vsel %vm252_vm2, %v313_v20, 0.0  ;;  %v275_v32 = vsel %vm252_vm2, %v448_v16, 0.0  ;;  %v322_v11 = vmul.f32 %v561_v17, %v561_v17 }
  0xe1   :  { %254 = vst.msk [vmem:[%s668_s2 + $0x8] sm:$0xff] %vm252_vm2, %v192_v18  ;;  %v271_v22 = vsel %vm252_vm2, %v192_v18, 0.0  ;;  %v312_v23 = vmul.f32 %v192_v18, %v192_v18  ;;  %262 = vst.msk [vmem:[%s668_s2 + $0x48] sm:$0xff] %vm252_vm2, %v224_v19  ;;  %v327_v26 = vsel %vm252_vm2, %v311_v15, 0.0  ;;  %v342_v2 = vsel %vm252_vm2, %v319_v57, 0.0 }
  0xe2   :  { %v272_v24 = vadd.f32 %v271_v22, %v270_v21  ;;  %v332_v39 = vsel %vm252_vm2, %v314_v27, 0.0  ;;  %v320_v3 = vmul.f32 %v224_v19, %v224_v19  ;;  %v287_v7 = vsel %vm252_vm2, %v224_v19, 0.0 }
  0xe3   :  { %v328_v28 = vsel %vm252_vm2, %v312_v23, 0.0  ;;  %v346_v18 = vsel %vm252_vm2, %v321_v6, 0.0  ;;  %v291_v20 = vsel %vm252_vm2, %v561_v17, 0.0  ;;  %v348_v23 = vsel %vm252_vm2, %v322_v11, 0.0 }
  0xe4   :  { %v274_v29 = vadd.f32 %v273_v25, %v272_v24  ;;  %v329_v30 = vadd.f32 %v328_v28, %v327_v26  ;;  %v344_v13 = vsel %vm252_vm2, %v320_v3, 0.0 }
  0xe5   :  { %v451_v33 = vpop.f32.mrb[4].mxu0  ;;  %v587_v34 = vpop.f32.mrb[4].mxu1 }
  0xe6   :  { %v331_v35 = vadd.f32 %v330_v31, %v329_v30  ;;  %259 = vst.msk [vmem:[%s668_s2 + $0x30] sm:$0xff] %vm252_vm2, %v451_v33  ;;  %v205_v36 = vpop.f32.mrb[5].mxu0  ;;  %v276_v37 = vadd.f32 %v275_v32, %v274_v29  ;;  %267 = vst.msk [vmem:[%s668_s2 + $0x70] sm:$0xff] %vm252_vm2, %v587_v34  ;;  %v237_v38 = vpop.f32.mrb[5].mxu1  ;;  %v317_v48 = vmul.f32 %v451_v33, %v451_v33  ;;  %v281_v54 = vsel %vm252_vm2, %v451_v33, 0.0 }
  0xe7   :  { %257 = vst.msk [vmem:[%s668_s2 + $0x20] sm:$0xff] %vm252_vm2, %v205_v36  ;;  %v277_v40 = vsel %vm252_vm2, %v205_v36, 0.0  ;;  %v315_v41 = vmul.f32 %v205_v36, %v205_v36  ;;  %v452_v42 = vpop.f32.mrb[6].mxu0  ;;  %265 = vst.msk [vmem:[%s668_s2 + $0x60] sm:$0xff] %vm252_vm2, %v237_v38  ;;  %v460_v43 = vpop.f32.mrb[6].mxu1  ;;  %v323_v14 = vmul.f32 %v237_v38, %v237_v38  ;;  %v293_v19 = vsel %vm252_vm2, %v237_v38, 0.0 }
  0xe8   :  { %v278_v44 = vadd.f32 %v277_v40, %v276_v37  ;;  %v333_v45 = vadd.f32 %v332_v39, %v331_v35  ;;  %260 = vst.msk [vmem:[%s668_s2 + $0x38] sm:$0xff] %vm252_vm2, %v452_v42  ;;  %v208_v46 = vpop.f32.mrb[7].mxu0  ;;  %268 = vst.msk [vmem:[%s668_s2 + $0x78] sm:$0xff] %vm252_vm2, %v460_v43  ;;  %v240_v47 = vpop.f32.mrb[7].mxu1  ;;  %v318_v55 = vmul.f32 %v452_v42, %v452_v42  ;;  %v338_v60 = vsel %vm252_vm2, %v317_v48, 0.0 }
  0xe9   :  { %v334_v49 = vsel %vm252_vm2, %v315_v41, 0.0  ;;  %258 = vst.msk [vmem:[%s668_s2 + $0x28] sm:$0xff] %vm252_vm2, %v208_v46  ;;  %v279_v50 = vsel %vm252_vm2, %v208_v46, 0.0  ;;  %v316_v51 = vmul.f32 %v208_v46, %v208_v46  ;;  %266 = vst.msk [vmem:[%s668_s2 + $0x68] sm:$0xff] %vm252_vm2, %v240_v47  ;;  %v283_v61 = vsel %vm252_vm2, %v452_v42, 0.0 }
  0xea   :  { %v335_v52 = vadd.f32 %v334_v49, %v333_v45  ;;  %v280_v53 = vadd.f32 %v279_v50, %v278_v44  ;;  %v340_v1 = vsel %vm252_vm2, %v318_v55, 0.0  ;;  %v350_v12 = vsel %vm252_vm2, %v323_v14, 0.0 }
  0xeb   :  { %v336_v56 = vsel %vm252_vm2, %v316_v51, 0.0  ;;  %v324_v24 = vmul.f32 %v240_v47, %v240_v47  ;;  %v325_v27 = vmul.f32 %v587_v34, %v587_v34  ;;  %v295_v28 = vsel %vm252_vm2, %v240_v47, 0.0  ;;  %v269_v51 = vld [vmem:[#allocation2] sm:$0x1] }
  0xec   :  { %v282_v58 = vadd.f32 %v281_v54, %v280_v53  ;;  %v337_v59 = vadd.f32 %v336_v56, %v335_v52  ;;  %v297_v17 = vsel %vm252_vm2, %v587_v34, 0.0  ;;  %v326_v31 = vmul.f32 %v460_v43, %v460_v43  ;;  %v310_v54 = vld [vmem:[#allocation3] sm:$0x1] }
  0xed   :  { %v352_v32 = vsel %vm252_vm2, %v324_v24, 0.0  ;;  %v354_v36 = vsel %vm252_vm2, %v325_v27, 0.0  ;;  %v299_v37 = vsel %vm252_vm2, %v460_v43, 0.0 }
  0xee   :  { %v339_v63 = vadd.f32 %v338_v60, %v337_v59  ;;  %v284_v0 = vadd.f32 %v283_v61, %v282_v58  ;;  %v356_v40 = vsel %vm252_vm2, %v326_v31, 0.0 }
  0xf0   :  { %v286_v4 = vadd.f32 %v285_v62, %v284_v0  ;;  %v341_v5 = vadd.f32 %v340_v1, %v339_v63 }
  0xf2   :  { %v343_v8 = vadd.f32 %v342_v2, %v341_v5  ;;  %v288_v9 = vadd.f32 %v287_v7, %v286_v4 }
  0xf4   :  { %v290_v15 = vadd.f32 %v289_v10, %v288_v9  ;;  %v345_v16 = vadd.f32 %v344_v13, %v343_v8 }
  0xf6   :  { %v347_v21 = vadd.f32 %v346_v18, %v345_v16  ;;  %v292_v22 = vadd.f32 %v291_v20, %v290_v15 }
  0xf8   :  { %v294_v25 = vadd.f32 %v293_v19, %v292_v22  ;;  %v349_v26 = vadd.f32 %v348_v23, %v347_v21 }
  0xfa   :  { %v351_v29 = vadd.f32 %v350_v12, %v349_v26  ;;  %v296_v30 = vadd.f32 %v295_v28, %v294_v25 }
  0xfc   :  { %v298_v33 = vadd.f32 %v297_v17, %v296_v30  ;;  %v353_v35 = vadd.f32 %v352_v32, %v351_v29 }
  0xfe   :  { %v300_v38 = vadd.f32 %v299_v37, %v298_v33  ;;  %v355_v39 = vadd.f32 %v354_v36, %v353_v35 }
 0x100   :  { %v301_v41 = vrot.slane %v300_v38, 4  ;;  %v357_v42 = vadd.f32 %v356_v40, %v355_v39 }
 0x102   :  { %v302_v44 = vadd.f32 %v301_v41, %v300_v38  ;;  %v358_v45 = vrot.slane %v357_v42, 4 }
 0x104   :  { %v303_v46 = vrot.slane %v302_v44, 2  ;;  %v359_v47 = vadd.f32 %v358_v45, %v357_v42 }
 0x106   :  { %v304_v34 = vadd.f32 %v303_v46, %v302_v44  ;;  %v360_v48 = vrot.slane %v359_v47, 2 }
 0x108   :  { %v305_v49 = vrot.slane %v304_v34, 1  ;;  %v361_v50 = vadd.f32 %v360_v48, %v359_v47 }
 0x10a   :  { %v306_v52 = vadd.f32 %v305_v49, %v304_v34  ;;  %v362_v53 = vrot.slane %v361_v50, 1 }
 0x10c   :  { %v307_v55 = vadd.f32 %v306_v52, %v269_v51  ;;  %v363_v43 = vadd.f32 %v362_v53, %v361_v50 }
 0x10e   :  { %309 = vst.msk [vmem:[#allocation2] sm:$0x1] %vm55_vm1, %v307_v55  ;;  %v364_v56 = vadd.f32 %v363_v43, %v310_v54 }
 0x110   :  { %365 = vst.msk [vmem:[#allocation3] sm:$0x1] %vm55_vm1, %v364_v56 }
 0x115   :  { %v369_v57 = vld [vmem:[#allocation2] sm:$0x1] }
 0x116   :  { %370 = vst.msk [vmem:[%s669_s3] sm:$0x1] %vm55_vm1, %v369_v57 }
 0x117   :  { %v371_v58 = vld [vmem:[#allocation3] sm:$0x1] }
 0x118   :  { %372 = vst.msk [vmem:[%s670_s4] sm:$0x1] %vm55_vm1, %v371_v58 }

// kernel: resnet_generator_pallas.49
= control target key start
LH: loop header
LB: loop body
LE: loop exit
PB: predicated region body
PF: predicated region fallthrough
CT: control target
= control target key end

     0   :  { %s2012_s12 = smov 0   ;;  %s2335_s0 = inlined_call_operand.vmem [shape: bf16[512,784], index: 0, kind: input, shape index: {}]   ;;  %s2336_s1 = inlined_call_operand.vmem [shape: bf16[784,128], index: 1, kind: input, shape index: {}]   ;;  %s2337_s2 = inlined_call_operand.vmem [shape: f32[1,128], index: 2, kind: input, shape index: {}]   ;;  %s2338_s3 = inlined_call_operand.vmem [shape: f32[512,128], index: 3, kind: output, shape index: {}]  }
   0x1 LB: > { %s1454_s13 = sadd.s32 4294967295, %s1990_s12   ;;  %p1458_p0 = scmp.ge.s32.totalorder %s1990_s12, 1  ;;  %s1990_s12 = sphi %s2012_s12, %s13_s12  }
   0x2   : > { %p139_p1 = scmp.lt.s32.totalorder %s1990_s12, 5 }
   0x4   : > { %p140_p2 = pnand %p1458_p0, %p139_p1 }
   0x5   : > { %v1823_v0 = vld [vmem:[%s2336_s1 + $0x40] sm:$0xff] (!%p140_p2)   ;;  %v1827_v4 = vld [vmem:[%s2336_s1 + $0x48] sm:$0xff] (!%p140_p2)   ;;  %v1831_v8 = vld [vmem:[%s2336_s1 + $0x50] sm:$0xff] (!%p140_p2)   ;;  %s1459_s19 = sshll.u32 (!%p140_p2), %s1454_s13, 4  ;;  %vm921_vm0 = vcmask (!%p140_p2), 130048  }
   0x6   : > { %143 = sbr.rel (%p140_p2) target bundleno = 381 (0x17d), region = 32  ;;  %v1824_v1 = vld [vmem:[%s2336_s1 + $0xc0] sm:$0xff] (!%p140_p2)   ;;  %1579 = vmatprep.subr.bf16.mxu0 (!%p140_p2), %v1823_v0  ;;  %v1828_v5 = vld [vmem:[%s2336_s1 + $0xc8] sm:$0xff] (!%p140_p2)   ;;  %v1832_v9 = vld [vmem:[%s2336_s1 + $0xd0] sm:$0xff] (!%p140_p2)   ;;  %p165_p3 = scmp.lt.s32.totalorder (!%p140_p2), %s1459_s19, 63 }
   0x7   : > { %v1825_v2 = vld [vmem:[%s2336_s1] sm:$0xff] (!%p140_p2)   ;;  %1643 = vmatprep.subr.bf16.mxu1 (!%p140_p2), %v1824_v1  ;;  %v1829_v6 = vld [vmem:[%s2336_s1 + $0x8] sm:$0xff] (!%p140_p2)   ;;  %v1833_v10 = vld [vmem:[%s2336_s1 + $0x10] sm:$0xff] (!%p140_p2)  }
   0x8   : > { %v1826_v3 = vld [vmem:[%s2336_s1 + $0x80] sm:$0xff] (!%p140_p2)   ;;  %1580 = vmatpush3.bf16.msra.mxu0 (!%p140_p2), %v1825_v2  ;;  %v1830_v7 = vld [vmem:[%s2336_s1 + $0x88] sm:$0xff] (!%p140_p2)   ;;  %v1834_v11 = vld [vmem:[%s2336_s1 + $0x90] sm:$0xff] (!%p140_p2)  }
   0x9   : > { %1644 = vmatpush3.bf16.msra.mxu1 (!%p140_p2), %v1826_v3  ;;  %1581 = vmatprep.subr.bf16.mxu0 (!%p140_p2), %v1827_v4  ;;  %v1835_v12 = vld [vmem:[%s2336_s1 + $0x58] sm:$0xff] (!%p140_p2)   ;;  %v1839_v16 = vld [vmem:[%s2336_s1 + $0x60] sm:$0xff] (!%p140_p2)   ;;  %v1843_v20 = vld [vmem:[%s2336_s1 + $0x68] sm:$0xff] (!%p140_p2)  }
   0xa   : > { %1645 = vmatprep.subr.bf16.mxu1 (!%p140_p2), %v1828_v5  ;;  %v1836_v13 = vld [vmem:[%s2336_s1 + $0xd8] sm:$0xff] (!%p140_p2)   ;;  %v1840_v17 = vld [vmem:[%s2336_s1 + $0xe0] sm:$0xff] (!%p140_p2)   ;;  %v1844_v21 = vld [vmem:[%s2336_s1 + $0xe8] sm:$0xff] (!%p140_p2)  }
   0xb   : > { %v1837_v14 = vld [vmem:[%s2336_s1 + $0x18] sm:$0xff] (!%p140_p2)   ;;  %v1841_v18 = vld [vmem:[%s2336_s1 + $0x20] sm:$0xff] (!%p140_p2)   ;;  %v1845_v22 = vld [vmem:[%s2336_s1 + $0x28] sm:$0xff] (!%p140_p2)  }
   0xc   : > { %1582 = vmatpush3.bf16.msra.mxu0 (!%p140_p2), %v1829_v6  ;;  %v1838_v15 = vld [vmem:[%s2336_s1 + $0x98] sm:$0xff] (!%p140_p2)   ;;  %v1842_v19 = vld [vmem:[%s2336_s1 + $0xa0] sm:$0xff] (!%p140_p2)   ;;  %v1846_v23 = vld [vmem:[%s2336_s1 + $0xa8] sm:$0xff] (!%p140_p2)  }
   0xd   : > { %1646 = vmatpush3.bf16.msra.mxu1 %v1830_v7  ;;  %1583 = vmatprep.subr.bf16.mxu0 %v1831_v8  ;;  %s2340_s19 = smov (!%p165_p3, %s1459_s19), 63  ;;  %v1847_v24 = vld [vmem:[%s2336_s1 + $0x70] sm:$0xff]   ;;  %v1851_v28 = vld [vmem:[%s2336_s1 + $0x78] sm:$0xff]   ;;  %v1861_v36 = vld [vmem:[%s2336_s1 + $0x140] sm:$0xff]  }
   0xe   : > { %1647 = vmatprep.subr.bf16.mxu1 %v1832_v9  ;;  %v1848_v25 = vld [vmem:[%s2336_s1 + $0xf0] sm:$0xff]   ;;  %s1814_s16 = smul.u32 28, %s2340_s19  ;;  %v1852_v29 = vld [vmem:[%s2336_s1 + $0xf8] sm:$0xff]   ;;  %v1862_v37 = vld [vmem:[%s2336_s1 + $0x100] sm:$0xff]  }
   0xf   : > { %v1849_v26 = vld [vmem:[%s2336_s1 + $0x30] sm:$0xff]   ;;  %v1853_v30 = vld [vmem:[%s2336_s1 + $0x38] sm:$0xff]   ;;  %v1869_v42 = vld [vmem:[%s2336_s1 + $0x148] sm:$0xff]  }
  0x10   : > { %1584 = vmatpush3.bf16.msra.mxu0 %v1833_v10  ;;  %v1850_v27 = vld [vmem:[%s2336_s1 + $0xb0] sm:$0xff]   ;;  %s2118_s13 = scalar_lea.vmem %s2335_s0, %s1814_s16  ;;  %v1854_v31 = vld [vmem:[%s2336_s1 + $0xb8] sm:$0xff]   ;;  %v1870_v43 = vld [vmem:[%s2336_s1 + $0x108] sm:$0xff]  }
  0x11   : > { %1648 = vmatpush3.bf16.msra.mxu1 %v1834_v11  ;;  %1585 = vmatprep.subr.bf16.mxu0 %v1835_v12  ;;  %v1855_v32 = vld [vmem:[%s2118_s13] ss:$28 sps:$4 sm:$0xff]   ;;  %v1858_v34 = vld [vmem:[%s2118_s13 + $0x8] ss:$28 sps:$4 sm:$0xff]   ;;  %v1867_v40 = vld [vmem:[%s2118_s13 + $0x38] ss:$28 sps:$4 sm:$0xff]  }
  0x12   : > { %1649 = vmatprep.subr.bf16.mxu1 %v1836_v13  ;;  %v1857_v33 = vld [vmem:[%s2118_s13 + $0x4] ss:$28 sps:$4 sm:$0xff]   ;;  %v1860_v35 = vld [vmem:[%s2118_s13 + $0xc] ss:$28 sps:$4 sm:$0xff]   ;;  %v1863_v38 = vld [vmem:[%s2118_s13 + $0x3c] ss:$28 sps:$4 sm:$0xff]  }
  0x13   : > { %978 = vmatprep.mubr.bf16.mxu0 %v1857_v33  ;;  %1075 = vmatprep.mubr.bf16.mxu1 %v1860_v35  ;;  %v1865_v39 = vld [vmem:[%s2118_s13 + $0x44] ss:$28 sps:$4 sm:$0xff]   ;;  %v1871_v44 = vld [vmem:[%s2118_s13 + $0x74] ss:$28 sps:$4 sm:$0xff]   ;;  %v1873_v45 = vld [vmem:[%s2118_s13 + $0x7c] ss:$28 sps:$4 sm:$0xff]  }
  0x14   : > { %1586 = vmatpush3.bf16.msra.mxu0 %v1837_v14  ;;  %v1868_v41 = vld [vmem:[%s2118_s13 + $0x40] ss:$28 sps:$4 sm:$0xff]   ;;  %v1877_v46 = vld [vmem:[%s2336_s1 + $0x150] sm:$0xff]   ;;  %v1879_v50 = vld [vmem:[%s2118_s13 + $0xac] ss:$28 sps:$4 sm:$0xff]  }
  0x15   : > { %1650 = vmatpush3.bf16.msra.mxu1 %v1838_v15  ;;  %1587 = vmatprep.subr.bf16.mxu0 %v1839_v16  ;;  %v1878_v47 = vld [vmem:[%s2336_s1 + $0x110] sm:$0xff]   ;;  %v1885_v52 = vld [vmem:[%s2336_s1 + $0x158] sm:$0xff]   ;;  %v1893_v54 = vld [vmem:[%s2336_s1 + $0x160] sm:$0xff]  }
  0x16   : > { %1651 = vmatprep.subr.bf16.mxu1 %v1840_v17  ;;  %v1875_v48 = vld [vmem:[%s2118_s13 + $0x70] ss:$28 sps:$4 sm:$0xff]   ;;  %v1876_v49 = vld [vmem:[%s2118_s13 + $0x78] ss:$28 sps:$4 sm:$0xff]   ;;  %v1894_v55 = vld [vmem:[%s2336_s1 + $0x120] sm:$0xff]  }
  0x17   : > { %v1881_v51 = vld [vmem:[%s2118_s13 + $0xb4] ss:$28 sps:$4 sm:$0xff]   ;;  %v1886_v53 = vld [vmem:[%s2336_s1 + $0x118] sm:$0xff]   ;;  %v1883_v56 = vld [vmem:[%s2118_s13 + $0xa8] ss:$28 sps:$4 sm:$0xff]  }
  0x18   : > { %1588 = vmatpush3.bf16.msra.mxu0 %v1841_v18  ;;  %v1884_v57 = vld [vmem:[%s2118_s13 + $0xb0] ss:$28 sps:$4 sm:$0xff]   ;;  %v1887_v58 = vld [vmem:[%s2118_s13 + $0xe4] ss:$28 sps:$4 sm:$0xff]   ;;  %v1895_v2 = vld [vmem:[%s2118_s13 + $0x11c] ss:$28 sps:$4 sm:$0xff]  }
  0x19   : > { %1652 = vmatpush3.bf16.msra.mxu1 %v1842_v19  ;;  %1589 = vmatprep.subr.bf16.mxu0 %v1843_v20  ;;  %v1889_v59 = vld [vmem:[%s2118_s13 + $0xec] ss:$28 sps:$4 sm:$0xff]   ;;  %v1891_v62 = vld [vmem:[%s2118_s13 + $0xe0] ss:$28 sps:$4 sm:$0xff]   ;;  %v1909_v0 = vld [vmem:[%s2336_s1 + $0x170] sm:$0xff]  }
  0x1a   : > { %1653 = vmatprep.subr.bf16.mxu1 %v1844_v21  ;;  %v1901_v60 = vld [vmem:[%s2336_s1 + $0x168] sm:$0xff]   ;;  %v1910_v1 = vld [vmem:[%s2336_s1 + $0x130] sm:$0xff]   ;;  %v1897_v3 = vld [vmem:[%s2118_s13 + $0x124] ss:$28 sps:$4 sm:$0xff]  }
  0x1b   : > { %v1902_v61 = vld [vmem:[%s2336_s1 + $0x128] sm:$0xff]   ;;  %v1917_v4 = vld [vmem:[%s2336_s1 + $0x178] sm:$0xff]   ;;  %v1925_v8 = vld [vmem:[%s2336_s1 + $0x180] sm:$0xff]  }
  0x1c   : > { %1590 = vmatpush3.bf16.msra.mxu0 %v1845_v22  ;;  %v1892_v63 = vld [vmem:[%s2118_s13 + $0xe8] ss:$28 sps:$4 sm:$0xff]   ;;  %v1918_v5 = vld [vmem:[%s2336_s1 + $0x138] sm:$0xff]   ;;  %v1903_v9 = vld [vmem:[%s2118_s13 + $0x154] ss:$28 sps:$4 sm:$0xff]  }
  0x1d   : > { %1654 = vmatpush3.bf16.msra.mxu1 %v1846_v23  ;;  %1591 = vmatprep.subr.bf16.mxu0 %v1847_v24  ;;  %v1899_v6 = vld [vmem:[%s2118_s13 + $0x118] ss:$28 sps:$4 sm:$0xff]   ;;  %v1900_v7 = vld [vmem:[%s2118_s13 + $0x120] ss:$28 sps:$4 sm:$0xff]   ;;  %v1907_v11 = vld [vmem:[%s2118_s13 + $0x150] ss:$28 sps:$4 sm:$0xff]  }
  0x1e   : > { %1655 = vmatprep.subr.bf16.mxu1 %v1848_v25  ;;  %v1905_v10 = vld [vmem:[%s2118_s13 + $0x15c] ss:$28 sps:$4 sm:$0xff]   ;;  %v1911_v13 = vld [vmem:[%s2118_s13 + $0x18c] ss:$28 sps:$4 sm:$0xff]   ;;  %v1913_v14 = vld [vmem:[%s2118_s13 + $0x194] ss:$28 sps:$4 sm:$0xff]  }
  0x1f   : > { %v1908_v12 = vld [vmem:[%s2118_s13 + $0x158] ss:$28 sps:$4 sm:$0xff]   ;;  %v1915_v15 = vld [vmem:[%s2118_s13 + $0x188] ss:$28 sps:$4 sm:$0xff]   ;;  %v1916_v16 = vld [vmem:[%s2118_s13 + $0x190] ss:$28 sps:$4 sm:$0xff]  }
  0x20   : > { %1592 = vmatpush3.bf16.msra.mxu0 %v1849_v26  ;;  %v1921_v17 = vld [vmem:[%s2118_s13 + $0x14] ss:$28 sps:$4 sm:$0xff]   ;;  %v1924_v18 = vld [vmem:[%s2118_s13 + $0x164] ss:$28 sps:$4 sm:$0xff]   ;;  %v1926_v21 = vld [vmem:[%s2118_s13 + $0x4c] ss:$28 sps:$4 sm:$0xff]  }
  0x21   : > { %1656 = vmatpush3.bf16.msra.mxu1 %v1850_v27  ;;  %1593 = vmatprep.subr.bf16.mxu0 %v1851_v28  ;;  %v1919_v19 = vld [vmem:[%s2118_s13 + $0x10] ss:$28 sps:$4 sm:$0xff]   ;;  %v1922_v20 = vld [vmem:[%s2118_s13 + $0x160] ss:$28 sps:$4 sm:$0xff]   ;;  %v1930_v23 = vld [vmem:[%s2118_s13 + $0x48] ss:$28 sps:$4 sm:$0xff]  }
  0x22   : > { %1657 = vmatprep.subr.bf16.mxu1 %v1852_v29  ;;  %v1928_v22 = vld [vmem:[%s2118_s13 + $0x19c] ss:$28 sps:$4 sm:$0xff]   ;;  %v1932_v25 = vld [vmem:[%s2118_s13 + $0x84] ss:$28 sps:$4 sm:$0xff]   ;;  %v1936_v28 = vld [vmem:[%s2118_s13 + $0x50] ss:$28 sps:$4 sm:$0xff]  }
  0x23   : > { %v1931_v24 = vld [vmem:[%s2118_s13 + $0x198] ss:$28 sps:$4 sm:$0xff]   ;;  %v1935_v27 = vld [vmem:[%s2118_s13 + $0x80] ss:$28 sps:$4 sm:$0xff]   ;;  %v1945_v35 = vld [vmem:[%s2118_s13 + $0xf0] ss:$28 sps:$4 sm:$0xff]  }
  0x24   : > { %1594 = vmatpush3.bf16.msra.mxu0 %v1853_v30  ;;  %v1934_v26 = vld [vmem:[%s2118_s13 + $0x18] ss:$28 sps:$4 sm:$0xff]   ;;  %v1939_v30 = vld [vmem:[%s2118_s13 + $0x88] ss:$28 sps:$4 sm:$0xff]  }
  0x25   : > { %1658 = vmatpush3.bf16.msra.mxu1 %v1854_v31  ;;  %1707 = vmatprep.subr.bf16.mxu0 %v1861_v36  ;;  %v1937_v29 = vld [vmem:[%s2118_s13 + $0xbc] ss:$28 sps:$4 sm:$0xff]   ;;  %v1942_v33 = vld [vmem:[%s2118_s13 + $0xf4] ss:$28 sps:$4 sm:$0xff]  }
  0x26   : > { %1798 = vmatprep.subr.bf16.mxu1 %v1861_v36  ;;  %v1940_v31 = vld [vmem:[%s2118_s13 + $0xb8] ss:$28 sps:$4 sm:$0xff]   ;;  %v1946_v36 = vld [vmem:[%s2118_s13 + $0x130] ss:$28 sps:$4 sm:$0xff]  }
  0x27   : > { %979 = vmatmul.mubr.bf16.vlgmr.msra.gmra.mrb[0].mxu0 %v1855_v32  ;;  %v1941_v32 = vld [vmem:[%s2118_s13 + $0xc0] ss:$28 sps:$4 sm:$0xff]  }
  0x28   : > { %1076 = vmatmul.mubr.bf16.vlgmr.msra.gmra.mrb[0].mxu1 %v1858_v34  ;;  %1708 = vmatpush3.bf16.msra.mxu0 %v1862_v37  ;;  %v1944_v34 = vld [vmem:[%s2118_s13 + $0xf8] ss:$28 sps:$4 sm:$0xff]  }
  0x29   : > { %1806 = vmatpush3.bf16.msra.mxu1 %v1862_v37  ;;  %986 = vmatprep.mubr.bf16.mxu0 %v1863_v38  ;;  %v1947_v37 = vld [vmem:[%s2118_s13 + $0x12c] ss:$28 sps:$4 sm:$0xff]  }
  0x2a   : > { %1083 = vmatprep.mubr.bf16.mxu1 %v1865_v39  ;;  %1709 = vmatprep.subr.bf16.mxu0 %v1869_v42  ;;  %v1949_v38 = vld [vmem:[%s2118_s13 + $0x168] ss:$28 sps:$4 sm:$0xff]  }
  0x2b   : > { %1799 = vmatprep.subr.bf16.mxu1 %v1869_v42  ;;  %v1950_v39 = vld [vmem:[%s2118_s13 + $0x128] ss:$28 sps:$4 sm:$0xff]   ;;  %v2244_v42 = vld [vmem:[%s2337_s2] ss:$0 sm:$0xff] }
  0x2c   : > { %1710 = vmatpush3.bf16.msra.mxu0 %v1870_v43 }
  0x2d   : > { %1807 = vmatpush3.bf16.msra.mxu1 %v1870_v43  ;;  %1711 = vmatprep.subr.bf16.mxu0 %v1877_v46 }
  0x2e   : > { %1800 = vmatprep.subr.bf16.mxu1 %v1877_v46 }
  0x2f   : > { %987 = vmatmul.mubr.bf16.gmra.mrb[4].mxu0 %v1867_v40  ;;  %v1951_v40 = vld [vmem:[%s2118_s13 + $0x1a0] ss:$28 sps:$4 sm:$0xff]   ;;  %s1462_s13 = sshll.u32 %s2340_s19, 3 }
  0x30   : > { %1084 = vmatmul.mubr.bf16.gmra.mrb[4].mxu1 %v1868_v41  ;;  %994 = vmatprep.mubr.bf16.mxu0 %v1871_v44  ;;  %s2306_s22 = scalar_lea.vmem %s2338_s3, %s1462_s13 }
  0x31   : > { %1091 = vmatprep.mubr.bf16.mxu1 %v1873_v45  ;;  %1712 = vmatpush3.bf16.msra.mxu0 %v1878_v47 }
  0x32   : > { %1808 = vmatpush3.bf16.msra.mxu1 %v1878_v47  ;;  %1713 = vmatprep.subr.bf16.mxu0 %v1885_v52 }
  0x33   : > { %1801 = vmatprep.subr.bf16.mxu1 %v1885_v52 }
  0x35   : > { %1714 = vmatpush3.bf16.msra.mxu0 %v1886_v53 }
  0x36   : > { %1809 = vmatpush3.bf16.msra.mxu1 %v1886_v53  ;;  %1715 = vmatprep.subr.bf16.mxu0 %v1893_v54 }
  0x37   : > { %995 = vmatmul.mubr.bf16.gmra.mrb[8].mxu0 %v1875_v48  ;;  %1802 = vmatprep.subr.bf16.mxu1 %v1893_v54 }
  0x38   : > { %1092 = vmatmul.mubr.bf16.gmra.mrb[8].mxu1 %v1876_v49  ;;  %1002 = vmatprep.mubr.bf16.mxu0 %v1879_v50 }
  0x39   : > { %1099 = vmatprep.mubr.bf16.mxu1 %v1881_v51  ;;  %1716 = vmatpush3.bf16.msra.mxu0 %v1894_v55 }
  0x3a   : > { %1810 = vmatpush3.bf16.msra.mxu1 %v1894_v55  ;;  %1717 = vmatprep.subr.bf16.mxu0 %v1901_v60 }
  0x3b   : > { %1803 = vmatprep.subr.bf16.mxu1 %v1901_v60 }
  0x3d   : > { %1718 = vmatpush3.bf16.msra.mxu0 %v1902_v61 }
  0x3e   : > { %1811 = vmatpush3.bf16.msra.mxu1 %v1902_v61  ;;  %1719 = vmatprep.subr.bf16.mxu0 %v1909_v0 }
  0x3f   : > { %1003 = vmatmul.mubr.bf16.gmra.mrb[12].mxu0 %v1883_v56  ;;  %1804 = vmatprep.subr.bf16.mxu1 %v1909_v0 }
  0x40   : > { %1100 = vmatmul.mubr.bf16.gmra.mrb[12].mxu1 %v1884_v57  ;;  %1010 = vmatprep.mubr.bf16.mxu0 %v1887_v58 }
  0x41   : > { %1107 = vmatprep.mubr.bf16.mxu1 %v1889_v59  ;;  %1720 = vmatpush3.bf16.msra.mxu0 %v1910_v1 }
  0x42   : > { %1812 = vmatpush3.bf16.msra.mxu1 %v1910_v1  ;;  %1721 = vmatprep.subr.bf16.mxu0 %v1917_v4 }
  0x43   : > { %1805 = vmatprep.subr.bf16.mxu1 %v1917_v4 }
  0x45   : > { %1722 = vmatpush3.bf16.msra.mxu0 %v1918_v5 }
  0x46   : > { %1813 = vmatpush3.bf16.msra.mxu1 %v1918_v5 }
  0x47   : > { %1011 = vmatmul.mubr.bf16.gmra.mrb[16].mxu0 %v1891_v62  ;;  %1780 = vmatprep.subr.bf16.mxu1 %v1925_v8 }
  0x48   : > { %1108 = vmatmul.mubr.bf16.gmra.mrb[16].mxu1 %v1892_v63  ;;  %1018 = vmatprep.mubr.bf16.mxu0 %v1895_v2 }
  0x49   : > { %1115 = vmatprep.mubr.bf16.mxu1 %v1897_v3 }
  0x4f   : > { %1019 = vmatmul.mubr.bf16.gmra.mrb[20].mxu0 %v1899_v6 }
  0x50   : > { %1116 = vmatmul.mubr.bf16.gmra.mrb[20].mxu1 %v1900_v7  ;;  %1026 = vmatprep.mubr.bf16.mxu0 %v1903_v9 }
  0x51   : > { %1123 = vmatprep.mubr.bf16.mxu1 %v1905_v10 }
  0x57   : > { %1027 = vmatmul.mubr.bf16.gmra.mrb[24].mxu0 %v1907_v11 }
  0x58   : > { %1124 = vmatmul.mubr.bf16.gmra.mrb[24].mxu1 %v1908_v12  ;;  %1034 = vmatprep.mubr.bf16.mxu0 %v1911_v13 }
  0x59   : > { %1131 = vmatprep.mubr.bf16.mxu1 %v1913_v14 }
  0x5f   : > { %1035 = vmatmul.mubr.bf16.gmra.mrb[28].mxu0 %v1915_v15 }
  0x60   : > { %1132 = vmatmul.mubr.bf16.gmra.mrb[28].mxu1 %v1916_v16  ;;  %1172 = vmatprep.mubr.bf16.mxu0 %v1921_v17 }
  0x61   : > { %1220 = vmatprep.mubr.bf16.mxu1 %v1924_v18 }
  0x67   : > { %1173 = vmatmul.mubr.bf16.vlgmr.msra.gmra.mrb[32].mxu0 %v1919_v19 }
  0x68   : > { %1221 = vmatmul.mubr.bf16.vlgmr.msra.gmra.mrb[32].mxu1 %v1922_v20  ;;  %1180 = vmatprep.mubr.bf16.mxu0 %v1926_v21 }
  0x69   : > { %1781 = vmatpush3.bf16.msra.mxu1 %v1925_v8  ;;  %1228 = vmatprep.mubr.bf16.mxu1 %v1928_v22 }
  0x6f   : > { %1181 = vmatmul.mubr.bf16.gmra.mrb[36].mxu0 %v1930_v23 }
  0x70   : > { %1229 = vmatmul.mubr.bf16.gmra.mrb[36].mxu1 %v1931_v24  ;;  %1188 = vmatprep.mubr.bf16.mxu0 %v1932_v25 }
  0x71   : > { %1782 = vmatprep.mubr.msk.bf16.mxu1 %vm921_vm0, %v1934_v26 }
  0x77   : > { %1189 = vmatmul.mubr.bf16.gmra.mrb[40].mxu0 %v1935_v27 }
  0x78   : > { %1783 = vmatmul.mubr.msk.bf16.vlgmr.msra.gmra.mrb[40].mxu1 %vm921_vm0, %v1936_v28  ;;  %1196 = vmatprep.mubr.bf16.mxu0 %v1937_v29 }
  0x79   : > { %1786 = vmatprep.mubr.msk.bf16.mxu1 %vm921_vm0, %v1939_v30 }
  0x7f   : > { %1197 = vmatmul.mubr.bf16.gmra.mrb[44].mxu0 %v1940_v31 }
  0x80   : > { %1787 = vmatmul.mubr.msk.bf16.gmra.mrb[44].mxu1 %vm921_vm0, %v1941_v32  ;;  %1204 = vmatprep.mubr.bf16.mxu0 %v1942_v33 }
  0x81   : > { %1790 = vmatprep.mubr.msk.bf16.mxu1 %vm921_vm0, %v1944_v34 }
  0x87   : > { %1205 = vmatmul.mubr.bf16.gmra.mrb[48].mxu0 %v1945_v35 }
  0x88   : > { %1791 = vmatmul.mubr.msk.bf16.gmra.mrb[48].mxu1 %vm921_vm0, %v1946_v36  ;;  %1212 = vmatprep.mubr.bf16.mxu0 %v1947_v37 }
  0x89   : > { %1794 = vmatprep.mubr.msk.bf16.mxu1 %vm921_vm0, %v1949_v38 }
  0x8f   : > { %1213 = vmatmul.mubr.bf16.gmra.mrb[52].mxu0 %v1950_v39 }
  0x90   : > { %1795 = vmatmul.mubr.msk.bf16.gmra.mrb[52].mxu1 %vm921_vm0, %v1951_v40 }
  0xfa   : > { %v1595_v41 = vpop.f32.mrb[0].mxu0 }
  0xfb   : > { %v1596_v43 = vpop.f32.mrb[1].mxu0  ;;  %v1659_v44 = vpop.f32.mrb[0].mxu1 }
  0xfc   : > { %v1597_v45 = vadd.f32 %v1596_v43, %v1595_v41  ;;  %v1598_v46 = vpop.f32.mrb[2].mxu0  ;;  %v1660_v47 = vpop.f32.mrb[1].mxu1 }
  0xfd   : > { %v1599_v48 = vpop.f32.mrb[3].mxu0  ;;  %v1661_v49 = vadd.f32 %v1660_v47, %v1659_v44  ;;  %v1662_v50 = vpop.f32.mrb[2].mxu1 }
  0xfe   : > { %v981_v51 = vadd.f32 %v1597_v45, %v2244_v42  ;;  %v1600_v52 = vadd.f32 %v1599_v48, %v1598_v46  ;;  %v1663_v53 = vpop.f32.mrb[3].mxu1 }
  0xff   : > { %v1664_v54 = vadd.f32 %v1663_v53, %v1662_v50 }
 0x100   : > { %v984_v55 = vadd.f32 %v1600_v52, %v2244_v42  ;;  %v2248_v56 = vadd.f32 %v1661_v49, %v981_v51 }
 0x102   : > { %v2250_v57 = vadd.f32 %v1664_v54, %v984_v55  ;;  %v1601_v58 = vpop.f32.mrb[4].mxu0 }
 0x103   : > { %v1602_v59 = vpop.f32.mrb[5].mxu0  ;;  %v1665_v60 = vpop.f32.mrb[4].mxu1 }
 0x104   : > { %v1603_v61 = vadd.f32 %v1602_v59, %v1601_v58  ;;  %v1604_v62 = vpop.f32.mrb[6].mxu0  ;;  %v1666_v63 = vpop.f32.mrb[5].mxu1 }
 0x105   : > { %v1605_v0 = vpop.f32.mrb[7].mxu0  ;;  %v1667_v1 = vadd.f32 %v1666_v63, %v1665_v60  ;;  %v1668_v2 = vpop.f32.mrb[6].mxu1 }
 0x106   : > { %v989_v3 = vadd.f32 %v1603_v61, %v2244_v42  ;;  %v1606_v4 = vadd.f32 %v1605_v0, %v1604_v62  ;;  %v1669_v5 = vpop.f32.mrb[7].mxu1 }
 0x107   : > { %v1670_v6 = vadd.f32 %v1669_v5, %v1668_v2 }
 0x108   : > { %v992_v7 = vadd.f32 %v1606_v4, %v2244_v42  ;;  %v2254_v8 = vadd.f32 %v1667_v1, %v989_v3 }
 0x10a   : > { %v2256_v9 = vadd.f32 %v1670_v6, %v992_v7  ;;  %v1607_v10 = vpop.f32.mrb[8].mxu0 }
 0x10b   : > { %v1608_v11 = vpop.f32.mrb[9].mxu0  ;;  %v1671_v12 = vpop.f32.mrb[8].mxu1 }
 0x10c   : > { %v1609_v13 = vadd.f32 %v1608_v11, %v1607_v10  ;;  %v1610_v14 = vpop.f32.mrb[10].mxu0  ;;  %v1672_v15 = vpop.f32.mrb[9].mxu1 }
 0x10d   : > { %v1611_v16 = vpop.f32.mrb[11].mxu0  ;;  %v1673_v17 = vadd.f32 %v1672_v15, %v1671_v12  ;;  %v1674_v18 = vpop.f32.mrb[10].mxu1 }
 0x10e   : > { %v997_v19 = vadd.f32 %v1609_v13, %v2244_v42  ;;  %v1612_v20 = vadd.f32 %v1611_v16, %v1610_v14  ;;  %v1675_v21 = vpop.f32.mrb[11].mxu1 }
 0x10f   : > { %v1676_v22 = vadd.f32 %v1675_v21, %v1674_v18 }
 0x110   : > { %v1000_v23 = vadd.f32 %v1612_v20, %v2244_v42  ;;  %v2260_v24 = vadd.f32 %v1673_v17, %v997_v19 }
 0x112   : > { %v2262_v25 = vadd.f32 %v1676_v22, %v1000_v23  ;;  %v1613_v26 = vpop.f32.mrb[12].mxu0 }
 0x113   : > { %v1614_v27 = vpop.f32.mrb[13].mxu0  ;;  %v1677_v28 = vpop.f32.mrb[12].mxu1 }
 0x114   : > { %v1615_v29 = vadd.f32 %v1614_v27, %v1613_v26  ;;  %v1616_v30 = vpop.f32.mrb[14].mxu0  ;;  %v1678_v31 = vpop.f32.mrb[13].mxu1 }
 0x115   : > { %v1617_v32 = vpop.f32.mrb[15].mxu0  ;;  %v1679_v33 = vadd.f32 %v1678_v31, %v1677_v28  ;;  %v1680_v34 = vpop.f32.mrb[14].mxu1 }
 0x116   : > { %v1005_v35 = vadd.f32 %v1615_v29, %v2244_v42  ;;  %v1618_v36 = vadd.f32 %v1617_v32, %v1616_v30  ;;  %v1681_v37 = vpop.f32.mrb[15].mxu1 }
 0x117   : > { %v1682_v38 = vadd.f32 %v1681_v37, %v1680_v34 }
 0x118   : > { %v1008_v39 = vadd.f32 %v1618_v36, %v2244_v42  ;;  %v2266_v40 = vadd.f32 %v1679_v33, %v1005_v35 }
 0x11a   : > { %v2268_v41 = vadd.f32 %v1682_v38, %v1008_v39  ;;  %v1619_v43 = vpop.f32.mrb[16].mxu0 }
 0x11b   : > { %v1620_v44 = vpop.f32.mrb[17].mxu0  ;;  %v1683_v45 = vpop.f32.mrb[16].mxu1 }
 0x11c   : > { %v1621_v46 = vadd.f32 %v1620_v44, %v1619_v43  ;;  %v1622_v47 = vpop.f32.mrb[18].mxu0  ;;  %v1684_v48 = vpop.f32.mrb[17].mxu1 }
 0x11d   : > { %v1623_v49 = vpop.f32.mrb[19].mxu0  ;;  %v1685_v50 = vadd.f32 %v1684_v48, %v1683_v45  ;;  %v1686_v51 = vpop.f32.mrb[18].mxu1 }
 0x11e   : > { %v1013_v52 = vadd.f32 %v1621_v46, %v2244_v42  ;;  %v1624_v53 = vadd.f32 %v1623_v49, %v1622_v47  ;;  %v1687_v54 = vpop.f32.mrb[19].mxu1 }
 0x11f   : > { %v1688_v55 = vadd.f32 %v1687_v54, %v1686_v51 }
 0x120   : > { %v1016_v58 = vadd.f32 %v1624_v53, %v2244_v42  ;;  %v2272_v59 = vadd.f32 %v1685_v50, %v1013_v52 }
 0x122   : > { %v2274_v60 = vadd.f32 %v1688_v55, %v1016_v58  ;;  %v1625_v61 = vpop.f32.mrb[20].mxu0 }
 0x123   : > { %v1626_v62 = vpop.f32.mrb[21].mxu0  ;;  %v1689_v63 = vpop.f32.mrb[20].mxu1 }
 0x124   : > { %v1627_v0 = vadd.f32 %v1626_v62, %v1625_v61  ;;  %v1628_v1 = vpop.f32.mrb[22].mxu0  ;;  %v1690_v2 = vpop.f32.mrb[21].mxu1 }
 0x125   : > { %v1629_v3 = vpop.f32.mrb[23].mxu0  ;;  %v1691_v4 = vadd.f32 %v1690_v2, %v1689_v63  ;;  %v1692_v5 = vpop.f32.mrb[22].mxu1 }
 0x126   : > { %v1021_v6 = vadd.f32 %v1627_v0, %v2244_v42  ;;  %v1630_v7 = vadd.f32 %v1629_v3, %v1628_v1  ;;  %v1693_v10 = vpop.f32.mrb[23].mxu1 }
 0x127   : > { %v1694_v11 = vadd.f32 %v1693_v10, %v1692_v5 }
 0x128   : > { %v1024_v12 = vadd.f32 %v1630_v7, %v2244_v42  ;;  %v2278_v13 = vadd.f32 %v1691_v4, %v1021_v6 }
 0x12a   : > { %v2280_v14 = vadd.f32 %v1694_v11, %v1024_v12  ;;  %v1631_v15 = vpop.f32.mrb[24].mxu0 }
 0x12b   : > { %v1632_v16 = vpop.f32.mrb[25].mxu0  ;;  %v1695_v17 = vpop.f32.mrb[24].mxu1 }
 0x12c   : > { %v1633_v18 = vadd.f32 %v1632_v16, %v1631_v15  ;;  %v1634_v19 = vpop.f32.mrb[26].mxu0  ;;  %v1696_v20 = vpop.f32.mrb[25].mxu1 }
 0x12d   : > { %v1635_v21 = vpop.f32.mrb[27].mxu0  ;;  %v1697_v22 = vadd.f32 %v1696_v20, %v1695_v17  ;;  %v1698_v23 = vpop.f32.mrb[26].mxu1 }
 0x12e   : > { %v1029_v26 = vadd.f32 %v1633_v18, %v2244_v42  ;;  %v1636_v27 = vadd.f32 %v1635_v21, %v1634_v19  ;;  %v1699_v28 = vpop.f32.mrb[27].mxu1 }
 0x12f   : > { %v1700_v29 = vadd.f32 %v1699_v28, %v1698_v23 }
 0x130   : > { %v1032_v30 = vadd.f32 %v1636_v27, %v2244_v42  ;;  %v1126_v31 = vadd.f32 %v1697_v22, %v1029_v26 }
 0x132   : > { %v1129_v32 = vadd.f32 %v1700_v29, %v1032_v30  ;;  %v1637_v33 = vpop.f32.mrb[28].mxu0 }
 0x133   : > { %v1638_v34 = vpop.f32.mrb[29].mxu0  ;;  %v1701_v35 = vpop.f32.mrb[28].mxu1 }
 0x134   : > { %v1639_v36 = vadd.f32 %v1638_v34, %v1637_v33  ;;  %v1640_v37 = vpop.f32.mrb[30].mxu0  ;;  %v1702_v38 = vpop.f32.mrb[29].mxu1 }
 0x135   : > { %v1641_v39 = vpop.f32.mrb[31].mxu0  ;;  %v1703_v43 = vadd.f32 %v1702_v38, %v1701_v35  ;;  %v1704_v44 = vpop.f32.mrb[30].mxu1 }
 0x136   : > { %v1037_v45 = vadd.f32 %v1639_v36, %v2244_v42  ;;  %v1642_v46 = vadd.f32 %v1641_v39, %v1640_v37  ;;  %v1705_v47 = vpop.f32.mrb[31].mxu1 }
 0x137   : > { %v1706_v48 = vadd.f32 %v1705_v47, %v1704_v44 }
 0x138   : > { %v1040_v49 = vadd.f32 %v1642_v46, %v2244_v42  ;;  %v1134_v50 = vadd.f32 %v1703_v43, %v1037_v45 }
 0x13a   : > { %v1137_v51 = vadd.f32 %v1706_v48, %v1040_v49  ;;  %v1723_v52 = vpop.f32.mrb[32].mxu0 }
 0x13b   : > { %v1759_v53 = vpop.f32.mrb[32].mxu1  ;;  %v1724_v54 = vpop.f32.mrb[33].mxu0 }
 0x13c   : > { %v1725_v55 = vadd.f32 %v1724_v54, %v1723_v52  ;;  %v1760_v58 = vpop.f32.mrb[33].mxu1  ;;  %v1726_v61 = vpop.f32.mrb[34].mxu0 }
 0x13d   : > { %v1761_v62 = vadd.f32 %v1760_v58, %v1759_v53  ;;  %v1762_v63 = vpop.f32.mrb[34].mxu1  ;;  %v1727_v0 = vpop.f32.mrb[35].mxu0 }
 0x13e   : > { %v1728_v1 = vadd.f32 %v1727_v0, %v1726_v61  ;;  %v1763_v2 = vpop.f32.mrb[35].mxu1  ;;  %v1175_v3 = vadd.f32 %v1725_v55, %v2248_v56 }
 0x13f   : > { %v1764_v4 = vadd.f32 %v1763_v2, %v1762_v63  ;;  %v2287_v5 = vadd.f32 %v1761_v62, %v1126_v31 }
 0x140   : > { %v1178_v42 = vadd.f32 %v1728_v1, %v2250_v57 }
 0x141   : > { %v2290_v6 = vadd.f32 %v1764_v4, %v1129_v32 }
 0x142   : > { %v1729_v7 = vpop.f32.mrb[36].mxu0 }
 0x143   : > { %v1765_v10 = vpop.f32.mrb[36].mxu1  ;;  %v1730_v11 = vpop.f32.mrb[37].mxu0 }
 0x144   : > { %v1731_v12 = vadd.f32 %v1730_v11, %v1729_v7  ;;  %v1766_v15 = vpop.f32.mrb[37].mxu1  ;;  %v1732_v16 = vpop.f32.mrb[38].mxu0 }
 0x145   : > { %v1767_v17 = vadd.f32 %v1766_v15, %v1765_v10  ;;  %v1768_v18 = vpop.f32.mrb[38].mxu1  ;;  %v1733_v19 = vpop.f32.mrb[39].mxu0 }
 0x146   : > { %v1734_v20 = vadd.f32 %v1733_v19, %v1732_v16  ;;  %v1769_v21 = vpop.f32.mrb[39].mxu1  ;;  %v1183_v56 = vadd.f32 %v1731_v12, %v2254_v8 }
 0x147   : > { %v1770_v22 = vadd.f32 %v1769_v21, %v1768_v18  ;;  %v2293_v23 = vadd.f32 %v1767_v17, %v1134_v50 }
 0x148   : > { %v1186_v57 = vadd.f32 %v1734_v20, %v2256_v9 }
 0x149   : > { %v2296_v26 = vadd.f32 %v1770_v22, %v1137_v51 }
 0x14a   : > { %v1735_v27 = vpop.f32.mrb[40].mxu0 }
 0x14b   : > { %v1784_v28 = vpop.f32.mrb[40].mxu1  ;;  %v1736_v29 = vpop.f32.mrb[41].mxu0 }
 0x14c   : > { %v1280_v30 = vadd.f32 %v1784_v28, %v1183_v56  ;;  %v1737_v31 = vadd.f32 %v1736_v29, %v1735_v27  ;;  %v1271_v32 = vpop.f32.mrb[41].mxu1  ;;  %v1738_v33 = vpop.f32.mrb[42].mxu0 }
 0x14d   : > { %v1272_v34 = vadd.f32 %v1271_v32, %v1175_v3  ;;  %v1785_v35 = vpop.f32.mrb[42].mxu1  ;;  %v1739_v36 = vpop.f32.mrb[43].mxu0 }
 0x14e   : > { %1952 = vtanh.f32 %v1280_v30  ;;  %v1283_v37 = vadd.f32 %v1785_v35, %v1186_v57  ;;  %v1740_v8 = vadd.f32 %v1739_v36, %v1738_v33  ;;  %v1274_v38 = vpop.f32.mrb[43].mxu1  ;;  %v1191_v39 = vadd.f32 %v1737_v31, %v2260_v24 }
 0x14f   : > { %1954 = vtanh.f32 %v1272_v34  ;;  %v1275_v9 = vadd.f32 %v1274_v38, %v1178_v42 }
 0x150   : > { %1956 = vtanh.f32 %v1283_v37  ;;  %v1194_v43 = vadd.f32 %v1740_v8, %v2262_v25 }
 0x151   : > { %1958 = vtanh.f32 %v1275_v9 }
 0x152   : > { %v1741_v44 = vpop.f32.mrb[44].mxu0 }
 0x153   : > { %v1788_v45 = vpop.f32.mrb[44].mxu1  ;;  %v1742_v46 = vpop.f32.mrb[45].mxu0 }
 0x154   : > { %v1743_v47 = vadd.f32 %v1742_v46, %v1741_v44  ;;  %v1287_v48 = vpop.f32.mrb[45].mxu1  ;;  %v1744_v49 = vpop.f32.mrb[46].mxu0 }
 0x155   : > { %v1288_v50 = vadd.f32 %v1287_v48, %v1191_v39  ;;  %v1789_v51 = vpop.f32.mrb[46].mxu1  ;;  %v1745_v52 = vpop.f32.mrb[47].mxu0 }
 0x156   : > { %v1199_v53 = vadd.f32 %v1743_v47, %v2266_v40  ;;  %v1746_v54 = vadd.f32 %v1745_v52, %v1744_v49  ;;  %v1290_v24 = vpop.f32.mrb[47].mxu1 }
 0x157   : > { %1960 = vtanh.f32 %v1288_v50  ;;  %v1291_v55 = vadd.f32 %v1290_v24, %v1194_v43 }
 0x158   : > { %v1953_v58 = vpop.eup %1952  ;;  %v1296_v61 = vadd.f32 %v1788_v45, %v1199_v53  ;;  %v1202_v25 = vadd.f32 %v1746_v54, %v2268_v41 }
 0x159   : > { %v1955_v62 = vpop.eup %1954  ;;  %v1352_v63 = vmul.f32 0.5, %v1953_v58  ;;  %1962 = vtanh.f32 %v1291_v55 }
 0x15a   : > { %v1957_v0 = vpop.eup %1956  ;;  %v1350_v40 = vmul.f32 0.5, %v1955_v62  ;;  %1964 = vtanh.f32 %v1296_v61  ;;  %v1299_v1 = vadd.f32 %v1789_v51, %v1202_v25  ;;  %v1747_v2 = vpop.f32.mrb[48].mxu0 }
 0x15b   : > { %v1959_v3 = vpop.eup %1958  ;;  %v1368_v4 = vadd.f32 0.5, %v1352_v63  ;;  %v1353_v42 = vmul.f32 0.5, %v1957_v0  ;;  %v1748_v7 = vpop.f32.mrb[49].mxu0 }
 0x15c   : > { %v1792_v41 = vpop.f32.mrb[48].mxu1  ;;  %v1366_v10 = vadd.f32 0.5, %v1350_v40  ;;  %v1351_v11 = vmul.f32 0.5, %v1959_v3  ;;  %1966 = vtanh.f32 %v1299_v1  ;;  %v1749_v12 = vadd.f32 %v1748_v7, %v1747_v2  ;;  %v1750_v15 = vpop.f32.mrb[50].mxu0 }
 0x15d   : > { %v1303_v16 = vpop.f32.mrb[49].mxu1  ;;  %1384 = vst [vmem:[%s2306_s22 + $0x10] sm:$0xff] %v1368_v4  ;;  %v1369_v17 = vadd.f32 0.5, %v1353_v42  ;;  %v1751_v18 = vpop.f32.mrb[51].mxu0 }
 0x15e   : > { %v1793_v19 = vpop.f32.mrb[50].mxu1  ;;  %1382 = vst [vmem:[%s2306_s22] sm:$0xff] %v1366_v10  ;;  %v1367_v20 = vadd.f32 0.5, %v1351_v11  ;;  %v1752_v21 = vadd.f32 %v1751_v18, %v1750_v15  ;;  %v1207_v56 = vadd.f32 %v1749_v12, %v2272_v59 }
 0x15f   : > { %v1306_v22 = vpop.f32.mrb[51].mxu1  ;;  %1385 = vst [vmem:[%s2306_s22 + $0x18] sm:$0xff] %v1369_v17 }
 0x160   : > { %1383 = vst [vmem:[%s2306_s22 + $0x8] sm:$0xff] %v1367_v20  ;;  %v1304_v57 = vadd.f32 %v1303_v16, %v1207_v56  ;;  %v1210_v27 = vadd.f32 %v1752_v21, %v2274_v60 }
 0x161   : > { %v1961_v28 = vpop.eup %1960 }
 0x162   : > { %v1354_v29 = vmul.f32 0.5, %v1961_v28  ;;  %1968 = vtanh.f32 %v1304_v57  ;;  %v1307_v30 = vadd.f32 %v1306_v22, %v1210_v27  ;;  %v1753_v31 = vpop.f32.mrb[52].mxu0 }
 0x163   : > { %v1963_v32 = vpop.eup %1962  ;;  %v1796_v33 = vpop.f32.mrb[52].mxu1 }
 0x164   : > { %v1754_v34 = vpop.f32.mrb[53].mxu0  ;;  %v1965_v35 = vpop.eup %1964  ;;  %v1370_v36 = vadd.f32 0.5, %v1354_v29  ;;  %v1355_v37 = vmul.f32 0.5, %v1963_v32  ;;  %1970 = vtanh.f32 %v1307_v30  ;;  %v1328_v59 = vadd.f32 %v1796_v33, %v2293_v23 }
 0x165   : > { %v1319_v8 = vpop.f32.mrb[53].mxu1  ;;  %v1756_v38 = vpop.f32.mrb[54].mxu0  ;;  %v1356_v39 = vmul.f32 0.5, %v1965_v35  ;;  %v1755_v60 = vadd.f32 %v1754_v34, %v1753_v31 }
 0x166   : > { %v1320_v9 = vadd.f32 %v1319_v8, %v2287_v5  ;;  %v1797_v43 = vpop.f32.mrb[54].mxu1  ;;  %v1757_v44 = vpop.f32.mrb[55].mxu0  ;;  %1386 = vst [vmem:[%s2306_s22 + $0x20] sm:$0xff] %v1370_v36  ;;  %v1371_v46 = vadd.f32 0.5, %v1355_v37  ;;  %1972 = vtanh.f32 %v1328_v59 }
 0x167   : > { %v1967_v45 = vpop.eup %1966  ;;  %v1331_v47 = vadd.f32 %v1797_v43, %v2296_v26  ;;  %v1758_v48 = vadd.f32 %v1757_v44, %v1756_v38  ;;  %v1322_v49 = vpop.f32.mrb[55].mxu1  ;;  %v1372_v23 = vadd.f32 0.5, %v1356_v39  ;;  %v1215_v51 = vadd.f32 %v1755_v60, %v2278_v13 }
 0x168   : > { %v1357_v50 = vmul.f32 0.5, %v1967_v45  ;;  %1974 = vtanh.f32 %v1320_v9  ;;  %1387 = vst [vmem:[%s2306_s22 + $0x28] sm:$0xff] %v1371_v46  ;;  %v1323_v52 = vadd.f32 %v1322_v49, %v2290_v6 }
 0x169   : > { %1976 = vtanh.f32 %v1331_v47  ;;  %v1218_v5 = vadd.f32 %v1758_v48, %v2280_v14  ;;  %1388 = vst [vmem:[%s2306_s22 + $0x30] sm:$0xff] %v1372_v23  ;;  %v1312_v54 = vadd.f32 %v1792_v41, %v1215_v51 }
 0x16a   : > { %v1373_v53 = vadd.f32 0.5, %v1357_v50  ;;  %1978 = vtanh.f32 %v1323_v52 }
 0x16b   : > { %v1315_v24 = vadd.f32 %v1793_v19, %v1218_v5  ;;  %1980 = vtanh.f32 %v1312_v54 }
 0x16c   : > { %1389 = vst [vmem:[%s2306_s22 + $0x38] sm:$0xff] %v1373_v53  ;;  %v1969_v26 = vpop.eup %1968 }
 0x16d   : > { %1982 = vtanh.f32 %v1315_v24  ;;  %v1358_v55 = vmul.f32 0.5, %v1969_v26 }
 0x16e   : > { %v1971_v13 = vpop.eup %1970 }
 0x16f   : > { %v1374_v58 = vadd.f32 0.5, %v1358_v55  ;;  %v1359_v61 = vmul.f32 0.5, %v1971_v13 }
 0x170   : > { %v1973_v25 = vpop.eup %1972 }
 0x171   : > { %1390 = vst [vmem:[%s2306_s22 + $0x40] sm:$0xff] %v1374_v58  ;;  %v1375_v6 = vadd.f32 0.5, %v1359_v61  ;;  %v1364_v62 = vmul.f32 0.5, %v1973_v25 }
 0x172   : > { %v1975_v14 = vpop.eup %1974 }
 0x173   : > { %v1977_v63 = vpop.eup %1976  ;;  %v1362_v0 = vmul.f32 0.5, %v1975_v14  ;;  %1391 = vst [vmem:[%s2306_s22 + $0x48] sm:$0xff] %v1375_v6  ;;  %v1380_v40 = vadd.f32 0.5, %v1364_v62 }
 0x174   : > { %v1365_v1 = vmul.f32 0.5, %v1977_v63  ;;  %v1979_v2 = vpop.eup %1978 }
 0x175   : > { %v1378_v3 = vadd.f32 0.5, %v1362_v0  ;;  %v1981_v4 = vpop.eup %1980  ;;  %1396 = vst [vmem:[%s2306_s22 + $0x70] sm:$0xff] %v1380_v40  ;;  %v1363_v7 = vmul.f32 0.5, %v1979_v2 }
 0x176   : > { %v1381_v42 = vadd.f32 0.5, %v1365_v1  ;;  %v1360_v10 = vmul.f32 0.5, %v1981_v4 }
 0x177   : > { %v1983_v41 = vpop.eup %1982  ;;  %1394 = vst [vmem:[%s2306_s22 + $0x60] sm:$0xff] %v1378_v3  ;;  %v1379_v12 = vadd.f32 0.5, %v1363_v7 }
 0x178   : > { %1397 = vst [vmem:[%s2306_s22 + $0x78] sm:$0xff] %v1381_v42  ;;  %v1361_v11 = vmul.f32 0.5, %v1983_v41  ;;  %v1376_v15 = vadd.f32 0.5, %v1360_v10 }
 0x179   : > { %1395 = vst [vmem:[%s2306_s22 + $0x68] sm:$0xff] %v1379_v12 }
 0x17a   : > { %v1377_v16 = vadd.f32 0.5, %v1361_v11  ;;  %1392 = vst [vmem:[%s2306_s22 + $0x50] sm:$0xff] %v1376_v15 }
 0x17c   : > { %1393 = vst [vmem:[%s2306_s22 + $0x58] sm:$0xff] %v1377_v16 }
 0x17d PF: > { %s13_s12 = sadd.s32 1, %s1990_s12  }
 0x17e   : > { %p10_p4 = scmp.ge.s32.totalorder %s13_s12, 6  }
 0x180   :  { %12 = sbr.rel (!%p10_p4) target bundleno = 1 (0x1), region = 62 }

</bundles_post_ra>
